<compile_context>
chip_gen: v7x
topology: tpu7x:2x2x1
jax: 0.10.0
libtpu: 0.0.40
codegen_flags: <defaults>
</compile_context>

<pallas_src>
import math
import functools

import jax
import jax.numpy as jnp
from jax import lax
from jax.experimental import pallas as pl
from jax.experimental.pallas import tpu as pltpu


BN_EPS = 1e-5
COS_EPS = 1e-12                 # torch F.normalize default eps (clamps the norm)
VMEM_LIMIT = 32 * 1024 * 1024   # explicit scoped-VMEM budget (safe on v5e/v6e/v7x)


def _full_spec(shape):
    # whole-array block for a grid=(1,) call
    return pl.BlockSpec(shape, lambda i: (0,) * len(shape))


def _bn_train(x, gamma, beta):
    # BatchNorm1d, training mode: per-feature batch mean / biased variance, affine (f32).
    mu = jnp.mean(x, axis=0, keepdims=True)
    xc = x - mu
    var = jnp.mean(xc * xc, axis=0, keepdims=True)
    return xc * lax.rsqrt(var + BN_EPS) * gamma + beta


# --------------------------------------------------------------------------------------
# Encoder kernel: 3x3 conv (pad=1) + bias + ReLU + global average pool, one image/step.
# Input layout per image: zero-padded NHWC flattened to ((H+3)*(W+2), Cin) in bf16
# (top pad 1, bottom pad 2 = halo + one slack row for the shifted flat windows).
# A flat window slice at offset dy*(W+2)+dx gives, row-for-row, the (dy,dx)-shifted input
# of every output pixel; the two garbage columns (x' in {W, W+1}) are zeroed by the GAP
# weight vector, which also carries the 1/(H*W) scale.
# --------------------------------------------------------------------------------------
def encoder_kernel(x_ref, wc_ref, bc_ref, gap_ref, h_ref, *, H, W, TR):
    R = W + 2                   # flattened row stride
    CL = TR * R                 # flattened rows per output-row chunk
    SEG = CL + 2 * R + 2        # chunk rows + halo needed by the 9 shifts
    Cout = wc_ref.shape[-1]
    n_chunks = H // TR

    gw = gap_ref[...]                                   # (CL, 1) f32: mask / (H*W)
    hacc = jnp.zeros((1, Cout), jnp.float32)            # GAP accumulator

    for c in range(n_chunks):                           # static chunk loop (small H here)
        base = c * CL
        seg = x_ref[pl.ds(base, SEG), :].astype(jnp.float32)      # (SEG, Cin)
        acc = jnp.zeros((CL, Cout), jnp.float32)
        for k in range(9):                              # 9 shifted-window matmuls (MXU)
            dy, dx = divmod(k, 3)
            off = dy * R + dx
            sl = seg[off:off + CL, :].astype(jnp.bfloat16)         # (CL, Cin) bf16
            acc = acc + jnp.dot(sl, wc_ref[k], preferred_element_type=jnp.float32)
        a = jnp.maximum(acc + bc_ref[...], 0.0)                    # bias + ReLU (f32)
        hacc = hacc + jnp.sum(a * gw, axis=0, keepdims=True)       # chunked GAP accum

    h_ref[...] = hacc                                              # (1, Cout)


def encoder_forward(xs, wc, bc, gapw, B, H, W, TR):
    # xs: (2, B, (H+3)*(W+2), Cin) bf16 ; returns h stacked as (2B, Cout) f32.
    Rtot, Cin = xs.shape[2], xs.shape[3]
    Cout = wc.shape[-1]
    kern = functools.partial(encoder_kernel, H=H, W=W, TR=TR)
    h = pl.pallas_call(
        kern,
        grid=(2, B),
        in_specs=[
            pl.BlockSpec((None, None, Rtot, Cin), lambda i, b: (i, b, 0, 0)),
            pl.BlockSpec(wc.shape, lambda i, b: (0, 0, 0)),
            pl.BlockSpec(bc.shape, lambda i, b: (0, 0)),
            pl.BlockSpec(gapw.shape, lambda i, b: (0, 0)),
        ],
        out_specs=pl.BlockSpec((None, None, 1, Cout), lambda i, b: (i, b, 0, 0)),
        out_shape=jax.ShapeDtypeStruct((2, B, 1, Cout), jnp.float32),
        compiler_params=pltpu.CompilerParams(
            dimension_semantics=("parallel", "parallel"),
            vmem_limit_bytes=VMEM_LIMIT),
    )(xs, wc, bc, gapw)
    return h.reshape(2 * B, Cout)


# --------------------------------------------------------------------------------------
# Head kernel: projector + predictor + SimSiam loss for BOTH crops stacked as (2B, 128).
# BN statistics are computed per crop half (matching the two separate projector calls).
# --------------------------------------------------------------------------------------
def head_kernel(h_ref,
                w1_ref, g1_ref, be1_ref,
                w2_ref, g2_ref, be2_ref,
                w3_ref, g3_ref, be3_ref,
                q1_ref, qg1_ref, qbe1_ref,
                q2_ref, qb2_ref,
                z_ref, loss_ref, *, B):

    def mm(x, w_ref):
        # bf16 MXU inputs, f32 accumulation
        return jnp.dot(x.astype(jnp.bfloat16), w_ref[...],
                       preferred_element_type=jnp.float32)

    def bn2(x, g_ref, b_ref):
        # per-crop BatchNorm1d (training-mode batch statistics) on the stacked batch
        g, b = g_ref[...], b_ref[...]
        return jnp.concatenate([_bn_train(x[:B], g, b),
                                _bn_train(x[B:], g, b)], axis=0)

    h = h_ref[...]                                                  # (2B, 128) f32

    # projector: (Linear(no bias) -> BN -> ReLU) x2 -> Linear(no bias) -> BN
    x = jnp.maximum(bn2(mm(h, w1_ref), g1_ref, be1_ref), 0.0)
    x = jnp.maximum(bn2(mm(x, w2_ref), g2_ref, be2_ref), 0.0)
    z = bn2(mm(x, w3_ref), g3_ref, be3_ref)                         # (2B, 128)
    z_ref[...] = z

    # predictor: Linear(no bias) -> BN -> ReLU -> Linear(+bias)
    y = jnp.maximum(bn2(mm(z, q1_ref), qg1_ref, qbe1_ref), 0.0)     # (2B, 512)
    p = mm(y, q2_ref) + qb2_ref[...]                                # (2B, 128)

    # symmetric negative cosine similarity (detach is a no-op for the forward value)
    def nrm(v):
        return v * lax.rsqrt(jnp.maximum(jnp.sum(v * v, axis=-1, keepdims=True),
                                         COS_EPS * COS_EPS))
    zn, pn = nrm(z), nrm(p)
    c = jnp.sum(pn[:B] * zn[B:] + pn[B:] * zn[:B], axis=-1, keepdims=True)   # (B, 1)
    loss_ref[...] = jnp.sum(c, axis=0, keepdims=True) * (-0.5 / B)           # (1, 1)


def head_forward(h2, params, B):
    bf16 = jnp.bfloat16
    ws = (params['p_w1'].astype(bf16), params['p_g1'], params['p_be1'],
          params['p_w2'].astype(bf16), params['p_g2'], params['p_be2'],
          params['p_w3'].astype(bf16), params['p_g3'], params['p_be3'],
          params['q_w1'].astype(bf16), params['q_g1'], params['q_be1'],
          params['q_w2'].astype(bf16), params['q_b2'])
    D = params['p_w3'].shape[1]
    kern = functools.partial(head_kernel, B=B)
    z, loss = pl.pallas_call(
        kern,
        grid=(1,),
        in_specs=[_full_spec(h2.shape)] + [_full_spec(w.shape) for w in ws],
        out_specs=[_full_spec((2 * B, D)), _full_spec((1, 1))],
        out_shape=(jax.ShapeDtypeStruct((2 * B, D), jnp.float32),
                   jax.ShapeDtypeStruct((1, 1), jnp.float32)),
        compiler_params=pltpu.CompilerParams(
            dimension_semantics=("arbitrary",),
            vmem_limit_bytes=VMEM_LIMIT),
    )(h2, *ws)
    return z, loss


# --------------------------------------------------------------------------------------
# Full SimSiam forward: h = encoder(x); z = projector(h); p = predictor(z);
#                       loss = criterion(z1.detach(), z2.detach(), p1, p2)
# returns (loss, z1, z2) like the PyTorch module.
# --------------------------------------------------------------------------------------
def simsiam_forward(params, x1, x2, _=None):
    B, Cin, H, W = x1.shape
    R = W + 2
    TR = math.gcd(H, 8)          # output rows per in-kernel chunk (divides H)
    CL = TR * R

    def prep(x):
        # NCHW -> NHWC, zero pad (top 1, bottom 2 = halo + slack row, left/right 1),
        # flatten spatial -> (B, (H+3)*(W+2), Cin).  Pure layout plumbing, no duplication.
        xt = jnp.transpose(x, (0, 2, 3, 1))
        xp = jnp.pad(xt, ((0, 0), (1, 2), (1, 1), (0, 0)))
        return xp.reshape(B, (H + 3) * R, Cin)

    xs = jnp.stack([prep(x1), prep(x2)], axis=0).astype(jnp.bfloat16)   # (2,B,Rtot,Cin)

    # GAP weight column: 1/(H*W) for real output columns, 0 for the 2 pad columns.
    col = jnp.arange(CL, dtype=jnp.int32) % R
    gapw = jnp.where(col < W, 1.0 / (H * W), 0.0).astype(jnp.float32).reshape(CL, 1)

    wc = params['enc_w'].astype(jnp.bfloat16)        # (9, Cin, 128) bf16
    bc = params['enc_b']                             # (1, 128) f32

    h2 = encoder_forward(xs, wc, bc, gapw, B, H, W, TR)   # (2B, 128) f32
    z, loss = head_forward(h2, params, B)                 # (2B, 128), (1, 1)
    return loss[0, 0], z[:B], z[B:]


# --------------------------------------------------------------------------------------
# Deterministic parameter init (lane-dense feature dims; predictor hidden = 512 per spec).
# --------------------------------------------------------------------------------------
def init_params(key, cin=3, d_enc=128, d_proj=128, pred_hidden=512):
    ks = jax.random.split(key, 6)
    f32 = jnp.float32

    def lin(k, din, dout):
        return jax.random.normal(k, (din, dout), f32) * (1.0 / math.sqrt(din))

    conv_w = jax.random.normal(ks[0], (3, 3, cin, d_enc), f32) * 0.1
    return {
        # encoder: 3x3 conv weights as (9, Cin, d_enc) + bias; encoder.fc = Identity
        'enc_w': conv_w.reshape(9, cin, d_enc),
        'enc_b': jnp.zeros((1, d_enc), f32),
        # projector
        'p_w1': lin(ks[1], d_enc, d_proj),
        'p_g1': jnp.ones((1, d_proj), f32), 'p_be1': jnp.zeros((1, d_proj), f32),
        'p_w2': lin(ks[2], d_proj, d_proj),
        'p_g2': jnp.ones((1, d_proj), f32), 'p_be2': jnp.zeros((1, d_proj), f32),
        'p_w3': lin(ks[3], d_proj, d_proj),
        'p_g3': jnp.ones((1, d_proj), f32), 'p_be3': jnp.zeros((1, d_proj), f32),
        # predictor
        'q_w1': lin(ks[4], d_proj, pred_hidden),
        'q_g1': jnp.ones((1, pred_hidden), f32), 'q_be1': jnp.zeros((1, pred_hidden), f32),
        'q_w2': lin(ks[5], pred_hidden, d_proj),
        'q_b2': jnp.zeros((1, d_proj), f32),
    }


if __name__ == "__main__":
    key = jax.random.PRNGKey(0)
    kx1, kx2, kp = jax.random.split(key, 3)

    B = 2
    # two augmented views, NCHW like PyTorch
    x1 = jax.random.normal(kx1, (B, 3, 16, 16), jnp.float32)
    x2 = jax.random.normal(kx2, (B, 3, 16, 16), jnp.float32)

    params = init_params(kp)
    fwd = jax.jit(simsiam_forward)
    loss, z1, z2 = fwd(params, x1, x2, None)
    jax.block_until_ready((loss, z1, z2))
    print("KERNEL_OK")
</pallas_src>

<mosaic_0001>
module attributes {stable_mosaic.version = 11 : i64} {
  func.func @encoder_kernel(%arg0: i32, %arg1: i32, %arg2: memref<1x1x342x3xbf16, #tpu.memory_space<vmem>>, %arg3: memref<9x3x128xbf16, #tpu.memory_space<vmem>>, %arg4: memref<1x128xf32, #tpu.memory_space<vmem>>, %arg5: memref<144x1xf32, #tpu.memory_space<vmem>>, %arg6: memref<1x1x1x128xf32, #tpu.memory_space<vmem>>) attributes {dimension_semantics = [#tpu.dimension_semantics<parallel>, #tpu.dimension_semantics<parallel>], iteration_bounds = array<i64: 2, 2>, scalar_prefetch = 0 : i64, scratch_operands = 0 : i64, tpu.core_type = #tpu.core_type<tc>, window_params = [{transform_indices = @transform_0, window_bounds = array<i64: 1, 1, 342, 3>}, {pipeline_mode = #tpu.pipeline_mode<synchronous>, transform_indices = @transform_1, window_bounds = array<i64: 9, 3, 128>}, {pipeline_mode = #tpu.pipeline_mode<synchronous>, transform_indices = @transform_2, window_bounds = array<i64: 1, 128>}, {pipeline_mode = #tpu.pipeline_mode<synchronous>, transform_indices = @transform_3, window_bounds = array<i64: 144, 1>}, {transform_indices = @transform_4, window_bounds = array<i64: 1, 1, 1, 128>}]} {
    %c0 = arith.constant 0 : index
    %c0_0 = arith.constant 0 : index
    %0 = vector.load %arg5[%c0, %c0_0] : memref<144x1xf32, #tpu.memory_space<vmem>>, vector<144x1xf32>
    %cst = arith.constant 0.000000e+00 : f32
    %1 = vector.broadcast %cst : f32 to vector<1x128xf32>
    %c0_1 = arith.constant 0 : index
    %c0_2 = arith.constant 0 : index
    %c0_3 = arith.constant 0 : index
    %c0_4 = arith.constant 0 : index
    %2 = vector.load %arg2[%c0_1, %c0_2, %c0_3, %c0_4] : memref<1x1x342x3xbf16, #tpu.memory_space<vmem>>, vector<1x1x182x3xbf16>
    %3 = vector.shape_cast %2 : vector<1x1x182x3xbf16> to vector<182x3xbf16>
    %4 = arith.extf %3 : vector<182x3xbf16> to vector<182x3xf32>
    %cst_5 = arith.constant 0.000000e+00 : f32
    %5 = vector.broadcast %cst_5 : f32 to vector<144x128xf32>
    %6 = vector.extract_strided_slice %4 {offsets = [0, 0], sizes = [144, 3], strides = [1, 1]} : vector<182x3xf32> to vector<144x3xf32>
    %7 = arith.truncf %6 : vector<144x3xf32> to vector<144x3xbf16>
    %c0_6 = arith.constant 0 : index
    %c0_7 = arith.constant 0 : index
    %c0_8 = arith.constant 0 : index
    %8 = vector.load %arg3[%c0_6, %c0_7, %c0_8] : memref<9x3x128xbf16, #tpu.memory_space<vmem>>, vector<1x3x128xbf16>
    %9 = vector.shape_cast %8 : vector<1x3x128xbf16> to vector<3x128xbf16>
    %cst_9 = arith.constant dense<0.000000e+00> : vector<144x128xf32>
    %10 = tpu.matmul %7, %9, %cst_9 {dimension_numbers = #tpu.dot_dimension_numbers<[1], [0], [0], [1], [0, 0, 1, 1], [], []>} : vector<144x3xbf16>, vector<3x128xbf16>, vector<144x128xf32> -> vector<144x128xf32>
    %11 = arith.addf %5, %10 : vector<144x128xf32>
    %12 = vector.extract_strided_slice %4 {offsets = [1, 0], sizes = [144, 3], strides = [1, 1]} : vector<182x3xf32> to vector<144x3xf32>
    %13 = arith.truncf %12 : vector<144x3xf32> to vector<144x3xbf16>
    %c1 = arith.constant 1 : index
    %c0_10 = arith.constant 0 : index
    %c0_11 = arith.constant 0 : index
    %14 = vector.load %arg3[%c1, %c0_10, %c0_11] : memref<9x3x128xbf16, #tpu.memory_space<vmem>>, vector<1x3x128xbf16>
    %15 = vector.shape_cast %14 : vector<1x3x128xbf16> to vector<3x128xbf16>
    %cst_12 = arith.constant dense<0.000000e+00> : vector<144x128xf32>
    %16 = tpu.matmul %13, %15, %cst_12 {dimension_numbers = #tpu.dot_dimension_numbers<[1], [0], [0], [1], [0, 0, 1, 1], [], []>} : vector<144x3xbf16>, vector<3x128xbf16>, vector<144x128xf32> -> vector<144x128xf32>
    %17 = arith.addf %11, %16 : vector<144x128xf32>
    %18 = vector.extract_strided_slice %4 {offsets = [2, 0], sizes = [144, 3], strides = [1, 1]} : vector<182x3xf32> to vector<144x3xf32>
    %19 = arith.truncf %18 : vector<144x3xf32> to vector<144x3xbf16>
    %c2 = arith.constant 2 : index
    %c0_13 = arith.constant 0 : index
    %c0_14 = arith.constant 0 : index
    %20 = vector.load %arg3[%c2, %c0_13, %c0_14] : memref<9x3x128xbf16, #tpu.memory_space<vmem>>, vector<1x3x128xbf16>
    %21 = vector.shape_cast %20 : vector<1x3x128xbf16> to vector<3x128xbf16>
    %cst_15 = arith.constant dense<0.000000e+00> : vector<144x128xf32>
    %22 = tpu.matmul %19, %21, %cst_15 {dimension_numbers = #tpu.dot_dimension_numbers<[1], [0], [0], [1], [0, 0, 1, 1], [], []>} : vector<144x3xbf16>, vector<3x128xbf16>, vector<144x128xf32> -> vector<144x128xf32>
    %23 = arith.addf %17, %22 : vector<144x128xf32>
    %24 = vector.extract_strided_slice %4 {offsets = [18, 0], sizes = [144, 3], strides = [1, 1]} : vector<182x3xf32> to vector<144x3xf32>
    %25 = arith.truncf %24 : vector<144x3xf32> to vector<144x3xbf16>
    %c3 = arith.constant 3 : index
    %c0_16 = arith.constant 0 : index
    %c0_17 = arith.constant 0 : index
    %26 = vector.load %arg3[%c3, %c0_16, %c0_17] : memref<9x3x128xbf16, #tpu.memory_space<vmem>>, vector<1x3x128xbf16>
    %27 = vector.shape_cast %26 : vector<1x3x128xbf16> to vector<3x128xbf16>
    %cst_18 = arith.constant dense<0.000000e+00> : vector<144x128xf32>
    %28 = tpu.matmul %25, %27, %cst_18 {dimension_numbers = #tpu.dot_dimension_numbers<[1], [0], [0], [1], [0, 0, 1, 1], [], []>} : vector<144x3xbf16>, vector<3x128xbf16>, vector<144x128xf32> -> vector<144x128xf32>
    %29 = arith.addf %23, %28 : vector<144x128xf32>
    %30 = vector.extract_strided_slice %4 {offsets = [19, 0], sizes = [144, 3], strides = [1, 1]} : vector<182x3xf32> to vector<144x3xf32>
    %31 = arith.truncf %30 : vector<144x3xf32> to vector<144x3xbf16>
    %c4 = arith.constant 4 : index
    %c0_19 = arith.constant 0 : index
    %c0_20 = arith.constant 0 : index
    %32 = vector.load %arg3[%c4, %c0_19, %c0_20] : memref<9x3x128xbf16, #tpu.memory_space<vmem>>, vector<1x3x128xbf16>
    %33 = vector.shape_cast %32 : vector<1x3x128xbf16> to vector<3x128xbf16>
    %cst_21 = arith.constant dense<0.000000e+00> : vector<144x128xf32>
    %34 = tpu.matmul %31, %33, %cst_21 {dimension_numbers = #tpu.dot_dimension_numbers<[1], [0], [0], [1], [0, 0, 1, 1], [], []>} : vector<144x3xbf16>, vector<3x128xbf16>, vector<144x128xf32> -> vector<144x128xf32>
    %35 = arith.addf %29, %34 : vector<144x128xf32>
    %36 = vector.extract_strided_slice %4 {offsets = [20, 0], sizes = [144, 3], strides = [1, 1]} : vector<182x3xf32> to vector<144x3xf32>
    %37 = arith.truncf %36 : vector<144x3xf32> to vector<144x3xbf16>
    %c5 = arith.constant 5 : index
    %c0_22 = arith.constant 0 : index
    %c0_23 = arith.constant 0 : index
    %38 = vector.load %arg3[%c5, %c0_22, %c0_23] : memref<9x3x128xbf16, #tpu.memory_space<vmem>>, vector<1x3x128xbf16>
    %39 = vector.shape_cast %38 : vector<1x3x128xbf16> to vector<3x128xbf16>
    %cst_24 = arith.constant dense<0.000000e+00> : vector<144x128xf32>
    %40 = tpu.matmul %37, %39, %cst_24 {dimension_numbers = #tpu.dot_dimension_numbers<[1], [0], [0], [1], [0, 0, 1, 1], [], []>} : vector<144x3xbf16>, vector<3x128xbf16>, vector<144x128xf32> -> vector<144x128xf32>
    %41 = arith.addf %35, %40 : vector<144x128xf32>
    %42 = vector.extract_strided_slice %4 {offsets = [36, 0], sizes = [144, 3], strides = [1, 1]} : vector<182x3xf32> to vector<144x3xf32>
    %43 = arith.truncf %42 : vector<144x3xf32> to vector<144x3xbf16>
    %c6 = arith.constant 6 : index
    %c0_25 = arith.constant 0 : index
    %c0_26 = arith.constant 0 : index
    %44 = vector.load %arg3[%c6, %c0_25, %c0_26] : memref<9x3x128xbf16, #tpu.memory_space<vmem>>, vector<1x3x128xbf16>
    %45 = vector.shape_cast %44 : vector<1x3x128xbf16> to vector<3x128xbf16>
    %cst_27 = arith.constant dense<0.000000e+00> : vector<144x128xf32>
    %46 = tpu.matmul %43, %45, %cst_27 {dimension_numbers = #tpu.dot_dimension_numbers<[1], [0], [0], [1], [0, 0, 1, 1], [], []>} : vector<144x3xbf16>, vector<3x128xbf16>, vector<144x128xf32> -> vector<144x128xf32>
    %47 = arith.addf %41, %46 : vector<144x128xf32>
    %48 = vector.extract_strided_slice %4 {offsets = [37, 0], sizes = [144, 3], strides = [1, 1]} : vector<182x3xf32> to vector<144x3xf32>
    %49 = arith.truncf %48 : vector<144x3xf32> to vector<144x3xbf16>
    %c7 = arith.constant 7 : index
    %c0_28 = arith.constant 0 : index
    %c0_29 = arith.constant 0 : index
    %50 = vector.load %arg3[%c7, %c0_28, %c0_29] : memref<9x3x128xbf16, #tpu.memory_space<vmem>>, vector<1x3x128xbf16>
    %51 = vector.shape_cast %50 : vector<1x3x128xbf16> to vector<3x128xbf16>
    %cst_30 = arith.constant dense<0.000000e+00> : vector<144x128xf32>
    %52 = tpu.matmul %49, %51, %cst_30 {dimension_numbers = #tpu.dot_dimension_numbers<[1], [0], [0], [1], [0, 0, 1, 1], [], []>} : vector<144x3xbf16>, vector<3x128xbf16>, vector<144x128xf32> -> vector<144x128xf32>
    %53 = arith.addf %47, %52 : vector<144x128xf32>
    %54 = vector.extract_strided_slice %4 {offsets = [38, 0], sizes = [144, 3], strides = [1, 1]} : vector<182x3xf32> to vector<144x3xf32>
    %55 = arith.truncf %54 : vector<144x3xf32> to vector<144x3xbf16>
    %c8 = arith.constant 8 : index
    %c0_31 = arith.constant 0 : index
    %c0_32 = arith.constant 0 : index
    %56 = vector.load %arg3[%c8, %c0_31, %c0_32] : memref<9x3x128xbf16, #tpu.memory_space<vmem>>, vector<1x3x128xbf16>
    %57 = vector.shape_cast %56 : vector<1x3x128xbf16> to vector<3x128xbf16>
    %cst_33 = arith.constant dense<0.000000e+00> : vector<144x128xf32>
    %58 = tpu.matmul %55, %57, %cst_33 {dimension_numbers = #tpu.dot_dimension_numbers<[1], [0], [0], [1], [0, 0, 1, 1], [], []>} : vector<144x3xbf16>, vector<3x128xbf16>, vector<144x128xf32> -> vector<144x128xf32>
    %59 = arith.addf %53, %58 : vector<144x128xf32>
    %c0_34 = arith.constant 0 : index
    %c0_35 = arith.constant 0 : index
    %60 = vector.load %arg4[%c0_34, %c0_35] : memref<1x128xf32, #tpu.memory_space<vmem>>, vector<1x128xf32>
    %61 = vector.broadcast %60 : vector<1x128xf32> to vector<144x128xf32>
    %62 = arith.addf %59, %61 : vector<144x128xf32>
    %cst_36 = arith.constant 0.000000e+00 : f32
    %63 = vector.broadcast %cst_36 : f32 to vector<144x128xf32>
    %64 = arith.maximumf %62, %63 : vector<144x128xf32>
    %65 = vector.broadcast %0 : vector<144x1xf32> to vector<144x128xf32>
    %66 = arith.mulf %64, %65 : vector<144x128xf32>
    %cst_37 = arith.constant dense<0.000000e+00> : vector<128xf32>
    %67 = vector.multi_reduction <add>, %66, %cst_37 [0] : vector<144x128xf32> to vector<128xf32>
    %68 = vector.shape_cast %67 : vector<128xf32> to vector<1x128xf32>
    %69 = arith.addf %1, %68 : vector<1x128xf32>
    %c0_38 = arith.constant 0 : index
    %c0_39 = arith.constant 0 : index
    %c144 = arith.constant 144 : index
    %c0_40 = arith.constant 0 : index
    %70 = vector.load %arg2[%c0_38, %c0_39, %c144, %c0_40] : memref<1x1x342x3xbf16, #tpu.memory_space<vmem>>, vector<1x1x182x3xbf16>
    %71 = vector.shape_cast %70 : vector<1x1x182x3xbf16> to vector<182x3xbf16>
    %72 = arith.extf %71 : vector<182x3xbf16> to vector<182x3xf32>
    %cst_41 = arith.constant 0.000000e+00 : f32
    %73 = vector.broadcast %cst_41 : f32 to vector<144x128xf32>
    %74 = vector.extract_strided_slice %72 {offsets = [0, 0], sizes = [144, 3], strides = [1, 1]} : vector<182x3xf32> to vector<144x3xf32>
    %75 = arith.truncf %74 : vector<144x3xf32> to vector<144x3xbf16>
    %c0_42 = arith.constant 0 : index
    %c0_43 = arith.constant 0 : index
    %c0_44 = arith.constant 0 : index
    %76 = vector.load %arg3[%c0_42, %c0_43, %c0_44] : memref<9x3x128xbf16, #tpu.memory_space<vmem>>, vector<1x3x128xbf16>
    %77 = vector.shape_cast %76 : vector<1x3x128xbf16> to vector<3x128xbf16>
    %cst_45 = arith.constant dense<0.000000e+00> : vector<144x128xf32>
    %78 = tpu.matmul %75, %77, %cst_45 {dimension_numbers = #tpu.dot_dimension_numbers<[1], [0], [0], [1], [0, 0, 1, 1], [], []>} : vector<144x3xbf16>, vector<3x128xbf16>, vector<144x128xf32> -> vector<144x128xf32>
    %79 = arith.addf %73, %78 : vector<144x128xf32>
    %80 = vector.extract_strided_slice %72 {offsets = [1, 0], sizes = [144, 3], strides = [1, 1]} : vector<182x3xf32> to vector<144x3xf32>
    %81 = arith.truncf %80 : vector<144x3xf32> to vector<144x3xbf16>
    %c1_46 = arith.constant 1 : index
    %c0_47 = arith.constant 0 : index
    %c0_48 = arith.constant 0 : index
    %82 = vector.load %arg3[%c1_46, %c0_47, %c0_48] : memref<9x3x128xbf16, #tpu.memory_space<vmem>>, vector<1x3x128xbf16>
    %83 = vector.shape_cast %82 : vector<1x3x128xbf16> to vector<3x128xbf16>
    %cst_49 = arith.constant dense<0.000000e+00> : vector<144x128xf32>
    %84 = tpu.matmul %81, %83, %cst_49 {dimension_numbers = #tpu.dot_dimension_numbers<[1], [0], [0], [1], [0, 0, 1, 1], [], []>} : vector<144x3xbf16>, vector<3x128xbf16>, vector<144x128xf32> -> vector<144x128xf32>
    %85 = arith.addf %79, %84 : vector<144x128xf32>
    %86 = vector.extract_strided_slice %72 {offsets = [2, 0], sizes = [144, 3], strides = [1, 1]} : vector<182x3xf32> to vector<144x3xf32>
    %87 = arith.truncf %86 : vector<144x3xf32> to vector<144x3xbf16>
    %c2_50 = arith.constant 2 : index
    %c0_51 = arith.constant 0 : index
    %c0_52 = arith.constant 0 : index
    %88 = vector.load %arg3[%c2_50, %c0_51, %c0_52] : memref<9x3x128xbf16, #tpu.memory_space<vmem>>, vector<1x3x128xbf16>
    %89 = vector.shape_cast %88 : vector<1x3x128xbf16> to vector<3x128xbf16>
    %cst_53 = arith.constant dense<0.000000e+00> : vector<144x128xf32>
    %90 = tpu.matmul %87, %89, %cst_53 {dimension_numbers = #tpu.dot_dimension_numbers<[1], [0], [0], [1], [0, 0, 1, 1], [], []>} : vector<144x3xbf16>, vector<3x128xbf16>, vector<144x128xf32> -> vector<144x128xf32>
    %91 = arith.addf %85, %90 : vector<144x128xf32>
    %92 = vector.extract_strided_slice %72 {offsets = [18, 0], sizes = [144, 3], strides = [1, 1]} : vector<182x3xf32> to vector<144x3xf32>
    %93 = arith.truncf %92 : vector<144x3xf32> to vector<144x3xbf16>
    %c3_54 = arith.constant 3 : index
    %c0_55 = arith.constant 0 : index
    %c0_56 = arith.constant 0 : index
    %94 = vector.load %arg3[%c3_54, %c0_55, %c0_56] : memref<9x3x128xbf16, #tpu.memory_space<vmem>>, vector<1x3x128xbf16>
    %95 = vector.shape_cast %94 : vector<1x3x128xbf16> to vector<3x128xbf16>
    %cst_57 = arith.constant dense<0.000000e+00> : vector<144x128xf32>
    %96 = tpu.matmul %93, %95, %cst_57 {dimension_numbers = #tpu.dot_dimension_numbers<[1], [0], [0], [1], [0, 0, 1, 1], [], []>} : vector<144x3xbf16>, vector<3x128xbf16>, vector<144x128xf32> -> vector<144x128xf32>
    %97 = arith.addf %91, %96 : vector<144x128xf32>
    %98 = vector.extract_strided_slice %72 {offsets = [19, 0], sizes = [144, 3], strides = [1, 1]} : vector<182x3xf32> to vector<144x3xf32>
    %99 = arith.truncf %98 : vector<144x3xf32> to vector<144x3xbf16>
    %c4_58 = arith.constant 4 : index
    %c0_59 = arith.constant 0 : index
    %c0_60 = arith.constant 0 : index
    %100 = vector.load %arg3[%c4_58, %c0_59, %c0_60] : memref<9x3x128xbf16, #tpu.memory_space<vmem>>, vector<1x3x128xbf16>
    %101 = vector.shape_cast %100 : vector<1x3x128xbf16> to vector<3x128xbf16>
    %cst_61 = arith.constant dense<0.000000e+00> : vector<144x128xf32>
    %102 = tpu.matmul %99, %101, %cst_61 {dimension_numbers = #tpu.dot_dimension_numbers<[1], [0], [0], [1], [0, 0, 1, 1], [], []>} : vector<144x3xbf16>, vector<3x128xbf16>, vector<144x128xf32> -> vector<144x128xf32>
    %103 = arith.addf %97, %102 : vector<144x128xf32>
    %104 = vector.extract_strided_slice %72 {offsets = [20, 0], sizes = [144, 3], strides = [1, 1]} : vector<182x3xf32> to vector<144x3xf32>
    %105 = arith.truncf %104 : vector<144x3xf32> to vector<144x3xbf16>
    %c5_62 = arith.constant 5 : index
    %c0_63 = arith.constant 0 : index
    %c0_64 = arith.constant 0 : index
    %106 = vector.load %arg3[%c5_62, %c0_63, %c0_64] : memref<9x3x128xbf16, #tpu.memory_space<vmem>>, vector<1x3x128xbf16>
    %107 = vector.shape_cast %106 : vector<1x3x128xbf16> to vector<3x128xbf16>
    %cst_65 = arith.constant dense<0.000000e+00> : vector<144x128xf32>
    %108 = tpu.matmul %105, %107, %cst_65 {dimension_numbers = #tpu.dot_dimension_numbers<[1], [0], [0], [1], [0, 0, 1, 1], [], []>} : vector<144x3xbf16>, vector<3x128xbf16>, vector<144x128xf32> -> vector<144x128xf32>
    %109 = arith.addf %103, %108 : vector<144x128xf32>
    %110 = vector.extract_strided_slice %72 {offsets = [36, 0], sizes = [144, 3], strides = [1, 1]} : vector<182x3xf32> to vector<144x3xf32>
    %111 = arith.truncf %110 : vector<144x3xf32> to vector<144x3xbf16>
    %c6_66 = arith.constant 6 : index
    %c0_67 = arith.constant 0 : index
    %c0_68 = arith.constant 0 : index
    %112 = vector.load %arg3[%c6_66, %c0_67, %c0_68] : memref<9x3x128xbf16, #tpu.memory_space<vmem>>, vector<1x3x128xbf16>
    %113 = vector.shape_cast %112 : vector<1x3x128xbf16> to vector<3x128xbf16>
    %cst_69 = arith.constant dense<0.000000e+00> : vector<144x128xf32>
    %114 = tpu.matmul %111, %113, %cst_69 {dimension_numbers = #tpu.dot_dimension_numbers<[1], [0], [0], [1], [0, 0, 1, 1], [], []>} : vector<144x3xbf16>, vector<3x128xbf16>, vector<144x128xf32> -> vector<144x128xf32>
    %115 = arith.addf %109, %114 : vector<144x128xf32>
    %116 = vector.extract_strided_slice %72 {offsets = [37, 0], sizes = [144, 3], strides = [1, 1]} : vector<182x3xf32> to vector<144x3xf32>
    %117 = arith.truncf %116 : vector<144x3xf32> to vector<144x3xbf16>
    %c7_70 = arith.constant 7 : index
    %c0_71 = arith.constant 0 : index
    %c0_72 = arith.constant 0 : index
    %118 = vector.load %arg3[%c7_70, %c0_71, %c0_72] : memref<9x3x128xbf16, #tpu.memory_space<vmem>>, vector<1x3x128xbf16>
    %119 = vector.shape_cast %118 : vector<1x3x128xbf16> to vector<3x128xbf16>
    %cst_73 = arith.constant dense<0.000000e+00> : vector<144x128xf32>
    %120 = tpu.matmul %117, %119, %cst_73 {dimension_numbers = #tpu.dot_dimension_numbers<[1], [0], [0], [1], [0, 0, 1, 1], [], []>} : vector<144x3xbf16>, vector<3x128xbf16>, vector<144x128xf32> -> vector<144x128xf32>
    %121 = arith.addf %115, %120 : vector<144x128xf32>
    %122 = vector.extract_strided_slice %72 {offsets = [38, 0], sizes = [144, 3], strides = [1, 1]} : vector<182x3xf32> to vector<144x3xf32>
    %123 = arith.truncf %122 : vector<144x3xf32> to vector<144x3xbf16>
    %c8_74 = arith.constant 8 : index
    %c0_75 = arith.constant 0 : index
    %c0_76 = arith.constant 0 : index
    %124 = vector.load %arg3[%c8_74, %c0_75, %c0_76] : memref<9x3x128xbf16, #tpu.memory_space<vmem>>, vector<1x3x128xbf16>
    %125 = vector.shape_cast %124 : vector<1x3x128xbf16> to vector<3x128xbf16>
    %cst_77 = arith.constant dense<0.000000e+00> : vector<144x128xf32>
    %126 = tpu.matmul %123, %125, %cst_77 {dimension_numbers = #tpu.dot_dimension_numbers<[1], [0], [0], [1], [0, 0, 1, 1], [], []>} : vector<144x3xbf16>, vector<3x128xbf16>, vector<144x128xf32> -> vector<144x128xf32>
    %127 = arith.addf %121, %126 : vector<144x128xf32>
    %c0_78 = arith.constant 0 : index
    %c0_79 = arith.constant 0 : index
    %128 = vector.load %arg4[%c0_78, %c0_79] : memref<1x128xf32, #tpu.memory_space<vmem>>, vector<1x128xf32>
    %129 = vector.broadcast %128 : vector<1x128xf32> to vector<144x128xf32>
    %130 = arith.addf %127, %129 : vector<144x128xf32>
    %cst_80 = arith.constant 0.000000e+00 : f32
    %131 = vector.broadcast %cst_80 : f32 to vector<144x128xf32>
    %132 = arith.maximumf %130, %131 : vector<144x128xf32>
    %133 = vector.broadcast %0 : vector<144x1xf32> to vector<144x128xf32>
    %134 = arith.mulf %132, %133 : vector<144x128xf32>
    %cst_81 = arith.constant dense<0.000000e+00> : vector<128xf32>
    %135 = vector.multi_reduction <add>, %134, %cst_81 [0] : vector<144x128xf32> to vector<128xf32>
    %136 = vector.shape_cast %135 : vector<128xf32> to vector<1x128xf32>
    %137 = arith.addf %69, %136 : vector<1x128xf32>
    %c0_82 = arith.constant 0 : index
    %c0_83 = arith.constant 0 : index
    %c0_84 = arith.constant 0 : index
    %c0_85 = arith.constant 0 : index
    %138 = vector.load %arg6[%c0_82, %c0_83, %c0_84, %c0_85] : memref<1x1x1x128xf32, #tpu.memory_space<vmem>>, vector<1x1x1x128xf32>
    %139 = vector.shape_cast %138 : vector<1x1x1x128xf32> to vector<1x128xf32>
    %140 = vector.shape_cast %137 : vector<1x128xf32> to vector<1x1x1x128xf32>
    tpu.vector_store %arg6[%c0_82, %c0_83, %c0_84, %c0_85], %140 {strides = array<i32>} : memref<1x1x1x128xf32, #tpu.memory_space<vmem>>, vector<1x1x1x128xf32>,
    return
  }
  func.func @transform_0(%arg0: i32, %arg1: i32) -> (i32, i32, i32, i32) {
    %c0_i32 = arith.constant 0 : i32
    %c0_i32_0 = arith.constant 0 : i32
    %c0_i32_1 = arith.constant 0 : i32
    return %arg0, %arg1, %c0_i32, %c0_i32_0 : i32, i32, i32, i32
  }
  func.func @transform_1(%arg0: i32, %arg1: i32) -> (i32, i32, i32) {
    %c0_i32 = arith.constant 0 : i32
    %c0_i32_0 = arith.constant 0 : i32
    %c0_i32_1 = arith.constant 0 : i32
    %c0_i32_2 = arith.constant 0 : i32
    return %c0_i32, %c0_i32_0, %c0_i32_1 : i32, i32, i32
  }
  func.func @transform_2(%arg0: i32, %arg1: i32) -> (i32, i32) {
    %c0_i32 = arith.constant 0 : i32
    %c0_i32_0 = arith.constant 0 : i32
    %c0_i32_1 = arith.constant 0 : i32
    return %c0_i32, %c0_i32_0 : i32, i32
  }
  func.func @transform_3(%arg0: i32, %arg1: i32) -> (i32, i32) {
    %c0_i32 = arith.constant 0 : i32
    %c0_i32_0 = arith.constant 0 : i32
    %c0_i32_1 = arith.constant 0 : i32
    return %c0_i32, %c0_i32_0 : i32, i32
  }
  func.func @transform_4(%arg0: i32, %arg1: i32) -> (i32, i32, i32, i32) {
    %c0_i32 = arith.constant 0 : i32
    %c0_i32_0 = arith.constant 0 : i32
    %c0_i32_1 = arith.constant 0 : i32
    return %arg0, %arg1, %c0_i32, %c0_i32_0 : i32, i32, i32, i32
  }
}

module attributes {stable_mosaic.version = 11 : i64} {
  func.func @head_kernel(%arg0: i32, %arg1: memref<4x128xf32, #tpu.memory_space<vmem>>, %arg2: memref<128x128xbf16, #tpu.memory_space<vmem>>, %arg3: memref<1x128xf32, #tpu.memory_space<vmem>>, %arg4: memref<1x128xf32, #tpu.memory_space<vmem>>, %arg5: memref<128x128xbf16, #tpu.memory_space<vmem>>, %arg6: memref<1x128xf32, #tpu.memory_space<vmem>>, %arg7: memref<1x128xf32, #tpu.memory_space<vmem>>, %arg8: memref<128x128xbf16, #tpu.memory_space<vmem>>, %arg9: memref<1x128xf32, #tpu.memory_space<vmem>>, %arg10: memref<1x128xf32, #tpu.memory_space<vmem>>, %arg11: memref<128x512xbf16, #tpu.memory_space<vmem>>, %arg12: memref<1x512xf32, #tpu.memory_space<vmem>>, %arg13: memref<1x512xf32, #tpu.memory_space<vmem>>, %arg14: memref<512x128xbf16, #tpu.memory_space<vmem>>, %arg15: memref<1x128xf32, #tpu.memory_space<vmem>>, %arg16: memref<4x128xf32, #tpu.memory_space<vmem>>, %arg17: memref<1x1xf32, #tpu.memory_space<vmem>>) attributes {dimension_semantics = [#tpu.dimension_semantics<arbitrary>], iteration_bounds = array<i64: 1>, scalar_prefetch = 0 : i64, scratch_operands = 0 : i64, tpu.core_type = #tpu.core_type<tc>, window_params = [{pipeline_mode = #tpu.pipeline_mode<synchronous>, transform_indices = @transform_0, window_bounds = array<i64: 4, 128>}, {pipeline_mode = #tpu.pipeline_mode<synchronous>, transform_indices = @transform_1, window_bounds = array<i64: 128, 128>}, {pipeline_mode = #tpu.pipeline_mode<synchronous>, transform_indices = @transform_2, window_bounds = array<i64: 1, 128>}, {pipeline_mode = #tpu.pipeline_mode<synchronous>, transform_indices = @transform_3, window_bounds = array<i64: 1, 128>}, {pipeline_mode = #tpu.pipeline_mode<synchronous>, transform_indices = @transform_4, window_bounds = array<i64: 128, 128>}, {pipeline_mode = #tpu.pipeline_mode<synchronous>, transform_indices = @transform_5, window_bounds = array<i64: 1, 128>}, {pipeline_mode = #tpu.pipeline_mode<synchronous>, transform_indices = @transform_6, window_bounds = array<i64: 1, 128>}, {pipeline_mode = #tpu.pipeline_mode<synchronous>, transform_indices = @transform_7, window_bounds = array<i64: 128, 128>}, {pipeline_mode = #tpu.pipeline_mode<synchronous>, transform_indices = @transform_8, window_bounds = array<i64: 1, 128>}, {pipeline_mode = #tpu.pipeline_mode<synchronous>, transform_indices = @transform_9, window_bounds = array<i64: 1, 128>}, {pipeline_mode = #tpu.pipeline_mode<synchronous>, transform_indices = @transform_10, window_bounds = array<i64: 128, 512>}, {pipeline_mode = #tpu.pipeline_mode<synchronous>, transform_indices = @transform_11, window_bounds = array<i64: 1, 512>}, {pipeline_mode = #tpu.pipeline_mode<synchronous>, transform_indices = @transform_12, window_bounds = array<i64: 1, 512>}, {pipeline_mode = #tpu.pipeline_mode<synchronous>, transform_indices = @transform_13, window_bounds = array<i64: 512, 128>}, {pipeline_mode = #tpu.pipeline_mode<synchronous>, transform_indices = @transform_14, window_bounds = array<i64: 1, 128>}, {pipeline_mode = #tpu.pipeline_mode<synchronous>, transform_indices = @transform_15, window_bounds = array<i64: 4, 128>}, {pipeline_mode = #tpu.pipeline_mode<synchronous>, transform_indices = @transform_16, window_bounds = array<i64: 1, 1>}]} {
    %c0 = arith.constant 0 : index
    %c0_0 = arith.constant 0 : index
    %0 = vector.load %arg1[%c0, %c0_0] : memref<4x128xf32, #tpu.memory_space<vmem>>, vector<4x128xf32>
    %1 = arith.truncf %0 : vector<4x128xf32> to vector<4x128xbf16>
    %c0_1 = arith.constant 0 : index
    %c0_2 = arith.constant 0 : index
    %2 = vector.load %arg2[%c0_1, %c0_2] : memref<128x128xbf16, #tpu.memory_space<vmem>>, vector<128x128xbf16>
    %cst = arith.constant dense<0.000000e+00> : vector<4x128xf32>
    %3 = tpu.matmul %1, %2, %cst {dimension_numbers = #tpu.dot_dimension_numbers<[1], [0], [0], [1], [0, 0, 1, 1], [], []>} : vector<4x128xbf16>, vector<128x128xbf16>, vector<4x128xf32> -> vector<4x128xf32>
    %c0_3 = arith.constant 0 : index
    %c0_4 = arith.constant 0 : index
    %4 = vector.load %arg3[%c0_3, %c0_4] : memref<1x128xf32, #tpu.memory_space<vmem>>, vector<1x128xf32>
    %c0_5 = arith.constant 0 : index
    %c0_6 = arith.constant 0 : index
    %5 = vector.load %arg4[%c0_5, %c0_6] : memref<1x128xf32, #tpu.memory_space<vmem>>, vector<1x128xf32>
    %6 = vector.extract_strided_slice %3 {offsets = [0, 0], sizes = [2, 128], strides = [1, 1]} : vector<4x128xf32> to vector<2x128xf32>
    %cst_7 = arith.constant dense<0.000000e+00> : vector<128xf32>
    %7 = vector.multi_reduction <add>, %6, %cst_7 [0] : vector<2x128xf32> to vector<128xf32>
    %8 = vector.shape_cast %7 : vector<128xf32> to vector<1x128xf32>
    %cst_8 = arith.constant 2.000000e+00 : f32
    %9 = vector.broadcast %cst_8 : f32 to vector<1x128xf32>
    %10 = arith.divf %8, %9 : vector<1x128xf32>
    %11 = vector.broadcast %10 : vector<1x128xf32> to vector<2x128xf32>
    %12 = arith.subf %6, %11 : vector<2x128xf32>
    %13 = arith.mulf %12, %12 : vector<2x128xf32>
    %cst_9 = arith.constant dense<0.000000e+00> : vector<128xf32>
    %14 = vector.multi_reduction <add>, %13, %cst_9 [0] : vector<2x128xf32> to vector<128xf32>
    %15 = vector.shape_cast %14 : vector<128xf32> to vector<1x128xf32>
    %cst_10 = arith.constant 2.000000e+00 : f32
    %16 = vector.broadcast %cst_10 : f32 to vector<1x128xf32>
    %17 = arith.divf %15, %16 : vector<1x128xf32>
    %cst_11 = arith.constant 9.99999974E-6 : f32
    %18 = vector.broadcast %cst_11 : f32 to vector<1x128xf32>
    %19 = arith.addf %17, %18 : vector<1x128xf32>
    %20 = math.rsqrt %19 : vector<1x128xf32>
    %21 = vector.broadcast %20 : vector<1x128xf32> to vector<2x128xf32>
    %22 = arith.mulf %12, %21 : vector<2x128xf32>
    %23 = vector.broadcast %4 : vector<1x128xf32> to vector<2x128xf32>
    %24 = arith.mulf %22, %23 : vector<2x128xf32>
    %25 = vector.broadcast %5 : vector<1x128xf32> to vector<2x128xf32>
    %26 = arith.addf %24, %25 : vector<2x128xf32>
    %27 = vector.extract_strided_slice %3 {offsets = [2, 0], sizes = [2, 128], strides = [1, 1]} : vector<4x128xf32> to vector<2x128xf32>
    %cst_12 = arith.constant dense<0.000000e+00> : vector<128xf32>
    %28 = vector.multi_reduction <add>, %27, %cst_12 [0] : vector<2x128xf32> to vector<128xf32>
    %29 = vector.shape_cast %28 : vector<128xf32> to vector<1x128xf32>
    %cst_13 = arith.constant 2.000000e+00 : f32
    %30 = vector.broadcast %cst_13 : f32 to vector<1x128xf32>
    %31 = arith.divf %29, %30 : vector<1x128xf32>
    %32 = vector.broadcast %31 : vector<1x128xf32> to vector<2x128xf32>
    %33 = arith.subf %27, %32 : vector<2x128xf32>
    %34 = arith.mulf %33, %33 : vector<2x128xf32>
    %cst_14 = arith.constant dense<0.000000e+00> : vector<128xf32>
    %35 = vector.multi_reduction <add>, %34, %cst_14 [0] : vector<2x128xf32> to vector<128xf32>
    %36 = vector.shape_cast %35 : vector<128xf32> to vector<1x128xf32>
    %cst_15 = arith.constant 2.000000e+00 : f32
    %37 = vector.broadcast %cst_15 : f32 to vector<1x128xf32>
    %38 = arith.divf %36, %37 : vector<1x128xf32>
    %cst_16 = arith.constant 9.99999974E-6 : f32
    %39 = vector.broadcast %cst_16 : f32 to vector<1x128xf32>
    %40 = arith.addf %38, %39 : vector<1x128xf32>
    %41 = math.rsqrt %40 : vector<1x128xf32>
    %42 = vector.broadcast %41 : vector<1x128xf32> to vector<2x128xf32>
    %43 = arith.mulf %33, %42 : vector<2x128xf32>
    %44 = vector.broadcast %4 : vector<1x128xf32> to vector<2x128xf32>
    %45 = arith.mulf %43, %44 : vector<2x128xf32>
    %46 = vector.broadcast %5 : vector<1x128xf32> to vector<2x128xf32>
    %47 = arith.addf %45, %46 : vector<2x128xf32>
    %48 = tpu.concatenate %26, %47 in 0 : vector<2x128xf32>, vector<2x128xf32> -> vector<4x128xf32>
    %cst_17 = arith.constant 0.000000e+00 : f32
    %49 = vector.broadcast %cst_17 : f32 to vector<4x128xf32>
    %50 = arith.maximumf %48, %49 : vector<4x128xf32>
    %51 = arith.truncf %50 : vector<4x128xf32> to vector<4x128xbf16>
    %c0_18 = arith.constant 0 : index
    %c0_19 = arith.constant 0 : index
    %52 = vector.load %arg5[%c0_18, %c0_19] : memref<128x128xbf16, #tpu.memory_space<vmem>>, vector<128x128xbf16>
    %cst_20 = arith.constant dense<0.000000e+00> : vector<4x128xf32>
    %53 = tpu.matmul %51, %52, %cst_20 {dimension_numbers = #tpu.dot_dimension_numbers<[1], [0], [0], [1], [0, 0, 1, 1], [], []>} : vector<4x128xbf16>, vector<128x128xbf16>, vector<4x128xf32> -> vector<4x128xf32>
    %c0_21 = arith.constant 0 : index
    %c0_22 = arith.constant 0 : index
    %54 = vector.load %arg6[%c0_21, %c0_22] : memref<1x128xf32, #tpu.memory_space<vmem>>, vector<1x128xf32>
    %c0_23 = arith.constant 0 : index
    %c0_24 = arith.constant 0 : index
    %55 = vector.load %arg7[%c0_23, %c0_24] : memref<1x128xf32, #tpu.memory_space<vmem>>, vector<1x128xf32>
    %56 = vector.extract_strided_slice %53 {offsets = [0, 0], sizes = [2, 128], strides = [1, 1]} : vector<4x128xf32> to vector<2x128xf32>
    %cst_25 = arith.constant dense<0.000000e+00> : vector<128xf32>
    %57 = vector.multi_reduction <add>, %56, %cst_25 [0] : vector<2x128xf32> to vector<128xf32>
    %58 = vector.shape_cast %57 : vector<128xf32> to vector<1x128xf32>
    %cst_26 = arith.constant 2.000000e+00 : f32
    %59 = vector.broadcast %cst_26 : f32 to vector<1x128xf32>
    %60 = arith.divf %58, %59 : vector<1x128xf32>
    %61 = vector.broadcast %60 : vector<1x128xf32> to vector<2x128xf32>
    %62 = arith.subf %56, %61 : vector<2x128xf32>
    %63 = arith.mulf %62, %62 : vector<2x128xf32>
    %cst_27 = arith.constant dense<0.000000e+00> : vector<128xf32>
    %64 = vector.multi_reduction <add>, %63, %cst_27 [0] : vector<2x128xf32> to vector<128xf32>
    %65 = vector.shape_cast %64 : vector<128xf32> to vector<1x128xf32>
    %cst_28 = arith.constant 2.000000e+00 : f32
    %66 = vector.broadcast %cst_28 : f32 to vector<1x128xf32>
    %67 = arith.divf %65, %66 : vector<1x128xf32>
    %cst_29 = arith.constant 9.99999974E-6 : f32
    %68 = vector.broadcast %cst_29 : f32 to vector<1x128xf32>
    %69 = arith.addf %67, %68 : vector<1x128xf32>
    %70 = math.rsqrt %69 : vector<1x128xf32>
    %71 = vector.broadcast %70 : vector<1x128xf32> to vector<2x128xf32>
    %72 = arith.mulf %62, %71 : vector<2x128xf32>
    %73 = vector.broadcast %54 : vector<1x128xf32> to vector<2x128xf32>
    %74 = arith.mulf %72, %73 : vector<2x128xf32>
    %75 = vector.broadcast %55 : vector<1x128xf32> to vector<2x128xf32>
    %76 = arith.addf %74, %75 : vector<2x128xf32>
    %77 = vector.extract_strided_slice %53 {offsets = [2, 0], sizes = [2, 128], strides = [1, 1]} : vector<4x128xf32> to vector<2x128xf32>
    %cst_30 = arith.constant dense<0.000000e+00> : vector<128xf32>
    %78 = vector.multi_reduction <add>, %77, %cst_30 [0] : vector<2x128xf32> to vector<128xf32>
    %79 = vector.shape_cast %78 : vector<128xf32> to vector<1x128xf32>
    %cst_31 = arith.constant 2.000000e+00 : f32
    %80 = vector.broadcast %cst_31 : f32 to vector<1x128xf32>
    %81 = arith.divf %79, %80 : vector<1x128xf32>
    %82 = vector.broadcast %81 : vector<1x128xf32> to vector<2x128xf32>
    %83 = arith.subf %77, %82 : vector<2x128xf32>
    %84 = arith.mulf %83, %83 : vector<2x128xf32>
    %cst_32 = arith.constant dense<0.000000e+00> : vector<128xf32>
    %85 = vector.multi_reduction <add>, %84, %cst_32 [0] : vector<2x128xf32> to vector<128xf32>
    %86 = vector.shape_cast %85 : vector<128xf32> to vector<1x128xf32>
    %cst_33 = arith.constant 2.000000e+00 : f32
    %87 = vector.broadcast %cst_33 : f32 to vector<1x128xf32>
    %88 = arith.divf %86, %87 : vector<1x128xf32>
    %cst_34 = arith.constant 9.99999974E-6 : f32
    %89 = vector.broadcast %cst_34 : f32 to vector<1x128xf32>
    %90 = arith.addf %88, %89 : vector<1x128xf32>
    %91 = math.rsqrt %90 : vector<1x128xf32>
    %92 = vector.broadcast %91 : vector<1x128xf32> to vector<2x128xf32>
    %93 = arith.mulf %83, %92 : vector<2x128xf32>
    %94 = vector.broadcast %54 : vector<1x128xf32> to vector<2x128xf32>
    %95 = arith.mulf %93, %94 : vector<2x128xf32>
    %96 = vector.broadcast %55 : vector<1x128xf32> to vector<2x128xf32>
    %97 = arith.addf %95, %96 : vector<2x128xf32>
    %98 = tpu.concatenate %76, %97 in 0 : vector<2x128xf32>, vector<2x128xf32> -> vector<4x128xf32>
    %cst_35 = arith.constant 0.000000e+00 : f32
    %99 = vector.broadcast %cst_35 : f32 to vector<4x128xf32>
    %100 = arith.maximumf %98, %99 : vector<4x128xf32>
    %101 = arith.truncf %100 : vector<4x128xf32> to vector<4x128xbf16>
    %c0_36 = arith.constant 0 : index
    %c0_37 = arith.constant 0 : index
    %102 = vector.load %arg8[%c0_36, %c0_37] : memref<128x128xbf16, #tpu.memory_space<vmem>>, vector<128x128xbf16>
    %cst_38 = arith.constant dense<0.000000e+00> : vector<4x128xf32>
    %103 = tpu.matmul %101, %102, %cst_38 {dimension_numbers = #tpu.dot_dimension_numbers<[1], [0], [0], [1], [0, 0, 1, 1], [], []>} : vector<4x128xbf16>, vector<128x128xbf16>, vector<4x128xf32> -> vector<4x128xf32>
    %c0_39 = arith.constant 0 : index
    %c0_40 = arith.constant 0 : index
    %104 = vector.load %arg9[%c0_39, %c0_40] : memref<1x128xf32, #tpu.memory_space<vmem>>, vector<1x128xf32>
    %c0_41 = arith.constant 0 : index
    %c0_42 = arith.constant 0 : index
    %105 = vector.load %arg10[%c0_41, %c0_42] : memref<1x128xf32, #tpu.memory_space<vmem>>, vector<1x128xf32>
    %106 = vector.extract_strided_slice %103 {offsets = [0, 0], sizes = [2, 128], strides = [1, 1]} : vector<4x128xf32> to vector<2x128xf32>
    %cst_43 = arith.constant dense<0.000000e+00> : vector<128xf32>
    %107 = vector.multi_reduction <add>, %106, %cst_43 [0] : vector<2x128xf32> to vector<128xf32>
    %108 = vector.shape_cast %107 : vector<128xf32> to vector<1x128xf32>
    %cst_44 = arith.constant 2.000000e+00 : f32
    %109 = vector.broadcast %cst_44 : f32 to vector<1x128xf32>
    %110 = arith.divf %108, %109 : vector<1x128xf32>
    %111 = vector.broadcast %110 : vector<1x128xf32> to vector<2x128xf32>
    %112 = arith.subf %106, %111 : vector<2x128xf32>
    %113 = arith.mulf %112, %112 : vector<2x128xf32>
    %cst_45 = arith.constant dense<0.000000e+00> : vector<128xf32>
    %114 = vector.multi_reduction <add>, %113, %cst_45 [0] : vector<2x128xf32> to vector<128xf32>
    %115 = vector.shape_cast %114 : vector<128xf32> to vector<1x128xf32>
    %cst_46 = arith.constant 2.000000e+00 : f32
    %116 = vector.broadcast %cst_46 : f32 to vector<1x128xf32>
    %117 = arith.divf %115, %116 : vector<1x128xf32>
    %cst_47 = arith.constant 9.99999974E-6 : f32
    %118 = vector.broadcast %cst_47 : f32 to vector<1x128xf32>
    %119 = arith.addf %117, %118 : vector<1x128xf32>
    %120 = math.rsqrt %119 : vector<1x128xf32>
    %121 = vector.broadcast %120 : vector<1x128xf32> to vector<2x128xf32>
    %122 = arith.mulf %112, %121 : vector<2x128xf32>
    %123 = vector.broadcast %104 : vector<1x128xf32> to vector<2x128xf32>
    %124 = arith.mulf %122, %123 : vector<2x128xf32>
    %125 = vector.broadcast %105 : vector<1x128xf32> to vector<2x128xf32>
    %126 = arith.addf %124, %125 : vector<2x128xf32>
    %127 = vector.extract_strided_slice %103 {offsets = [2, 0], sizes = [2, 128], strides = [1, 1]} : vector<4x128xf32> to vector<2x128xf32>
    %cst_48 = arith.constant dense<0.000000e+00> : vector<128xf32>
    %128 = vector.multi_reduction <add>, %127, %cst_48 [0] : vector<2x128xf32> to vector<128xf32>
    %129 = vector.shape_cast %128 : vector<128xf32> to vector<1x128xf32>
    %cst_49 = arith.constant 2.000000e+00 : f32
    %130 = vector.broadcast %cst_49 : f32 to vector<1x128xf32>
    %131 = arith.divf %129, %130 : vector<1x128xf32>
    %132 = vector.broadcast %131 : vector<1x128xf32> to vector<2x128xf32>
    %133 = arith.subf %127, %132 : vector<2x128xf32>
    %134 = arith.mulf %133, %133 : vector<2x128xf32>
    %cst_50 = arith.constant dense<0.000000e+00> : vector<128xf32>
    %135 = vector.multi_reduction <add>, %134, %cst_50 [0] : vector<2x128xf32> to vector<128xf32>
    %136 = vector.shape_cast %135 : vector<128xf32> to vector<1x128xf32>
    %cst_51 = arith.constant 2.000000e+00 : f32
    %137 = vector.broadcast %cst_51 : f32 to vector<1x128xf32>
    %138 = arith.divf %136, %137 : vector<1x128xf32>
    %cst_52 = arith.constant 9.99999974E-6 : f32
    %139 = vector.broadcast %cst_52 : f32 to vector<1x128xf32>
    %140 = arith.addf %138, %139 : vector<1x128xf32>
    %141 = math.rsqrt %140 : vector<1x128xf32>
    %142 = vector.broadcast %141 : vector<1x128xf32> to vector<2x128xf32>
    %143 = arith.mulf %133, %142 : vector<2x128xf32>
    %144 = vector.broadcast %104 : vector<1x128xf32> to vector<2x128xf32>
    %145 = arith.mulf %143, %144 : vector<2x128xf32>
    %146 = vector.broadcast %105 : vector<1x128xf32> to vector<2x128xf32>
    %147 = arith.addf %145, %146 : vector<2x128xf32>
    %148 = tpu.concatenate %126, %147 in 0 : vector<2x128xf32>, vector<2x128xf32> -> vector<4x128xf32>
    %c0_53 = arith.constant 0 : index
    %c0_54 = arith.constant 0 : index
    %149 = vector.load %arg16[%c0_53, %c0_54] : memref<4x128xf32, #tpu.memory_space<vmem>>, vector<4x128xf32>
    tpu.vector_store %arg16[%c0_53, %c0_54], %148 {strides = array<i32>} : memref<4x128xf32, #tpu.memory_space<vmem>>, vector<4x128xf32>,
    %150 = arith.truncf %148 : vector<4x128xf32> to vector<4x128xbf16>
    %c0_55 = arith.constant 0 : index
    %c0_56 = arith.constant 0 : index
    %151 = vector.load %arg11[%c0_55, %c0_56] : memref<128x512xbf16, #tpu.memory_space<vmem>>, vector<128x512xbf16>
    %cst_57 = arith.constant dense<0.000000e+00> : vector<4x512xf32>
    %152 = tpu.matmul %150, %151, %cst_57 {dimension_numbers = #tpu.dot_dimension_numbers<[1], [0], [0], [1], [0, 0, 1, 1], [], []>} : vector<4x128xbf16>, vector<128x512xbf16>, vector<4x512xf32> -> vector<4x512xf32>
    %c0_58 = arith.constant 0 : index
    %c0_59 = arith.constant 0 : index
    %153 = vector.load %arg12[%c0_58, %c0_59] : memref<1x512xf32, #tpu.memory_space<vmem>>, vector<1x512xf32>
    %c0_60 = arith.constant 0 : index
    %c0_61 = arith.constant 0 : index
    %154 = vector.load %arg13[%c0_60, %c0_61] : memref<1x512xf32, #tpu.memory_space<vmem>>, vector<1x512xf32>
    %155 = vector.extract_strided_slice %152 {offsets = [0, 0], sizes = [2, 512], strides = [1, 1]} : vector<4x512xf32> to vector<2x512xf32>
    %cst_62 = arith.constant dense<0.000000e+00> : vector<512xf32>
    %156 = vector.multi_reduction <add>, %155, %cst_62 [0] : vector<2x512xf32> to vector<512xf32>
    %157 = vector.shape_cast %156 : vector<512xf32> to vector<1x512xf32>
    %cst_63 = arith.constant 2.000000e+00 : f32
    %158 = vector.broadcast %cst_63 : f32 to vector<1x512xf32>
    %159 = arith.divf %157, %158 : vector<1x512xf32>
    %160 = vector.broadcast %159 : vector<1x512xf32> to vector<2x512xf32>
    %161 = arith.subf %155, %160 : vector<2x512xf32>
    %162 = arith.mulf %161, %161 : vector<2x512xf32>
    %cst_64 = arith.constant dense<0.000000e+00> : vector<512xf32>
    %163 = vector.multi_reduction <add>, %162, %cst_64 [0] : vector<2x512xf32> to vector<512xf32>
    %164 = vector.shape_cast %163 : vector<512xf32> to vector<1x512xf32>
    %cst_65 = arith.constant 2.000000e+00 : f32
    %165 = vector.broadcast %cst_65 : f32 to vector<1x512xf32>
    %166 = arith.divf %164, %165 : vector<1x512xf32>
    %cst_66 = arith.constant 9.99999974E-6 : f32
    %167 = vector.broadcast %cst_66 : f32 to vector<1x512xf32>
    %168 = arith.addf %166, %167 : vector<1x512xf32>
    %169 = math.rsqrt %168 : vector<1x512xf32>
    %170 = vector.broadcast %169 : vector<1x512xf32> to vector<2x512xf32>
    %171 = arith.mulf %161, %170 : vector<2x512xf32>
    %172 = vector.broadcast %153 : vector<1x512xf32> to vector<2x512xf32>
    %173 = arith.mulf %171, %172 : vector<2x512xf32>
    %174 = vector.broadcast %154 : vector<1x512xf32> to vector<2x512xf32>
    %175 = arith.addf %173, %174 : vector<2x512xf32>
    %176 = vector.extract_strided_slice %152 {offsets = [2, 0], sizes = [2, 512], strides = [1, 1]} : vector<4x512xf32> to vector<2x512xf32>
    %cst_67 = arith.constant dense<0.000000e+00> : vector<512xf32>
    %177 = vector.multi_reduction <add>, %176, %cst_67 [0] : vector<2x512xf32> to vector<512xf32>
    %178 = vector.shape_cast %177 : vector<512xf32> to vector<1x512xf32>
    %cst_68 = arith.constant 2.000000e+00 : f32
    %179 = vector.broadcast %cst_68 : f32 to vector<1x512xf32>
    %180 = arith.divf %178, %179 : vector<1x512xf32>
    %181 = vector.broadcast %180 : vector<1x512xf32> to vector<2x512xf32>
    %182 = arith.subf %176, %181 : vector<2x512xf32>
    %183 = arith.mulf %182, %182 : vector<2x512xf32>
    %cst_69 = arith.constant dense<0.000000e+00> : vector<512xf32>
    %184 = vector.multi_reduction <add>, %183, %cst_69 [0] : vector<2x512xf32> to vector<512xf32>
    %185 = vector.shape_cast %184 : vector<512xf32> to vector<1x512xf32>
    %cst_70 = arith.constant 2.000000e+00 : f32
    %186 = vector.broadcast %cst_70 : f32 to vector<1x512xf32>
    %187 = arith.divf %185, %186 : vector<1x512xf32>
    %cst_71 = arith.constant 9.99999974E-6 : f32
    %188 = vector.broadcast %cst_71 : f32 to vector<1x512xf32>
    %189 = arith.addf %187, %188 : vector<1x512xf32>
    %190 = math.rsqrt %189 : vector<1x512xf32>
    %191 = vector.broadcast %190 : vector<1x512xf32> to vector<2x512xf32>
    %192 = arith.mulf %182, %191 : vector<2x512xf32>
    %193 = vector.broadcast %153 : vector<1x512xf32> to vector<2x512xf32>
    %194 = arith.mulf %192, %193 : vector<2x512xf32>
    %195 = vector.broadcast %154 : vector<1x512xf32> to vector<2x512xf32>
    %196 = arith.addf %194, %195 : vector<2x512xf32>
    %197 = tpu.concatenate %175, %196 in 0 : vector<2x512xf32>, vector<2x512xf32> -> vector<4x512xf32>
    %cst_72 = arith.constant 0.000000e+00 : f32
    %198 = vector.broadcast %cst_72 : f32 to vector<4x512xf32>
    %199 = arith.maximumf %197, %198 : vector<4x512xf32>
    %200 = arith.truncf %199 : vector<4x512xf32> to vector<4x512xbf16>
    %c0_73 = arith.constant 0 : index
    %c0_74 = arith.constant 0 : index
    %201 = vector.load %arg14[%c0_73, %c0_74] : memref<512x128xbf16, #tpu.memory_space<vmem>>, vector<512x128xbf16>
    %cst_75 = arith.constant dense<0.000000e+00> : vector<4x128xf32>
    %202 = tpu.matmul %200, %201, %cst_75 {dimension_numbers = #tpu.dot_dimension_numbers<[1], [0], [0], [1], [0, 0, 1, 1], [], []>} : vector<4x512xbf16>, vector<512x128xbf16>, vector<4x128xf32> -> vector<4x128xf32>
    %c0_76 = arith.constant 0 : index
    %c0_77 = arith.constant 0 : index
    %203 = vector.load %arg15[%c0_76, %c0_77] : memref<1x128xf32, #tpu.memory_space<vmem>>, vector<1x128xf32>
    %204 = vector.broadcast %203 : vector<1x128xf32> to vector<4x128xf32>
    %205 = arith.addf %202, %204 : vector<4x128xf32>
    %206 = arith.mulf %148, %148 : vector<4x128xf32>
    %cst_78 = arith.constant dense<0.000000e+00> : vector<4xf32>
    %207 = vector.multi_reduction <add>, %206, %cst_78 [1] : vector<4x128xf32> to vector<4xf32>
    %208 = vector.shape_cast %207 : vector<4xf32> to vector<4x1xf32>
    %cst_79 = arith.constant 1.000000e-24 : f32
    %209 = vector.broadcast %cst_79 : f32 to vector<4x1xf32>
    %210 = arith.maximumf %208, %209 : vector<4x1xf32>
    %211 = math.rsqrt %210 : vector<4x1xf32>
    %212 = vector.broadcast %211 : vector<4x1xf32> to vector<4x128xf32>
    %213 = arith.mulf %148, %212 : vector<4x128xf32>
    %214 = arith.mulf %205, %205 : vector<4x128xf32>
    %cst_80 = arith.constant dense<0.000000e+00> : vector<4xf32>
    %215 = vector.multi_reduction <add>, %214, %cst_80 [1] : vector<4x128xf32> to vector<4xf32>
    %216 = vector.shape_cast %215 : vector<4xf32> to vector<4x1xf32>
    %cst_81 = arith.constant 1.000000e-24 : f32
    %217 = vector.broadcast %cst_81 : f32 to vector<4x1xf32>
    %218 = arith.maximumf %216, %217 : vector<4x1xf32>
    %219 = math.rsqrt %218 : vector<4x1xf32>
    %220 = vector.broadcast %219 : vector<4x1xf32> to vector<4x128xf32>
    %221 = arith.mulf %205, %220 : vector<4x128xf32>
    %222 = vector.extract_strided_slice %221 {offsets = [0, 0], sizes = [2, 128], strides = [1, 1]} : vector<4x128xf32> to vector<2x128xf32>
    %223 = vector.extract_strided_slice %213 {offsets = [2, 0], sizes = [2, 128], strides = [1, 1]} : vector<4x128xf32> to vector<2x128xf32>
    %224 = arith.mulf %222, %223 : vector<2x128xf32>
    %225 = vector.extract_strided_slice %221 {offsets = [2, 0], sizes = [2, 128], strides = [1, 1]} : vector<4x128xf32> to vector<2x128xf32>
    %226 = vector.extract_strided_slice %213 {offsets = [0, 0], sizes = [2, 128], strides = [1, 1]} : vector<4x128xf32> to vector<2x128xf32>
    %227 = arith.mulf %225, %226 : vector<2x128xf32>
    %228 = arith.addf %224, %227 : vector<2x128xf32>
    %cst_82 = arith.constant dense<0.000000e+00> : vector<2xf32>
    %229 = vector.multi_reduction <add>, %228, %cst_82 [1] : vector<2x128xf32> to vector<2xf32>
    %230 = vector.shape_cast %229 : vector<2xf32> to vector<2x1xf32>
    %cst_83 = arith.constant dense<0.000000e+00> : vector<1xf32>
    %231 = vector.multi_reduction <add>, %230, %cst_83 [0] : vector<2x1xf32> to vector<1xf32>
    %232 = vector.shape_cast %231 : vector<1xf32> to vector<1x1xf32>
    %cst_84 = arith.constant -2.500000e-01 : f32
    %233 = vector.broadcast %cst_84 : f32 to vector<1x1xf32>
    %234 = arith.mulf %232, %233 : vector<1x1xf32>
    %c0_85 = arith.constant 0 : index
    %c0_86 = arith.constant 0 : index
    %235 = vector.load %arg17[%c0_85, %c0_86] : memref<1x1xf32, #tpu.memory_space<vmem>>, vector<1x1xf32>
    tpu.vector_store %arg17[%c0_85, %c0_86], %234 {strides = array<i32>} : memref<1x1xf32, #tpu.memory_space<vmem>>, vector<1x1xf32>,
    return
  }
  func.func @transform_0(%arg0: i32) -> (i32, i32) {
    %c0_i32 = arith.constant 0 : i32
    %c0_i32_0 = arith.constant 0 : i32
    %c0_i32_1 = arith.constant 0 : i32
    return %c0_i32, %c0_i32_0 : i32, i32
  }
  func.func @transform_1(%arg0: i32) -> (i32, i32) {
    %c0_i32 = arith.constant 0 : i32
    %c0_i32_0 = arith.constant 0 : i32
    %c0_i32_1 = arith.constant 0 : i32
    return %c0_i32, %c0_i32_0 : i32, i32
  }
  func.func @transform_2(%arg0: i32) -> (i32, i32) {
    %c0_i32 = arith.constant 0 : i32
    %c0_i32_0 = arith.constant 0 : i32
    %c0_i32_1 = arith.constant 0 : i32
    return %c0_i32, %c0_i32_0 : i32, i32
  }
  func.func @transform_3(%arg0: i32) -> (i32, i32) {
    %c0_i32 = arith.constant 0 : i32
    %c0_i32_0 = arith.constant 0 : i32
    %c0_i32_1 = arith.constant 0 : i32
    return %c0_i32, %c0_i32_0 : i32, i32
  }
  func.func @transform_4(%arg0: i32) -> (i32, i32) {
    %c0_i32 = arith.constant 0 : i32
    %c0_i32_0 = arith.constant 0 : i32
    %c0_i32_1 = arith.constant 0 : i32
    return %c0_i32, %c0_i32_0 : i32, i32
  }
  func.func @transform_5(%arg0: i32) -> (i32, i32) {
    %c0_i32 = arith.constant 0 : i32
    %c0_i32_0 = arith.constant 0 : i32
    %c0_i32_1 = arith.constant 0 : i32
    return %c0_i32, %c0_i32_0 : i32, i32
  }
  func.func @transform_6(%arg0: i32) -> (i32, i32) {
    %c0_i32 = arith.constant 0 : i32
    %c0_i32_0 = arith.constant 0 : i32
    %c0_i32_1 = arith.constant 0 : i32
    return %c0_i32, %c0_i32_0 : i32, i32
  }
  func.func @transform_7(%arg0: i32) -> (i32, i32) {
    %c0_i32 = arith.constant 0 : i32
    %c0_i32_0 = arith.constant 0 : i32
    %c0_i32_1 = arith.constant 0 : i32
    return %c0_i32, %c0_i32_0 : i32, i32
  }
  func.func @transform_8(%arg0: i32) -> (i32, i32) {
    %c0_i32 = arith.constant 0 : i32
    %c0_i32_0 = arith.constant 0 : i32
    %c0_i32_1 = arith.constant 0 : i32
    return %c0_i32, %c0_i32_0 : i32, i32
  }
  func.func @transform_9(%arg0: i32) -> (i32, i32) {
    %c0_i32 = arith.constant 0 : i32
    %c0_i32_0 = arith.constant 0 : i32
    %c0_i32_1 = arith.constant 0 : i32
    return %c0_i32, %c0_i32_0 : i32, i32
  }
  func.func @transform_10(%arg0: i32) -> (i32, i32) {
    %c0_i32 = arith.constant 0 : i32
    %c0_i32_0 = arith.constant 0 : i32
    %c0_i32_1 = arith.constant 0 : i32
    return %c0_i32, %c0_i32_0 : i32, i32
  }
  func.func @transform_11(%arg0: i32) -> (i32, i32) {
    %c0_i32 = arith.constant 0 : i32
    %c0_i32_0 = arith.constant 0 : i32
    %c0_i32_1 = arith.constant 0 : i32
    return %c0_i32, %c0_i32_0 : i32, i32
  }
  func.func @transform_12(%arg0: i32) -> (i32, i32) {
    %c0_i32 = arith.constant 0 : i32
    %c0_i32_0 = arith.constant 0 : i32
    %c0_i32_1 = arith.constant 0 : i32
    return %c0_i32, %c0_i32_0 : i32, i32
  }
  func.func @transform_13(%arg0: i32) -> (i32, i32) {
    %c0_i32 = arith.constant 0 : i32
    %c0_i32_0 = arith.constant 0 : i32
    %c0_i32_1 = arith.constant 0 : i32
    return %c0_i32, %c0_i32_0 : i32, i32
  }
  func.func @transform_14(%arg0: i32) -> (i32, i32) {
    %c0_i32 = arith.constant 0 : i32
    %c0_i32_0 = arith.constant 0 : i32
    %c0_i32_1 = arith.constant 0 : i32
    return %c0_i32, %c0_i32_0 : i32, i32
  }
  func.func @transform_15(%arg0: i32) -> (i32, i32) {
    %c0_i32 = arith.constant 0 : i32
    %c0_i32_0 = arith.constant 0 : i32
    %c0_i32_1 = arith.constant 0 : i32
    return %c0_i32, %c0_i32_0 : i32, i32
  }
  func.func @transform_16(%arg0: i32) -> (i32, i32) {
    %c0_i32 = arith.constant 0 : i32
    %c0_i32_0 = arith.constant 0 : i32
    %c0_i32_1 = arith.constant 0 : i32
    return %c0_i32, %c0_i32_0 : i32, i32
  }
}

</mosaic_0001>

<bundles_post_ra>
// kernel: simsiam_forward.3
= control target key start
LH: loop header
LB: loop body
LE: loop exit
PB: predicated region body
PF: predicated region fallthrough
CT: control target
= control target key end

     0   :  { %s2444_s0 = inlined_call_operand.vmem [shape: f32[4,128], index: 0, kind: input, shape index: {}]   ;;  %s2445_s1 = inlined_call_operand.vmem [shape: bf16[128,128], index: 1, kind: input, shape index: {}]   ;;  %s2446_s2 = inlined_call_operand.vmem [shape: f32[1,128], index: 2, kind: input, shape index: {}]   ;;  %s2447_s3 = inlined_call_operand.vmem [shape: f32[1,128], index: 3, kind: input, shape index: {}]   ;;  %s2448_s4 = inlined_call_operand.vmem [shape: bf16[128,128], index: 4, kind: input, shape index: {}]   ;;  %s2449_s5 = inlined_call_operand.vmem [shape: f32[1,128], index: 5, kind: input, shape index: {}]   ;;  %s2450_s6 = inlined_call_operand.vmem [shape: f32[1,128], index: 6, kind: input, shape index: {}]   ;;  %s2451_s7 = inlined_call_operand.vmem [shape: bf16[128,128], index: 7, kind: input, shape index: {}]   ;;  %s2452_s8 = inlined_call_operand.vmem [shape: f32[1,128], index: 8, kind: input, shape index: {}]   ;;  %s2453_s9 = inlined_call_operand.vmem [shape: f32[1,128], index: 9, kind: input, shape index: {}]   ;;  %s2454_s10 = inlined_call_operand.vmem [shape: bf16[128,512], index: 10, kind: input, shape index: {}]   ;;  %s2455_s11 = inlined_call_operand.vmem [shape: f32[1,512], index: 11, kind: input, shape index: {}]   ;;  %s2456_s12 = inlined_call_operand.vmem [shape: f32[1,512], index: 12, kind: input, shape index: {}]   ;;  %s2457_s13 = inlined_call_operand.vmem [shape: bf16[512,128], index: 13, kind: input, shape index: {}]   ;;  %s2458_s14 = inlined_call_operand.vmem [shape: f32[1,128], index: 14, kind: input, shape index: {}]   ;;  %s2459_s15 = inlined_call_operand.vmem [shape: f32[4,128], index: 15, kind: output, shape index: {0}]   ;;  %s2460_s16 = inlined_call_operand.hbm [shape: f32[1,1], index: 16, kind: output, shape index: {1}]  }
   0x1   :  { %2461 = sst [smem:[#allocation5_spill]] %s2444_s0 }
   0x2   :  { %v1745_v0 = vld [vmem:[%s2445_s1] sm:$0xff]   ;;  %v1905_v1 = vmov 0.0   ;;  %v1746_v2 = vld [vmem:[%s2445_s1 + $0x8] sm:$0xff]   ;;  %vm1906_vm0 = vmmov 0   ;;  %v1747_v3 = vld [vmem:[%s2445_s1 + $0x10] sm:$0xff]   ;;  %s2462_s24 = sld [smem:[#allocation5_spill]] }
   0x3   :  { %1681 = vmatprep.subr.bf16.mxu0 %v1905_v1  ;;  %1701 = vmatprep.subr.bf16.mxu1 %v1905_v1  ;;  %v1748_v4 = vld [vmem:[%s2445_s1 + $0x18] sm:$0xff]   ;;  %v1749_v5 = vld [vmem:[%s2445_s1 + $0x20] sm:$0xff]   ;;  %v1750_v6 = vld [vmem:[%s2445_s1 + $0x28] sm:$0xff]  }
   0x4   :  { %1682 = vmatpush3.bf16.msra.mxu0 %v1745_v0  ;;  %1697 = vmatprep.mubr.msk.bf16.mxu0 %vm1906_vm0, %v1905_v1  ;;  %v1751_v7 = vld [vmem:[%s2445_s1 + $0x30] sm:$0xff]   ;;  %v1752_v8 = vld [vmem:[%s2445_s1 + $0x38] sm:$0xff]  }
   0x5   :  { %1683 = vmatprep.subr.bf16.mxu0 %v1905_v1  ;;  %1717 = vmatprep.mubr.msk.bf16.mxu1 %vm1906_vm0, %v1905_v1 }
   0x8   :  { %1684 = vmatpush3.bf16.msra.mxu0 %v1746_v2  ;;  %v54_v9 = vld [vmem:[%s2462_s24] sm:$0xf] }
   0x9   :  { %1685 = vmatprep.subr.bf16.mxu0 %v1905_v1  ;;  %v55_v10 = vpack.c.bf16 %v54_v9, %v54_v9 }
   0xc   :  { %1686 = vmatpush3.bf16.msra.mxu0 %v1747_v3 }
   0xd   :  { %1687 = vmatprep.subr.bf16.mxu0 %v1905_v1 }
  0x10   :  { %1688 = vmatpush3.bf16.msra.mxu0 %v1748_v4 }
  0x11   :  { %1689 = vmatprep.subr.bf16.mxu0 %v1905_v1 }
  0x14   :  { %1690 = vmatpush3.bf16.msra.mxu0 %v1749_v5 }
  0x15   :  { %1691 = vmatprep.subr.bf16.mxu0 %v1905_v1 }
  0x18   :  { %1692 = vmatpush3.bf16.msra.mxu0 %v1750_v6 }
  0x19   :  { %1693 = vmatprep.subr.bf16.mxu0 %v1905_v1 }
  0x1c   :  { %1694 = vmatpush3.bf16.msra.mxu0 %v1751_v7 }
  0x1d   :  { %1695 = vmatprep.subr.bf16.mxu0 %v1905_v1 }
  0x20   :  { %1696 = vmatpush3.bf16.msra.mxu0 %v1752_v8 }
  0x21   :  { %1721 = vmatprep.subr.bf16.mxu0 %v1905_v1 }
  0x23   :  { %1698 = vmatmul.mubr.bf16.vlgmr.msra.gmra.mrb[0].mxu0 %v55_v10 }
  0x24   :  { %1737 = vmatprep.mubr.msk.bf16.mxu0 %vm1906_vm0, %v1905_v1 }
  0x25   :  { %22 = vsyncpa [#allocation3], 0  ;;  %v1753_v11 = vld [vmem:[%s2448_s4] sm:$0xff]   ;;  %v1754_v12 = vld [vmem:[%s2448_s4 + $0x8] sm:$0xff]   ;;  %vm162_vm1 = vcmask 1041408   ;;  %vm1459_vm2 = vcmask 1043456  }
  0x26   :  { %1702 = vmatpush3.bf16.msra.mxu1 %v1753_v11  ;;  %v1755_v13 = vld [vmem:[%s2448_s4 + $0x10] sm:$0xff]   ;;  %v1756_v14 = vld [vmem:[%s2448_s4 + $0x18] sm:$0xff]   ;;  %v1757_v15 = vld [vmem:[%s2448_s4 + $0x20] sm:$0xff]   ;;  %vm1495_vm3 = vcmask 0  }
  0x27   :  { %1703 = vmatprep.subr.bf16.mxu1 %v1905_v1  ;;  %v1758_v16 = vld [vmem:[%s2448_s4 + $0x28] sm:$0xff]   ;;  %v1759_v17 = vld [vmem:[%s2448_s4 + $0x30] sm:$0xff]   ;;  %v1760_v18 = vld [vmem:[%s2448_s4 + $0x38] sm:$0xff]  }
  0x28   :  { %v1523_v2 = vld [vmem:[%s2446_s2] ss:$0 sm:$0xff] }
  0x29   :  { %v1524_v6 = vld [vmem:[%s2447_s3] ss:$0 sm:$0xff] }
  0x2a   :  { %1704 = vmatpush3.bf16.msra.mxu1 %v1754_v12 }
  0x2b   :  { %1705 = vmatprep.subr.bf16.mxu1 %v1905_v1 }
  0x2e   :  { %1706 = vmatpush3.bf16.msra.mxu1 %v1755_v13  ;;  %v1761_v13 = vld [vmem:[%s2451_s7] sm:$0xff]  }
  0x2f   :  { %1707 = vmatprep.subr.bf16.mxu1 %v1905_v1  ;;  %1722 = vmatpush3.bf16.msra.mxu0 %v1761_v13 }
  0x30   :  { %1723 = vmatprep.subr.bf16.mxu0 %v1905_v1 }
  0x32   :  { %1708 = vmatpush3.bf16.msra.mxu1 %v1756_v14  ;;  %v1762_v14 = vld [vmem:[%s2451_s7 + $0x8] sm:$0xff]  }
  0x33   :  { %1709 = vmatprep.subr.bf16.mxu1 %v1905_v1  ;;  %1724 = vmatpush3.bf16.msra.mxu0 %v1762_v14  ;;  %v1771_v14 = vld [vmem:[%s2454_s10 + $0x4] ss:$16 sps:$4 sm:$0xff]  }
  0x34   :  { %1725 = vmatprep.subr.bf16.mxu0 %v1905_v1 }
  0x36   :  { %1710 = vmatpush3.bf16.msra.mxu1 %v1757_v15  ;;  %v1763_v15 = vld [vmem:[%s2451_s7 + $0x10] sm:$0xff]  }
  0x37   :  { %1711 = vmatprep.subr.bf16.mxu1 %v1905_v1  ;;  %1726 = vmatpush3.bf16.msra.mxu0 %v1763_v15  ;;  %v1774_v15 = vld [vmem:[%s2454_s10 + $0xc] ss:$16 sps:$4 sm:$0xff]  }
  0x38   :  { %1727 = vmatprep.subr.bf16.mxu0 %v1905_v1 }
  0x3a   :  { %1712 = vmatpush3.bf16.msra.mxu1 %v1758_v16  ;;  %v1764_v16 = vld [vmem:[%s2451_s7 + $0x18] sm:$0xff]  }
  0x3b   :  { %1713 = vmatprep.subr.bf16.mxu1 %v1905_v1  ;;  %1728 = vmatpush3.bf16.msra.mxu0 %v1764_v16  ;;  %v1769_v16 = vld [vmem:[%s2454_s10] ss:$16 sps:$4 sm:$0xff]  }
  0x3c   :  { %1729 = vmatprep.subr.bf16.mxu0 %v1905_v1 }
  0x3e   :  { %1714 = vmatpush3.bf16.msra.mxu1 %v1759_v17  ;;  %v1765_v17 = vld [vmem:[%s2451_s7 + $0x20] sm:$0xff]  }
  0x3f   :  { %1715 = vmatprep.subr.bf16.mxu1 %v1905_v1  ;;  %1730 = vmatpush3.bf16.msra.mxu0 %v1765_v17  ;;  %v1772_v17 = vld [vmem:[%s2454_s10 + $0x8] ss:$16 sps:$4 sm:$0xff]  }
  0x40   :  { %1731 = vmatprep.subr.bf16.mxu0 %v1905_v1 }
  0x42   :  { %1716 = vmatpush3.bf16.msra.mxu1 %v1760_v18  ;;  %v1766_v18 = vld [vmem:[%s2451_s7 + $0x28] sm:$0xff]  }
  0x43   :  { %1732 = vmatpush3.bf16.msra.mxu0 %v1766_v18  ;;  %769 = vmatprep.subr.bf16.mxu1 %v1771_v14  ;;  %v1777_v18 = vld [vmem:[%s2454_s10 + $0x24] ss:$16 sps:$4 sm:$0xff]  }
  0x44   :  { %1733 = vmatprep.subr.bf16.mxu0 %v1905_v1 }
  0xf6   :  { %v154_v19 = vpop.f32.mrb[0].mxu0 }
  0xf7   :  { %v163_v20 = vsel %vm162_vm1, %v154_v19, 0.0  ;;  %v200_v21 = vrot.slane %v154_v19, 2  ;;  %v1699_v22 = vpop.f32.mrb[1].mxu0 }
  0xf8   :  { %v164_v23 = vrot.slane %v163_v20, 4  ;;  %v157_v24 = vpop.f32.mrb[2].mxu0 }
  0xf9   :  { %v202_v25 = vsel %vm162_vm1, %v200_v21, 0.0  ;;  %v1700_v26 = vpop.f32.mrb[3].mxu0 }
  0xfa   :  { %v165_v27 = vadd.f32 %v164_v23, %v163_v20  ;;  %v203_v28 = vrot.slane %v202_v25, 4  ;;  %v1768_v20 = vld [vmem:[%s2451_s7 + $0x38] sm:$0xff]  }
  0xfc   :  { %v166_v29 = vrot.slane %v165_v27, 2  ;;  %v204_v30 = vadd.f32 %v203_v28, %v202_v25 }
  0xfe   :  { %v167_v31 = vadd.f32 %v166_v29, %v165_v27  ;;  %v205_v32 = vrot.slane %v204_v30, 2 }
 0x100   :  { %v168_v33 = vrot.slane %v167_v31, 1  ;;  %v206_v34 = vadd.f32 %v205_v32, %v204_v30 }
 0x102   :  { %v169_v35 = vadd.f32 %v168_v33, %v167_v31  ;;  %v207_v36 = vrot.slane %v206_v34, 1 }
 0x104   :  { %v171_v37 = vmul.f32 0.5, %v169_v35  ;;  %v208_v38 = vadd.f32 %v207_v36, %v206_v34 }
 0x106   :  { %v172_v39 = vsub.f32 %v154_v19, %v171_v37  ;;  %v209_v40 = vmul.f32 0.5, %v208_v38 }
 0x108   :  { %v173_v41 = vmul.f32 %v172_v39, %v172_v39  ;;  %v210_v42 = vsub.f32 %v154_v19, %v209_v40  ;;  %v1767_v19 = vld [vmem:[%s2451_s7 + $0x30] sm:$0xff]  }
 0x109   :  { %1734 = vmatpush3.bf16.msra.mxu0 %v1767_v19  ;;  %v1780_v19 = vld [vmem:[%s2454_s10 + $0x2c] ss:$16 sps:$4 sm:$0xff]  }
 0x10a   :  { %v174_v43 = vsel %vm162_vm1, %v173_v41, 0.0  ;;  %v211_v44 = vmul.f32 %v210_v42, %v210_v42  ;;  %1735 = vmatprep.subr.bf16.mxu0 %v1905_v1 }
 0x10b   :  { %v175_v45 = vrot.slane %v174_v43, 4 }
 0x10c   :  { %v213_v46 = vrot.slane %v211_v44, 2 }
 0x10d   :  { %v176_v47 = vadd.f32 %v175_v45, %v174_v43  ;;  %1736 = vmatpush3.bf16.msra.mxu0 %v1768_v20  ;;  %v1775_v20 = vld [vmem:[%s2454_s10 + $0x20] ss:$16 sps:$4 sm:$0xff]  }
 0x10e   :  { %v215_v48 = vsel %vm162_vm1, %v213_v46, 0.0  ;;  %810 = vmatprep.subr.bf16.mxu0 %v1774_v15 }
 0x10f   :  { %v177_v49 = vrot.slane %v176_v47, 2  ;;  %v216_v50 = vrot.slane %v215_v48, 4 }
 0x111   :  { %v178_v51 = vadd.f32 %v177_v49, %v176_v47  ;;  %v217_v52 = vadd.f32 %v216_v50, %v215_v48 }
 0x113   :  { %v179_v53 = vrot.slane %v178_v51, 1  ;;  %v218_v54 = vrot.slane %v217_v52, 2 }
 0x115   :  { %v180_v55 = vadd.f32 %v179_v53, %v178_v51  ;;  %v219_v56 = vadd.f32 %v218_v54, %v217_v52 }
 0x117   :  { %v181_v57 = vmul.f32 0.5, %v180_v55  ;;  %v220_v58 = vrot.slane %v219_v56, 1 }
 0x119   :  { %v182_v59 = vadd.f32 1e-05, %v181_v57  ;;  %v221_v60 = vadd.f32 %v220_v58, %v219_v56 }
 0x11b   :  { %1849 = vrsqrt.f32 %v182_v59  ;;  %v222_v61 = vmul.f32 0.5, %v221_v60 }
 0x11d   :  { %v223_v62 = vadd.f32 1e-05, %v222_v61 }
 0x11f   :  { %1851 = vrsqrt.f32 %v223_v62 }
 0x125   :  { %v1850_v63 = vpop.eup %1849 }
 0x126   :  { %v184_v0 = vmul.f32 %v1850_v63, %v172_v39 }
 0x128   :  { %v191_v4 = vmul.f32 %v1523_v2, %v184_v0 }
 0x129   :  { %v1852_v3 = vpop.eup %1851 }
 0x12a   :  { %v225_v5 = vmul.f32 %v1852_v3, %v210_v42  ;;  %v198_v8 = vadd.f32 %v1524_v6, %v191_v4  ;;  %v1533_v3 = vld [vmem:[%s2449_s5] ss:$0 sm:$0xff] }
 0x12c   :  { %v226_v7 = vmul.f32 %v1523_v2, %v225_v5 }
 0x12e   :  { %v227_v9 = vadd.f32 %v1524_v6, %v226_v7  ;;  %v1534_v7 = vld [vmem:[%s2450_s6] ss:$0 sm:$0xff] }
 0x130   :  { %v228_v10 = vsel %vm162_vm1, %v198_v8, %v227_v9 }
 0x131   :  { %v229_v11 = vmax.f32 %v228_v10, 0.0 }
 0x133   :  { %v230_v12 = vpack.c.bf16 %v229_v11, %v229_v11 }
 0x135   :  { %1718 = vmatmul.mubr.bf16.vlgmr.msra.gmra.mrb[0].mxu1 %v230_v12 }
 0x136   :  { %770 = vmatpush1.bf16.msra.mxu1 %v1769_v16 }
 0x137   :  { %771 = vmatprep.subr.bf16.mxu1 %v1777_v18 }
 0x13a   :  { %772 = vmatpush1.bf16.msra.mxu1 %v1775_v20 }
 0x208   :  { %v329_v21 = vpop.f32.mrb[0].mxu1 }
 0x209   :  { %v337_v22 = vsel %vm162_vm1, %v329_v21, 0.0  ;;  %v373_v23 = vrot.slane %v329_v21, 2  ;;  %v1719_v24 = vpop.f32.mrb[1].mxu1 }
 0x20a   :  { %v338_v25 = vrot.slane %v337_v22, 4  ;;  %v332_v26 = vpop.f32.mrb[2].mxu1  ;;  %v1781_v24 = vld [vmem:[%s2454_s10 + $0x40] ss:$16 sps:$4 sm:$0xff]  }
 0x20b   :  { %v375_v27 = vsel %vm162_vm1, %v373_v23, 0.0  ;;  %v1720_v28 = vpop.f32.mrb[3].mxu1  ;;  %v1786_v23 = vld [vmem:[%s2454_s10 + $0x4c] ss:$16 sps:$4 sm:$0xff]   ;;  %v1789_v26 = vld [vmem:[%s2454_s10 + $0x64] ss:$16 sps:$4 sm:$0xff]  }
 0x20c   :  { %v339_v29 = vadd.f32 %v338_v25, %v337_v22  ;;  %v376_v30 = vrot.slane %v375_v27, 4  ;;  %v1783_v22 = vld [vmem:[%s2454_s10 + $0x44] ss:$16 sps:$4 sm:$0xff]   ;;  %v1784_v25 = vld [vmem:[%s2454_s10 + $0x48] ss:$16 sps:$4 sm:$0xff]  }
 0x20d   :  { %773 = vmatprep.subr.bf16.mxu1 %v1783_v22  ;;  %v1787_v28 = vld [vmem:[%s2454_s10 + $0x60] ss:$16 sps:$4 sm:$0xff]  }
 0x20e   :  { %v340_v31 = vrot.slane %v339_v29, 2  ;;  %v377_v32 = vadd.f32 %v376_v30, %v375_v27  ;;  %774 = vmatpush1.bf16.msra.mxu1 %v1781_v24  ;;  %v1792_v27 = vld [vmem:[%s2454_s10 + $0x6c] ss:$16 sps:$4 sm:$0xff]   ;;  %v1795_v30 = vld [vmem:[%s2454_s10 + $0x84] ss:$16 sps:$4 sm:$0xff]  }
 0x20f   :  { %775 = vmatprep.subr.bf16.mxu1 %v1789_v26 }
 0x210   :  { %v341_v33 = vadd.f32 %v340_v31, %v339_v29  ;;  %v378_v34 = vrot.slane %v377_v32, 2  ;;  %v1790_v29 = vld [vmem:[%s2454_s10 + $0x68] ss:$16 sps:$4 sm:$0xff]   ;;  %v1798_v31 = vld [vmem:[%s2454_s10 + $0x8c] ss:$16 sps:$4 sm:$0xff]  }
 0x212   :  { %v342_v35 = vrot.slane %v341_v33, 1  ;;  %v379_v36 = vadd.f32 %v378_v34, %v377_v32  ;;  %776 = vmatpush1.bf16.msra.mxu1 %v1787_v28  ;;  %v1793_v32 = vld [vmem:[%s2454_s10 + $0x80] ss:$16 sps:$4 sm:$0xff]   ;;  %v1801_v34 = vld [vmem:[%s2454_s10 + $0xa4] ss:$16 sps:$4 sm:$0xff]  }
 0x213   :  { %777 = vmatprep.subr.bf16.mxu1 %v1795_v30 }
 0x214   :  { %v343_v1 = vadd.f32 %v342_v35, %v341_v33  ;;  %v380_v37 = vrot.slane %v379_v36, 1  ;;  %v1796_v33 = vld [vmem:[%s2454_s10 + $0x88] ss:$16 sps:$4 sm:$0xff]   ;;  %v1804_v35 = vld [vmem:[%s2454_s10 + $0xac] ss:$16 sps:$4 sm:$0xff]  }
 0x216   :  { %v344_v38 = vmul.f32 0.5, %v343_v1  ;;  %v381_v39 = vadd.f32 %v380_v37, %v379_v36  ;;  %778 = vmatpush1.bf16.msra.mxu1 %v1793_v32  ;;  %v1799_v36 = vld [vmem:[%s2454_s10 + $0xa0] ss:$16 sps:$4 sm:$0xff]   ;;  %v1802_v1 = vld [vmem:[%s2454_s10 + $0xa8] ss:$16 sps:$4 sm:$0xff]  }
 0x217   :  { %779 = vmatprep.subr.bf16.mxu1 %v1801_v34  ;;  %v1807_v37 = vld [vmem:[%s2454_s10 + $0xc4] ss:$16 sps:$4 sm:$0xff]  }
 0x218   :  { %v345_v40 = vsub.f32 %v329_v21, %v344_v38  ;;  %v382_v41 = vmul.f32 0.5, %v381_v39  ;;  %v1810_v38 = vld [vmem:[%s2454_s10 + $0xcc] ss:$16 sps:$4 sm:$0xff]   ;;  %v1805_v39 = vld [vmem:[%s2454_s10 + $0xc0] ss:$16 sps:$4 sm:$0xff]  }
 0x21a   :  { %v346_v42 = vmul.f32 %v345_v40, %v345_v40  ;;  %v383_v43 = vsub.f32 %v329_v21, %v382_v41  ;;  %v1778_v21 = vld [vmem:[%s2454_s10 + $0x28] ss:$16 sps:$4 sm:$0xff]   ;;  %780 = vmatpush1.bf16.msra.mxu1 %v1799_v36  ;;  %v1813_v41 = vld [vmem:[%s2454_s10 + $0xe4] ss:$16 sps:$4 sm:$0xff]  }
 0x21b   :  { %781 = vmatprep.subr.bf16.mxu1 %v1807_v37 }
 0x21c   :  { %v347_v44 = vsel %vm162_vm1, %v346_v42, 0.0  ;;  %v384_v45 = vmul.f32 %v383_v43, %v383_v43  ;;  %v1816_v42 = vld [vmem:[%s2454_s10 + $0xec] ss:$16 sps:$4 sm:$0xff]  }
 0x21d   :  { %v348_v46 = vrot.slane %v347_v44, 4 }
 0x21e   :  { %v386_v47 = vrot.slane %v384_v45, 2  ;;  %782 = vmatpush1.bf16.msra.mxu1 %v1805_v39  ;;  %v1907_v45 = vmov 0  }
 0x21f   :  { %v349_v48 = vadd.f32 %v348_v46, %v347_v44  ;;  %v1814_v44 = vld [vmem:[%s2454_s10 + $0xe8] ss:$16 sps:$4 sm:$0xff]   ;;  %783 = vmatprep.subr.bf16.mxu1 %v1813_v41  ;;  %801 = vmatprep.mubr.bf16.mxu1 %v1907_v45  ;;  %v1818_v41 = vld [vmem:[%s2457_s13 + $0xc0] sm:$0xff]  }
 0x220   :  { %v388_v49 = vsel %vm162_vm1, %v386_v47, 0.0 }
 0x221   :  { %v350_v50 = vrot.slane %v349_v48, 2  ;;  %v389_v51 = vrot.slane %v388_v49, 4 }
 0x223   :  { %v351_v52 = vadd.f32 %v350_v50, %v349_v48  ;;  %v390_v53 = vadd.f32 %v389_v51, %v388_v49 }
 0x225   :  { %v352_v54 = vrot.slane %v351_v52, 1  ;;  %v391_v55 = vrot.slane %v390_v53, 2 }
 0x227   :  { %v353_v56 = vadd.f32 %v352_v54, %v351_v52  ;;  %v392_v57 = vadd.f32 %v391_v55, %v390_v53 }
 0x229   :  { %v354_v58 = vmul.f32 0.5, %v353_v56  ;;  %v393_v59 = vrot.slane %v392_v57, 1 }
 0x22b   :  { %v355_v60 = vadd.f32 1e-05, %v354_v58  ;;  %v394_v61 = vadd.f32 %v393_v59, %v392_v57 }
 0x22d   :  { %1853 = vrsqrt.f32 %v355_v60  ;;  %v395_v62 = vmul.f32 0.5, %v394_v61 }
 0x22f   :  { %v396_v63 = vadd.f32 1e-05, %v395_v62 }
 0x231   :  { %1855 = vrsqrt.f32 %v396_v63 }
 0x237   :  { %v1854_v0 = vpop.eup %1853 }
 0x238   :  { %v357_v2 = vmul.f32 %v1854_v0, %v345_v40  ;;  %v1808_v40 = vld [vmem:[%s2454_s10 + $0xc8] ss:$16 sps:$4 sm:$0xff]  }
 0x23a   :  { %v364_v5 = vmul.f32 %v1533_v3, %v357_v2 }
 0x23b   :  { %v1856_v4 = vpop.eup %1855 }
 0x23c   :  { %v398_v6 = vmul.f32 %v1856_v4, %v383_v43  ;;  %v371_v9 = vadd.f32 %v1534_v7, %v364_v5  ;;  %v1811_v43 = vld [vmem:[%s2454_s10 + $0xe0] ss:$16 sps:$4 sm:$0xff]  }
 0x23d   :  { %784 = vmatpush1.bf16.msra.mxu1 %v1811_v43  ;;  %v1820_v43 = vld [vmem:[%s2457_s13 + $0x80] sm:$0xff]  }
 0x23e   :  { %v399_v8 = vmul.f32 %v1533_v3, %v398_v6 }
 0x240   :  { %v400_v10 = vadd.f32 %v1534_v7, %v399_v8 }
 0x242   :  { %v401_v11 = vsel %vm162_vm1, %v371_v9, %v400_v10 }
 0x243   :  { %v402_v12 = vmax.f32 %v401_v11, 0.0 }
 0x245   :  { %v403_v13 = vpack.c.bf16 %v402_v12, %v402_v12 }
 0x247   :  { %1738 = vmatmul.mubr.bf16.vlgmr.msra.gmra.mrb[4].mxu0 %v403_v13 }
 0x248   :  { %811 = vmatpush1.bf16.msra.mxu0 %v1772_v17  ;;  %842 = vmatprep.mubr.bf16.mxu0 %v1907_v45  ;;  %v1822_v45 = vld [vmem:[%s2457_s13 + $0xc8] sm:$0xff]  }
 0x249   :  { %812 = vmatprep.subr.bf16.mxu0 %v1780_v19 }
 0x24c   :  { %813 = vmatpush1.bf16.msra.mxu0 %v1778_v21 }
 0x24d   :  { %814 = vmatprep.subr.bf16.mxu0 %v1786_v23 }
 0x250   :  { %815 = vmatpush1.bf16.msra.mxu0 %v1784_v25 }
 0x251   :  { %816 = vmatprep.subr.bf16.mxu0 %v1792_v27 }
 0x254   :  { %817 = vmatpush1.bf16.msra.mxu0 %v1790_v29  ;;  %v1543_v29 = vld [vmem:[%s2452_s8] ss:$0 sm:$0xff] }
 0x255   :  { %818 = vmatprep.subr.bf16.mxu0 %v1798_v31 }
 0x258   :  { %819 = vmatpush1.bf16.msra.mxu0 %v1796_v33  ;;  %v1544_v33 = vld [vmem:[%s2453_s9] ss:$0 sm:$0xff] }
 0x259   :  { %820 = vmatprep.subr.bf16.mxu0 %v1804_v35 }
 0x25c   :  { %821 = vmatpush1.bf16.msra.mxu0 %v1802_v1 }
 0x25d   :  { %822 = vmatprep.subr.bf16.mxu0 %v1810_v38 }
 0x260   :  { %823 = vmatpush1.bf16.msra.mxu0 %v1808_v40  ;;  %v1817_v40 = vld [vmem:[%s2457_s13 + $0x40] sm:$0xff]  }
 0x261   :  { %824 = vmatprep.subr.bf16.mxu0 %v1816_v42  ;;  %v1819_v42 = vld [vmem:[%s2457_s13] sm:$0xff]   ;;  %1637 = vmatprep.subr.bf16.mxu1 %v1817_v40 }
 0x264   :  { %825 = vmatpush1.bf16.msra.mxu0 %v1814_v44  ;;  %v1821_v44 = vld [vmem:[%s2457_s13 + $0x48] sm:$0xff]  }
 0x265   :  { %1659 = vmatprep.subr.bf16.mxu0 %v1818_v41 }
 0x31a   :  { %v502_v46 = vpop.f32.mrb[4].mxu0 }
 0x31b   :  { %v510_v47 = vsel %vm162_vm1, %v502_v46, 0.0  ;;  %v546_v48 = vrot.slane %v502_v46, 2  ;;  %v1739_v49 = vpop.f32.mrb[5].mxu0 }
 0x31c   :  { %v511_v50 = vrot.slane %v510_v47, 4  ;;  %v505_v51 = vpop.f32.mrb[6].mxu0  ;;  %v1826_v49 = vld [vmem:[%s2457_s13 + $0xd0] sm:$0xff]  }
 0x31d   :  { %v548_v52 = vsel %vm162_vm1, %v546_v48, 0.0  ;;  %v1740_v53 = vpop.f32.mrb[7].mxu0  ;;  %v1825_v48 = vld [vmem:[%s2457_s13 + $0x50] sm:$0xff]  }
 0x31e   :  { %v512_v54 = vadd.f32 %v511_v50, %v510_v47  ;;  %v549_v55 = vrot.slane %v548_v52, 4  ;;  %v1824_v47 = vld [vmem:[%s2457_s13 + $0x88] sm:$0xff]   ;;  %v1827_v50 = vld [vmem:[%s2457_s13 + $0x10] sm:$0xff]   ;;  %v1830_v53 = vld [vmem:[%s2457_s13 + $0xd8] sm:$0xff]  }
 0x31f   :  { %v1828_v51 = vld [vmem:[%s2457_s13 + $0x90] sm:$0xff]  }
 0x320   :  { %v513_v56 = vrot.slane %v512_v54, 2  ;;  %v550_v57 = vadd.f32 %v549_v55, %v548_v52  ;;  %v1829_v52 = vld [vmem:[%s2457_s13 + $0x58] sm:$0xff]  }
 0x321   :  { %v1832_v55 = vld [vmem:[%s2457_s13 + $0x98] sm:$0xff]  }
 0x322   :  { %v514_v58 = vadd.f32 %v513_v56, %v512_v54  ;;  %v551_v59 = vrot.slane %v550_v57, 2  ;;  %v1831_v54 = vld [vmem:[%s2457_s13 + $0x18] sm:$0xff]   ;;  %v1833_v56 = vld [vmem:[%s2457_s13 + $0x60] sm:$0xff]  }
 0x324   :  { %v515_v60 = vrot.slane %v514_v58, 1  ;;  %v552_v61 = vadd.f32 %v551_v59, %v550_v57  ;;  %v1834_v57 = vld [vmem:[%s2457_s13 + $0xe0] sm:$0xff]  }
 0x325   :  { %v1836_v59 = vld [vmem:[%s2457_s13 + $0xa0] sm:$0xff]  }
 0x326   :  { %v516_v62 = vadd.f32 %v515_v60, %v514_v58  ;;  %v553_v63 = vrot.slane %v552_v61, 1  ;;  %v1835_v58 = vld [vmem:[%s2457_s13 + $0x20] sm:$0xff]   ;;  %v1837_v60 = vld [vmem:[%s2457_s13 + $0x68] sm:$0xff]  }
 0x328   :  { %v517_v0 = vmul.f32 0.5, %v516_v62  ;;  %v554_v2 = vadd.f32 %v553_v63, %v552_v61  ;;  %v1838_v61 = vld [vmem:[%s2457_s13 + $0xe8] sm:$0xff]  }
 0x329   :  { %v1839_v62 = vld [vmem:[%s2457_s13 + $0x28] sm:$0xff]  }
 0x32a   :  { %v518_v3 = vsub.f32 %v502_v46, %v517_v0  ;;  %v555_v4 = vmul.f32 0.5, %v554_v2  ;;  %v1840_v63 = vld [vmem:[%s2457_s13 + $0xa8] sm:$0xff]   ;;  %v1841_v0 = vld [vmem:[%s2457_s13 + $0x70] sm:$0xff]  }
 0x32b   :  { %v1842_v2 = vld [vmem:[%s2457_s13 + $0xf0] sm:$0xff]  }
 0x32c   :  { %v519_v5 = vmul.f32 %v518_v3, %v518_v3  ;;  %v556_v6 = vsub.f32 %v502_v46, %v555_v4  ;;  %v1823_v46 = vld [vmem:[%s2457_s13 + $0x8] sm:$0xff]   ;;  %v1844_v4 = vld [vmem:[%s2457_s13 + $0xb0] sm:$0xff]  }
 0x32e   :  { %v520_v7 = vsel %vm162_vm1, %v519_v5, 0.0  ;;  %v557_v8 = vmul.f32 %v556_v6, %v556_v6  ;;  %v1845_v5 = vld [vmem:[%s2457_s13 + $0x78] sm:$0xff]  }
 0x32f   :  { %v521_v9 = vrot.slane %v520_v7, 4 }
 0x330   :  { %v559_v10 = vrot.slane %v557_v8, 2  ;;  %v1848_v8 = vld [vmem:[%s2457_s13 + $0xb8] sm:$0xff]  }
 0x331   :  { %v522_v11 = vadd.f32 %v521_v9, %v520_v7  ;;  %v1847_v7 = vld [vmem:[%s2457_s13 + $0x38] sm:$0xff]  }
 0x332   :  { %v561_v12 = vsel %vm162_vm1, %v559_v10, 0.0 }
 0x333   :  { %v523_v13 = vrot.slane %v522_v11, 2  ;;  %v562_v14 = vrot.slane %v561_v12, 4 }
 0x335   :  { %v524_v15 = vadd.f32 %v523_v13, %v522_v11  ;;  %v563_v16 = vadd.f32 %v562_v14, %v561_v12 }
 0x337   :  { %v525_v17 = vrot.slane %v524_v15, 1  ;;  %v564_v18 = vrot.slane %v563_v16, 2 }
 0x339   :  { %v526_v19 = vadd.f32 %v525_v17, %v524_v15  ;;  %v565_v20 = vadd.f32 %v564_v18, %v563_v16 }
 0x33b   :  { %v527_v21 = vmul.f32 0.5, %v526_v19  ;;  %v566_v22 = vrot.slane %v565_v20, 1 }
 0x33d   :  { %v528_v23 = vadd.f32 1e-05, %v527_v21  ;;  %v567_v24 = vadd.f32 %v566_v22, %v565_v20 }
 0x33f   :  { %1857 = vrsqrt.f32 %v528_v23  ;;  %v568_v25 = vmul.f32 0.5, %v567_v24 }
 0x341   :  { %v569_v26 = vadd.f32 1e-05, %v568_v25 }
 0x343   :  { %1859 = vrsqrt.f32 %v569_v26 }
 0x349   :  { %v1858_v27 = vpop.eup %1857 }
 0x34a   :  { %v530_v28 = vmul.f32 %v1858_v27, %v518_v3  ;;  %v1843_v3 = vld [vmem:[%s2457_s13 + $0x30] sm:$0xff]  }
 0x34c   :  { %v537_v31 = vmul.f32 %v1543_v29, %v530_v28 }
 0x34d   :  { %v1860_v30 = vpop.eup %1859 }
 0x34e   :  { %v571_v32 = vmul.f32 %v1860_v30, %v556_v6  ;;  %v544_v35 = vadd.f32 %v1544_v33, %v537_v31  ;;  %v1846_v6 = vld [vmem:[%s2457_s13 + $0xf8] sm:$0xff]  }
 0x350   :  { %v572_v34 = vmul.f32 %v1543_v29, %v571_v32 }
 0x352   :  { %v573_v36 = vadd.f32 %v1544_v33, %v572_v34 }
 0x354   :  { %v2228_v1 = vsel %vm162_vm1, %v544_v35, %v573_v36 }
 0x355   :  { %575 = vst [vmem:[%s2459_s15] sm:$0xf] %v2228_v1  ;;  %v576_v37 = vpack.c.bf16 %v2228_v1, %v2228_v1  ;;  %v1458_v38 = vmul.f32 %v2228_v1, %v2228_v1 }
 0x357   :  { %802 = vmatmul.mubr.bf16.vlgmr.msra.gmra.mrb[4].mxu1 %v576_v37  ;;  %843 = vmatmul.mubr.bf16.vlgmr.msra.gmra.mrb[8].mxu0 %v576_v37  ;;  %v1460_v39 = vsel %vm1459_vm2, %v1458_v38, 0.0 }
 0x358   :  { %1461 = vadd.xlane.f32.xlu0 %v1460_v39  ;;  %1638 = vmatpush3.bf16.msra.mxu1 %v1819_v42 }
 0x359   :  { %1660 = vmatpush3.bf16.msra.mxu0 %v1820_v43  ;;  %1639 = vmatprep.subr.bf16.mxu1 %v1821_v44 }
 0x35a   :  { %1661 = vmatprep.subr.bf16.mxu0 %v1822_v45 }
 0x35c   :  { %1640 = vmatpush3.bf16.msra.mxu1 %v1823_v46 }
 0x35d   :  { %1662 = vmatpush3.bf16.msra.mxu0 %v1824_v47  ;;  %1641 = vmatprep.subr.bf16.mxu1 %v1825_v48 }
 0x35e   :  { %1663 = vmatprep.subr.bf16.mxu0 %v1826_v49 }
 0x360   :  { %1642 = vmatpush3.bf16.msra.mxu1 %v1827_v50 }
 0x361   :  { %1664 = vmatpush3.bf16.msra.mxu0 %v1828_v51  ;;  %1643 = vmatprep.subr.bf16.mxu1 %v1829_v52 }
 0x362   :  { %1665 = vmatprep.subr.bf16.mxu0 %v1830_v53 }
 0x364   :  { %1644 = vmatpush3.bf16.msra.mxu1 %v1831_v54 }
 0x365   :  { %1666 = vmatpush3.bf16.msra.mxu0 %v1832_v55  ;;  %1645 = vmatprep.subr.bf16.mxu1 %v1833_v56 }
 0x366   :  { %1667 = vmatprep.subr.bf16.mxu0 %v1834_v57 }
 0x368   :  { %1646 = vmatpush3.bf16.msra.mxu1 %v1835_v58 }
 0x369   :  { %1668 = vmatpush3.bf16.msra.mxu0 %v1836_v59  ;;  %1647 = vmatprep.subr.bf16.mxu1 %v1837_v60 }
 0x36a   :  { %1669 = vmatprep.subr.bf16.mxu0 %v1838_v61 }
 0x36c   :  { %1648 = vmatpush3.bf16.msra.mxu1 %v1839_v62 }
 0x36d   :  { %1670 = vmatpush3.bf16.msra.mxu0 %v1840_v63  ;;  %1649 = vmatprep.subr.bf16.mxu1 %v1841_v0 }
 0x36e   :  { %1671 = vmatprep.subr.bf16.mxu0 %v1842_v2 }
 0x370   :  { %1650 = vmatpush3.bf16.msra.mxu1 %v1843_v3 }
 0x371   :  { %1672 = vmatpush3.bf16.msra.mxu0 %v1844_v4  ;;  %1651 = vmatprep.subr.bf16.mxu1 %v1845_v5 }
 0x372   :  { %1673 = vmatprep.subr.bf16.mxu0 %v1846_v6 }
 0x374   :  { %1652 = vmatpush3.bf16.msra.mxu1 %v1847_v7 }
 0x375   :  { %1674 = vmatpush3.bf16.msra.mxu0 %v1848_v8 }
 0x42a   :  { %v2335_v9 = vpop.f32.mrb[4].mxu1  ;;  %v2337_v10 = vpop.f32.mrb[8].mxu0 }
 0x42b   :  { %v853_v11 = vsel %vm162_vm1, %v2335_v9, 0.0  ;;  %v991_v12 = vrot.slane %v2335_v9, 2  ;;  %v867_v13 = vsel %vm162_vm1, %v2337_v10, 0.0  ;;  %v993_v14 = vrot.slane %v2337_v10, 2  ;;  %v2345_v15 = vpop.f32.mrb[5].mxu1  ;;  %v2347_v16 = vpop.f32.mrb[9].mxu0 }
 0x42c   :  { %v854_v17 = vrot.slane %v853_v11, 4  ;;  %v868_v18 = vrot.slane %v867_v13, 4  ;;  %v860_v19 = vsel %vm162_vm1, %v2345_v15, 0.0  ;;  %v992_v20 = vrot.slane %v2345_v15, 2  ;;  %v807_v21 = vpop.f32.mrb[6].mxu1  ;;  %v848_v22 = vpop.f32.mrb[10].mxu0 }
 0x42d   :  { %v999_v23 = vsel %vm162_vm1, %v991_v12, 0.0  ;;  %v1013_v24 = vsel %vm162_vm1, %v993_v14, 0.0  ;;  %v861_v25 = vrot.slane %v860_v19, 4  ;;  %v874_v26 = vsel %vm162_vm1, %v2347_v16, 0.0  ;;  %v808_v27 = vpop.f32.mrb[7].mxu1  ;;  %v849_v28 = vpop.f32.mrb[11].mxu0 }
 0x42e   :  { %v855_v29 = vadd.f32 %v854_v17, %v853_v11  ;;  %v1000_v30 = vrot.slane %v999_v23, 4  ;;  %v869_v31 = vadd.f32 %v868_v18, %v867_v13  ;;  %v1014_v32 = vrot.slane %v1013_v24, 4 }
 0x42f   :  { %v862_v33 = vadd.f32 %v861_v25, %v860_v19  ;;  %v1006_v34 = vsel %vm162_vm1, %v992_v20, 0.0  ;;  %v875_v35 = vrot.slane %v874_v26, 4  ;;  %v994_v36 = vrot.slane %v2347_v16, 2 }
 0x430   :  { %v856_v37 = vrot.slane %v855_v29, 2  ;;  %v1001_v38 = vadd.f32 %v1000_v30, %v999_v23  ;;  %v870_v39 = vrot.slane %v869_v31, 2  ;;  %v1015_v40 = vadd.f32 %v1014_v32, %v1013_v24 }
 0x431   :  { %v863_v41 = vrot.slane %v862_v33, 2  ;;  %v1007_v42 = vrot.slane %v1006_v34, 4  ;;  %v876_v43 = vadd.f32 %v875_v35, %v874_v26  ;;  %v1020_v44 = vsel %vm162_vm1, %v994_v36, 0.0 }
 0x432   :  { %v857_v45 = vadd.f32 %v856_v37, %v855_v29  ;;  %v1002_v46 = vrot.slane %v1001_v38, 2  ;;  %v871_v47 = vadd.f32 %v870_v39, %v869_v31  ;;  %v1016_v48 = vrot.slane %v1015_v40, 2 }
 0x433   :  { %v864_v49 = vadd.f32 %v863_v41, %v862_v33  ;;  %v1008_v50 = vadd.f32 %v1007_v42, %v1006_v34  ;;  %v877_v51 = vrot.slane %v876_v43, 2  ;;  %v1021_v52 = vrot.slane %v1020_v44, 4 }
 0x434   :  { %v858_v53 = vrot.slane %v857_v45, 1  ;;  %v1003_v54 = vadd.f32 %v1002_v46, %v1001_v38  ;;  %v872_v55 = vrot.slane %v871_v47, 1  ;;  %v1017_v56 = vadd.f32 %v1016_v48, %v1015_v40 }
 0x435   :  { %v865_v57 = vrot.slane %v864_v49, 1  ;;  %v1009_v58 = vrot.slane %v1008_v50, 2  ;;  %v878_v59 = vadd.f32 %v877_v51, %v876_v43  ;;  %v1022_v60 = vadd.f32 %v1021_v52, %v1020_v44 }
 0x436   :  { %v859_v61 = vadd.f32 %v858_v53, %v857_v45  ;;  %v1004_v62 = vrot.slane %v1003_v54, 1  ;;  %v873_v63 = vadd.f32 %v872_v55, %v871_v47  ;;  %v1018_v0 = vrot.slane %v1017_v56, 1 }
 0x437   :  { %v866_v2 = vadd.f32 %v865_v57, %v864_v49  ;;  %v1010_v3 = vadd.f32 %v1009_v58, %v1008_v50  ;;  %v879_v4 = vrot.slane %v878_v59, 1  ;;  %v1023_v5 = vrot.slane %v1022_v60, 2 }
 0x438   :  { %v881_v6 = vmul.f32 0.5, %v859_v61  ;;  %v1005_v7 = vadd.f32 %v1004_v62, %v1003_v54  ;;  %v883_v8 = vmul.f32 0.5, %v873_v63  ;;  %v1019_v11 = vadd.f32 %v1018_v0, %v1017_v56 }
 0x439   :  { %v882_v12 = vmul.f32 0.5, %v866_v2  ;;  %v1011_v13 = vrot.slane %v1010_v3, 1  ;;  %v880_v14 = vadd.f32 %v879_v4, %v878_v59  ;;  %v1024_v17 = vadd.f32 %v1023_v5, %v1022_v60 }
 0x43a   :  { %v2360_v18 = vsub.f32 %v2335_v9, %v881_v6  ;;  %v1027_v19 = vmul.f32 0.5, %v1005_v7  ;;  %v2363_v20 = vsub.f32 %v2337_v10, %v883_v8  ;;  %v1029_v21 = vmul.f32 0.5, %v1019_v11 }
 0x43b   :  { %v2366_v22 = vsub.f32 %v2345_v15, %v882_v12  ;;  %v1012_v23 = vadd.f32 %v1011_v13, %v1010_v3  ;;  %v884_v24 = vmul.f32 0.5, %v880_v14  ;;  %v1025_v25 = vrot.slane %v1024_v17, 1 }
 0x43c   :  { %v889_v26 = vmul.f32 %v2360_v18, %v2360_v18  ;;  %v2371_v27 = vsub.f32 %v2335_v9, %v1027_v19  ;;  %v891_v28 = vmul.f32 %v2363_v20, %v2363_v20  ;;  %v2376_v29 = vsub.f32 %v2337_v10, %v1029_v21 }
 0x43d   :  { %v890_v30 = vmul.f32 %v2366_v22, %v2366_v22  ;;  %v1028_v31 = vmul.f32 0.5, %v1012_v23  ;;  %v2381_v32 = vsub.f32 %v2347_v16, %v884_v24  ;;  %v1026_v33 = vadd.f32 %v1025_v25, %v1024_v17 }
 0x43e   :  { %v893_v34 = vsel %vm162_vm1, %v889_v26, 0.0  ;;  %v1035_v9 = vmul.f32 %v2371_v27, %v2371_v27  ;;  %v907_v35 = vsel %vm162_vm1, %v891_v28, 0.0  ;;  %v1037_v36 = vmul.f32 %v2376_v29, %v2376_v29 }
 0x43f   :  { %v894_v10 = vrot.slane %v893_v34, 4  ;;  %v908_v37 = vrot.slane %v907_v35, 4  ;;  %v900_v38 = vsel %vm162_vm1, %v890_v30, 0.0  ;;  %v2391_v39 = vsub.f32 %v2345_v15, %v1028_v31 }
 0x440   :  { %v1043_v40 = vrot.slane %v1035_v9, 2  ;;  %v1045_v41 = vrot.slane %v1037_v36, 2  ;;  %v901_v42 = vrot.slane %v900_v38, 4  ;;  %v892_v43 = vmul.f32 %v2381_v32, %v2381_v32 }
 0x441   :  { %v895_v44 = vadd.f32 %v894_v10, %v893_v34  ;;  %v909_v45 = vadd.f32 %v908_v37, %v907_v35  ;;  %v1036_v46 = vmul.f32 %v2391_v39, %v2391_v39  ;;  %v1030_v47 = vmul.f32 0.5, %v1026_v33 }
 0x442   :  { %v1051_v48 = vsel %vm162_vm1, %v1043_v40, 0.0  ;;  %v1065_v49 = vsel %vm162_vm1, %v1045_v41, 0.0  ;;  %v902_v50 = vadd.f32 %v901_v42, %v900_v38  ;;  %v914_v15 = vsel %vm162_vm1, %v892_v43, 0.0 }
 0x443   :  { %v896_v51 = vrot.slane %v895_v44, 2  ;;  %v1052_v52 = vrot.slane %v1051_v48, 4  ;;  %v910_v53 = vrot.slane %v909_v45, 2  ;;  %v1066_v54 = vrot.slane %v1065_v49, 4 }
 0x444   :  { %v903_v55 = vrot.slane %v902_v50, 2  ;;  %v1044_v56 = vrot.slane %v1036_v46, 2  ;;  %v915_v57 = vrot.slane %v914_v15, 4  ;;  %v2401_v58 = vsub.f32 %v2347_v16, %v1030_v47 }
 0x445   :  { %v897_v59 = vadd.f32 %v896_v51, %v895_v44  ;;  %v1053_v60 = vadd.f32 %v1052_v52, %v1051_v48  ;;  %v911_v61 = vadd.f32 %v910_v53, %v909_v45  ;;  %v1067_v62 = vadd.f32 %v1066_v54, %v1065_v49 }
 0x446   :  { %v904_v63 = vadd.f32 %v903_v55, %v902_v50  ;;  %v1058_v0 = vsel %vm162_vm1, %v1044_v56, 0.0  ;;  %v916_v2 = vadd.f32 %v915_v57, %v914_v15  ;;  %v1038_v3 = vmul.f32 %v2401_v58, %v2401_v58 }
 0x447   :  { %v898_v4 = vrot.slane %v897_v59, 1  ;;  %v1054_v5 = vrot.slane %v1053_v60, 2  ;;  %v912_v6 = vrot.slane %v911_v61, 1  ;;  %v1068_v7 = vrot.slane %v1067_v62, 2 }
 0x448   :  { %v905_v8 = vrot.slane %v904_v63, 1  ;;  %v1059_v11 = vrot.slane %v1058_v0, 4  ;;  %v917_v12 = vrot.slane %v916_v2, 2  ;;  %v1046_v16 = vrot.slane %v1038_v3, 2 }
 0x449   :  { %v899_v13 = vadd.f32 %v898_v4, %v897_v59  ;;  %v1055_v14 = vadd.f32 %v1054_v5, %v1053_v60  ;;  %v913_v17 = vadd.f32 %v912_v6, %v911_v61  ;;  %v1069_v19 = vadd.f32 %v1068_v7, %v1067_v62 }
 0x44a   :  { %v906_v21 = vadd.f32 %v905_v8, %v904_v63  ;;  %v1060_v23 = vadd.f32 %v1059_v11, %v1058_v0  ;;  %v918_v24 = vadd.f32 %v917_v12, %v916_v2  ;;  %v1072_v25 = vsel %vm162_vm1, %v1046_v16, 0.0  ;;  %v851_v63 = vld [vmem:[%s2455_s11] sm:$0xf] }
 0x44b   :  { %v921_v26 = vmul.f32 0.5, %v899_v13  ;;  %v1056_v28 = vrot.slane %v1055_v14, 1  ;;  %v923_v30 = vmul.f32 0.5, %v913_v17  ;;  %v1070_v31 = vrot.slane %v1069_v19, 1  ;;  %v852_v11 = vld [vmem:[%s2456_s12] sm:$0xf] }
 0x44c   :  { %v922_v33 = vmul.f32 0.5, %v906_v21  ;;  %v1061_v34 = vrot.slane %v1060_v23, 2  ;;  %v919_v9 = vrot.slane %v918_v24, 1  ;;  %v1073_v35 = vrot.slane %v1072_v25, 4 }
 0x44d   :  { %v925_v36 = vadd.f32 1e-05, %v921_v26  ;;  %v1057_v10 = vadd.f32 %v1056_v28, %v1055_v14  ;;  %v927_v37 = vadd.f32 1e-05, %v923_v30  ;;  %v1071_v38 = vadd.f32 %v1070_v31, %v1069_v19 }
 0x44e   :  { %v926_v40 = vadd.f32 1e-05, %v922_v33  ;;  %v1062_v41 = vadd.f32 %v1061_v34, %v1060_v23  ;;  %v920_v42 = vadd.f32 %v919_v9, %v918_v24  ;;  %v1074_v43 = vadd.f32 %v1073_v35, %v1072_v25 }
 0x44f   :  { %1861 = vrsqrt.f32 %v925_v36  ;;  %v1079_v44 = vmul.f32 0.5, %v1057_v10  ;;  %v1081_v45 = vmul.f32 0.5, %v1071_v38  ;;  %v938_v46 = vlaneseq }
 0x450   :  { %v1063_v47 = vrot.slane %v1062_v41, 1  ;;  %v924_v48 = vmul.f32 0.5, %v920_v42  ;;  %v1075_v49 = vrot.slane %v1074_v43, 2  ;;  %1863 = vrsqrt.f32 %v927_v37 }
 0x451   :  { %v1083_v50 = vadd.f32 1e-05, %v1079_v44  ;;  %v1085_v15 = vadd.f32 1e-05, %v1081_v45  ;;  %1865 = vrsqrt.f32 %v926_v40  ;;  %v939_v54 = vshrl.u32 %v938_v46, 7 }
 0x452   :  { %v1064_v51 = vadd.f32 %v1063_v47, %v1062_v41  ;;  %v928_v52 = vadd.f32 1e-05, %v924_v48  ;;  %v1076_v53 = vadd.f32 %v1075_v49, %v1074_v43 }
 0x453   :  { %1867 = vrsqrt.f32 %v1083_v50  ;;  %v940_v60 = vsub.s32 0, %v939_v54  ;;  %v948_v3 = vsub.s32 2, %v939_v54  ;;  %v944_v4 = vsub.s32 1, %v939_v54 }
 0x454   :  { %1869 = vrsqrt.f32 %v1085_v15  ;;  %v1080_v55 = vmul.f32 0.5, %v1064_v51  ;;  %v1077_v56 = vrot.slane %v1076_v53, 1  ;;  %v952_v13 = vsub.s32 3, %v939_v54 }
 0x455   :  { %1871 = vrsqrt.f32 %v928_v52  ;;  %v941_v7 = vrot.slane %v851_v63, %v940_v60  ;;  %v949_v14 = vrot.slane %v851_v63, %v948_v3  ;;  %v945_v21 = vrot.slane %v851_v63, %v944_v4 }
 0x456   :  { %v1084_v57 = vadd.f32 1e-05, %v1080_v55  ;;  %v1078_v59 = vadd.f32 %v1077_v56, %v1076_v53  ;;  %v953_v33 = vrot.slane %v851_v63, %v952_v13  ;;  %v970_v35 = vrot.slane %v852_v11, %v944_v4 }
 0x457   :  { %v978_v40 = vrot.slane %v852_v11, %v952_v13 }
 0x458   :  { %1873 = vrsqrt.f32 %v1084_v57  ;;  %v1082_v61 = vmul.f32 0.5, %v1078_v59  ;;  %v1577_v57 = vld [vmem:[%s2458_s14] ss:$0 sm:$0xff]  ;;  %s1908_s14 = smov [#allocation2]  }
 0x459   :  { %v1862_v62 = vpop.eup %1861  ;;  %s1505_s23 = sshll.u32 %s1908_s14, 4  ;;  %s1506_s23 = int_to_ptr.vmem [resolvable:$true] %s1505_s23 }
 0x45a   :  { %v1086_v0 = vadd.f32 1e-05, %v1082_v61  ;;  %v1864_v2 = vpop.eup %1863  ;;  %v933_v6 = vmul.f32 %v1862_v62, %v2360_v18  ;;  %v966_v18 = vrot.slane %v852_v11, %v940_v60  ;;  %s1881_s24 = scalar_lea.vmem %s1506_s23, 16  ;;  %s1885_s4 = scalar_lea.vmem %s1506_s23, 32 }
 0x45b   :  { %v1866_v5 = vpop.eup %1865  ;;  %v935_v26 = vmul.f32 %v1864_v2, %v2363_v20  ;;  %p1882_p0 = scmp.ne.s32.totalorder %s1506_s23, %s1881_s24  ;;  %p1886_p1 = scmp.lt.s32.totalorder %s1506_s23, %s1506_s23 }
 0x45c   :  { %1875 = vrsqrt.f32 %v1086_v0  ;;  %v934_v19 = vmul.f32 %v1866_v5, %v2366_v22  ;;  %v958_v24 = vmul.f32 %v941_v7, %v933_v6  ;;  %v974_v22 = vrot.slane %v852_v11, %v948_v3  ;;  %v1462_v11 = vpop.xlane.xlu0 %1461  ;;  %p1887_p2 = scmp.lt.s32.totalorder %s1885_s4, %s1881_s24 }
 0x45d   :  { %v1868_v8 = vpop.eup %1867  ;;  %v960_v36 = vmul.f32 %v949_v14, %v935_v26 }
 0x45e   :  { %v1870_v12 = vpop.eup %1869  ;;  %v1091_v16 = vmul.f32 %v1868_v8, %v2371_v27  ;;  %v959_v34 = vmul.f32 %v945_v21, %v934_v19  ;;  %p1888_p3 = por %p1887_p2, %p1886_p1 }
 0x45f   :  { %v1093_v17 = vmul.f32 %v1870_v12, %v2376_v29  ;;  %v1872_v23 = vpop.eup %1871  ;;  %v983_v29 = vadd.f32 %v966_v18, %v958_v24  ;;  %v985_v45 = vadd.f32 %v974_v22, %v960_v36  ;;  %v1463_v12 = vmax.f32 %v1462_v11, 1e-24 }
 0x460   :  { %v1095_v25 = vmul.f32 %v1091_v16, %v941_v7  ;;  %v936_v9 = vmul.f32 %v1872_v23, %v2381_v32  ;;  %v984_v43 = vadd.f32 %v970_v35, %v959_v34  ;;  %p1889_p4 = pnand %p1888_p3, %p1882_p0 }
 0x461   :  { %v1097_v31 = vmul.f32 %v1093_v17, %v949_v14  ;;  %1877 = vrsqrt.f32 %v1463_v12 }
 0x462   :  { %v1874_v28 = vpop.eup %1873  ;;  %v1099_v30 = vadd.f32 %v1095_v25, %v966_v18  ;;  %v961_v20 = vmul.f32 %v953_v33, %v936_v9 }
 0x463   :  { %v1092_v27 = vmul.f32 %v1874_v28, %v2391_v39  ;;  %v1101_v38 = vadd.f32 %v1097_v31, %v974_v22 }
 0x464   :  { %v1103_v41 = vsel %vm162_vm1, %v983_v29, %v1099_v30  ;;  %v986_v49 = vadd.f32 %v978_v40, %v961_v20 }
 0x465   :  { %v1096_v10 = vmul.f32 %v1092_v27, %v945_v21  ;;  %v1107_v32 = vmax.f32 %v1103_v41, 0.0  ;;  %v1105_v48 = vsel %vm162_vm1, %v985_v45, %v1101_v38 }
 0x466   :  { %v1876_v37 = vpop.eup %1875  ;;  %v1109_v53 = vmax.f32 %v1105_v48, 0.0 }
 0x467   :  { %v1094_v42 = vmul.f32 %v1876_v37, %v2401_v58  ;;  %v1100_v44 = vadd.f32 %v1096_v10, %v970_v35  ;;  %v1111_v52 = vpack.c.bf16 %v1107_v32, %v1107_v32 }
 0x468   :  { %v1113_v55 = vpack.c.bf16 %v1109_v53, %v1109_v53 }
 0x469   :  { %v1098_v46 = vmul.f32 %v1094_v42, %v953_v33  ;;  %v1104_v39 = vsel %vm162_vm1, %v984_v43, %v1100_v44 }
 0x46a   :  { %v1108_v47 = vmax.f32 %v1104_v39, 0.0 }
 0x46b   :  { %v1102_v50 = vadd.f32 %v1098_v46, %v978_v40  ;;  %v1878_v14 = vpop.eup %1877 }
 0x46c   :  { %v1112_v15 = vpack.c.bf16 %v1108_v47, %v1108_v47  ;;  %v1465_v17 = vmul.f32 %v1878_v14, %v2228_v1 }
 0x46d   :  { %v1106_v51 = vsel %vm162_vm1, %v986_v49, %v1102_v50 }
 0x46e   :  { %1410 = vmatprep.mubr.bf16.mxu1 %v1112_v15  ;;  %v1110_v54 = vmax.f32 %v1106_v51, 0.0  ;;  %v1477_v23 = vrot.slane %v1465_v17, 6  ;;  %v1474_v24 = vrot.slane %v1465_v17, 2 }
 0x46f   :  { %1411 = vmatmul.mubr.bf16.vlgmr.msra.gmra.mrb[8].mxu1 %v1111_v52 }
 0x470   :  { %v1114_v58 = vpack.c.bf16 %v1110_v54, %v1110_v54 }
 0x472   :  { %1450 = vmatprep.mubr.bf16.mxu0 %v1114_v58 }
 0x473   :  { %1451 = vmatmul.mubr.bf16.vlgmr.msra.gmra.mrb[12].mxu0 %v1113_v55 }
 0x542   :  { %v1653_v56 = vpop.f32.mrb[8].mxu1 }
 0x543   :  { %v1654_v59 = vpop.f32.mrb[9].mxu1 }
 0x544   :  { %v1655_v60 = vadd.f32 %v1654_v59, %v1653_v56  ;;  %v1656_v61 = vpop.f32.mrb[10].mxu1 }
 0x545   :  { %v1657_v62 = vpop.f32.mrb[11].mxu1 }
 0x546   :  { %v1675_v63 = vpop.f32.mrb[12].mxu0  ;;  %v1413_v0 = vadd.f32 %v1655_v60, %v1577_v57 }
 0x547   :  { %v1676_v2 = vpop.f32.mrb[13].mxu0 }
 0x548   :  { %v1677_v3 = vadd.f32 %v1676_v2, %v1675_v63  ;;  %v1678_v4 = vpop.f32.mrb[14].mxu0 }
 0x549   :  { %v1679_v5 = vpop.f32.mrb[15].mxu0 }
 0x54a   :  { %v1453_v6 = vadd.f32 %v1677_v3, %v1413_v0 }
 0x54c   :  { %v1466_v7 = vmul.f32 %v1453_v6, %v1453_v6 }
 0x54e   :  { %v1467_v8 = vsel %vm1459_vm2, %v1466_v7, 0.0 }
 0x54f   :  { %1468 = vadd.xlane.f32.xlu0 %v1467_v8 }
 0x5dc   :  { %v1469_v16 = vpop.xlane.xlu0 %1468 }
 0x5dd   :  { %v1470_v13 = vmax.f32 %v1469_v16, 1e-24 }
 0x5df   :  { %1879 = vrsqrt.f32 %v1470_v13 }
 0x5e9   :  { %v1880_v19 = vpop.eup %1879 }
 0x5ea   :  { %v1472_v21 = vmul.f32 %v1880_v19, %v1453_v6 }
 0x5ec   :  { %v1479_v18 = vmul.f32 %v1477_v23, %v1472_v21  ;;  %v1476_v25 = vmul.f32 %v1474_v24, %v1472_v21 }
 0x5ee   :  { %v1481_v26 = vrot.slane %v1479_v18, 2 }
 0x5f0   :  { %v1483_v28 = vadd.f32 %v1481_v26, %v1476_v25 }
 0x5f2   :  { %v1484_v30 = vsel %vm162_vm1, %v1483_v28, 0.0 }
 0x5f3   :  { %1485 = vadd.xlane.f32.xlu1 %v1484_v30 }
 0x680   :  { %v1486_v31 = vpop.xlane.xlu1 %1485 }
 0x681   :  { %v1487_v33 = vsel %vm162_vm1, %v1486_v31, 0.0 }
 0x682   :  { %v1488_v34 = vrot.slane %v1487_v33, 4 }
 0x684   :  { %v1489_v27 = vadd.f32 %v1488_v34, %v1487_v33 }
 0x686   :  { %v1490_v9 = vrot.slane %v1489_v27, 2 }
 0x688   :  { %v1491_v35 = vadd.f32 %v1490_v9, %v1489_v27 }
 0x68a   :  { %v1492_v29 = vrot.slane %v1491_v35, 1 }
 0x68c   :  { %v1493_v1 = vadd.f32 %v1492_v29, %v1491_v35 }
 0x68e   :  { %v1494_v36 = vmul.f32 -0.25, %v1493_v1 }
 0x690   :  { %1496 = vst.msk [vmem:[#allocation2] sm:$0x1] %vm1495_vm3, %v1494_v36 }
 0x691   :  { %1892 = shalt.err (!%p1889_p4)
}
 0x692   :  { %s1893_s10 = scalar_lea.hbm %s2460_s16, 16 }
 0x693   :  { %p1894_p5 = scmp.ne.s32.totalorder %s2460_s16, %s1893_s10  ;;  %p1897_p6 = scmp.lt.u32.totalorder %s1893_s10, %s2460_s16 }
 0x695   :  { %p1899_p7 = pnand %p1897_p6, %p1894_p5 }
 0x697   :  { %1902 = shalt.err (!%p1899_p7)
}
 0x698   :  { %1508 = dma.vmem_to_hbm [thread:$0]  %s1506_s23, 16, %s2460_s16, [#allocation3]  }
 0x699   :  { %1903 = dma.done.wait [#allocation3], 16  }
 0x69a   :  { %1904 = vsyncadd [#allocation3], 4294967280 }
 0x69b   :  { %1514 = vsyncpa [#allocation3], 1 }

// kernel: simsiam_forward.2
= control target key start
LH: loop header
LB: loop body
LE: loop exit
PB: predicated region body
PF: predicated region fallthrough
CT: control target
= control target key end

     0   :  { %s5023_s15 = smov 0   ;;  %s5025_s16 = smov 0   ;;  %s6908_s0 = inlined_call_operand.vmem [shape: bf16[2,2,342,3], index: 0, kind: input, shape index: {}]   ;;  %s6909_s1 = inlined_call_operand.vmem [shape: bf16[9,3,128], index: 1, kind: input, shape index: {}]   ;;  %s6910_s2 = inlined_call_operand.vmem [shape: f32[1,128], index: 2, kind: input, shape index: {}]   ;;  %s6911_s3 = inlined_call_operand.vmem [shape: f32[144,1], index: 3, kind: input, shape index: {}]   ;;  %s6912_s4 = inlined_call_operand.vmem [shape: f32[2,2,1,128], index: 4, kind: output, shape index: {}]  }
   0x1   :  { %s5027_s17 = smov 0   ;;  %s5029_s18 = smov 0  }
   0x2   :  { %s5031_s19 = smov 0  }
   0x3 LB: > { %s23_s20 = sadd.s32 1, %s4984_s17  ;;  %s26_s21 = sadd.s32 1, %s4988_s18  ;;  %s4992_s19 = sphi %s5031_s19, %s14_s19   ;;  %s4988_s18 = sphi %s5029_s18, %s7001_s18   ;;  %s4984_s17 = sphi %s5027_s17, %s7000_s17   ;;  %s4980_s16 = sphi %s5025_s16, %s6999_s16   ;;  %s4976_s15 = sphi %s5023_s15, %s6998_s15  }
   0x4   : > { %p24_p0 = scmp.ge.s32.totalorder %s23_s20, 2  ;;  %p3797_p1 = scmp.ge.s32.totalorder %s4992_s19, 1 }
   0x5   : > { %p182_p2 = scmp.lt.s32.totalorder %s4992_s19, 5 }
   0x6   : > { %s7003_s20 = smov (%p24_p0, %s23_s20), 0  ;;  %s7005_s21 = smov (!%p24_p0, %s26_s21), %s4988_s18 }
   0x7   : > { %p183_p3 = pnand %p3797_p1, %p182_p2  ;;  %p28_p4 = scmp.ge.s32.totalorder %s7005_s21, 2 }
   0x9   : > { %s7007_s21 = smov (%p28_p4, %s7005_s21), 0  ;;  %186 = sbr.rel (%p183_p3) target bundleno = 915 (0x393), region = 36 }
  0x10   : > { %v3810_v0 = vld [vmem:[%s6909_s1 + $0x2] sm:$0x3]  ;;  %vm413_vm0 = vcmask 1040384   ;;  %vm414_vm1 = vcmask 1041408   ;;  %v6915_v1 = vmov 0.0   ;;  %v4995_v2 = vmov 65535  }
  0x11   : > { %4181 = vmatprep.subr.bf16.mxu0 %v6915_v1  ;;  %4219 = vmatprep.subr.bf16.mxu1 %v6915_v1  ;;  %v415_v3 = vsel %vm413_vm0, 4294967295, %v4995_v2  ;;  %v304_v4 = vld [vmem:[%s6909_s1] sm:$0x3]  ;;  %p214_p5 = scmp.lt.s32.totalorder %s4980_s16, 1  ;;  %p216_p6 = scmp.lt.s32.totalorder %s4976_s15, 1  ;;  %vm4996_vm2 = vmmov 0  }
  0x12   : > { %v5067_v5 = vsel %vm414_vm1, %v415_v3, 0  ;;  %4221 = vmatprep.mubr.msk.bf16.mxu1 %vm4996_vm2, %v6915_v1  ;;  %4183 = vmatprep.mubr.msk.bf16.mxu0 %vm4996_vm2, %v6915_v1  ;;  %v3841_v8 = vld [vmem:[%s6909_s1 + $0x6] sm:$0x3]  ;;  %vm385_vm3 = vcmask 23552   ;;  %v3829_v15 = vld [vmem:[%s6909_s1 + $0x4] sm:$0x3] }
  0x13   : > { %v5074_v6 = vand.u32 %v3810_v0, %v5067_v5  ;;  %v5077_v7 = vand.u32 %v5067_v5, %v304_v4  ;;  %s7009_s16 = smov (!%p214_p5, %s4980_s16), 1  ;;  %s7011_s15 = smov (!%p216_p6, %s4976_s15), 1  ;;  %v5100_v9 = vand.u32 %v3841_v8, %v5067_v5  ;;  %vm308_vm4 = vsmask.f32 7424 }
  0x14   : > { %s4866_s26 = smul.u32 86, %s7009_s16  ;;  %v5119_v20 = vand.u32 %v3829_v15, %v5067_v5  ;;  %vm663_vm5 = vcmask 1046528   ;;  %vm1185_vm6 = vcmask 1045504   ;;  %vm980_vm7 = vsmask.f32 6400 }
  0x15   : > { %4182 = vmatpush3.bf16.msra.mxu0 %v5074_v6  ;;  %4220 = vmatpush3.bf16.msra.mxu1 %v5077_v7  ;;  %s4865_s27 = smul.u32 43, %s7011_s15  ;;  %vm1502_vm8 = vsmask.f32 5376  ;;  %vm1707_vm9 = vcmask 1044480  }
  0x16   : > { %4257 = vmatprep.subr.bf16.mxu0 %v6915_v1  ;;  %4295 = vmatprep.subr.bf16.mxu1 %v6915_v1 }
  0x17   : > { %s220_s30 = sadd.s32 %s4866_s26, %s4865_s27 }
  0x18   : > { %s3798_s5 = sshll.u32 %s220_s30, 2 }
  0x19   : > { %s5097_s8 = scalar_lea.vmem %s6908_s0, %s3798_s5  ;;  %s3799_s5 = sshll.u32 %s7009_s16, 1 }
  0x1a   : > { %v4913_v10 = vld [vmem:[%s5097_s8] sm:$0xff]   ;;  %v5104_v11 = vld [vmem:[%s5097_s8 + $0x8] sm:$0xff]   ;;  %v5115_v16 = vld [vmem:[%s5097_s8 + $0x10] sm:$0xff]   ;;  %s228_s6 = sadd.s32 %s3799_s5, %s7011_s15 }
  0x1b   : > { %4222 = vmatmul.mubr.msk.bf16.vlgmr.msra.gmra.mrb[0].mxu1 %vm385_vm3, %v4913_v10  ;;  %v310_v12 = vshrl.u32 %v4913_v10, 16  ;;  %v312_v13 = vshll.u32 %v4913_v10, 16  ;;  %v317_v14 = vshll.u32 %v5104_v11, 16  ;;  %v321_v21 = vshrl.u32 %v5104_v11, 16  ;;  %v5132_v26 = vld [vmem:[%s5097_s8 + $0x18] sm:$0xff]   ;;  %v5153_v34 = vld [vmem:[%s5097_s8 + $0x20] sm:$0xff]   ;;  %s229_s10 = scalar_lea.vmem %s6912_s4, %s228_s6 }
  0x1c   : > { %4296 = vmatpush3.bf16.msra.mxu1 %v5100_v9  ;;  %4225 = vmatprep.mubr.msk.bf16.mxu1 %vm4996_vm2, %v6915_v1  ;;  %v5123_v22 = vshll.u32 %v5115_v16, 16  ;;  %v5140_v27 = vshrl.u32 %v5115_v16, 16  ;;  %v5144_v29 = vshll.u32 %v5132_v26, 16  ;;  %v665_v30 = vrot.slane %v5104_v11, 1  ;;  %v5183_v44 = vld [vmem:[%s5097_s8 + $0x28] sm:$0xff]   ;;  %v5202_v50 = vld [vmem:[%s5097_s8 + $0x30] sm:$0xff]  }
  0x1d   : > { %v314_v17 = vrot.slane %v312_v13, 1  ;;  %4371 = vmatprep.subr.bf16.mxu1 %v6915_v1  ;;  %v319_v18 = vrot.slane %v317_v14, 1  ;;  %v664_v31 = vrot.slane %v4913_v10, 1  ;;  %v5162_v36 = vrot.slane %v317_v14, 2  ;;  %v5221_v56 = vld [vmem:[%s5097_s8 + $0x38] sm:$0xff]   ;;  %v5240_v62 = vld [vmem:[%s5097_s8 + $0x40] sm:$0xff]  }
  0x1e   : > { %v327_v25 = vrot.slane %v5123_v22, 1  ;;  %v335_v33 = vrot.slane %v5144_v29, 1  ;;  %v5164_v37 = vrot.slane %v321_v21, 1  ;;  %v5170_v39 = vshrl.u32 %v5132_v26, 16  ;;  %v5254_v3 = vld [vmem:[%s5097_s8 + $0x48] sm:$0xf] }
  0x1f   : > { %v315_v19 = vor.u32 %v314_v17, %v310_v12  ;;  %v323_v24 = vor.u32 %v321_v21, %v319_v18  ;;  %v5158_v35 = vsel %vm663_vm5, %v664_v31, %v665_v30  ;;  %v5173_v40 = vshll.u32 %v5153_v34, 16 }
  0x20   : > { %v331_v32 = vor.u32 %v5140_v27, %v327_v25  ;;  %v983_v41 = vor.u32 %v5162_v36, %v5164_v37  ;;  %v339_v42 = vor.u32 %v5170_v39, %v335_v33  ;;  %v5191_v46 = vshrl.u32 %v5153_v34, 16 }
  0x21   : > { %v320_v23 = vsel %vm308_vm4, %v315_v19, %v319_v18  ;;  %v328_v28 = vsel %vm308_vm4, %v323_v24, %v327_v25  ;;  %v343_v43 = vrot.slane %v5173_v40, 1  ;;  %v5194_v47 = vshll.u32 %v5183_v44, 16  ;;  %v3861_v19 = vld [vmem:[%s6909_s1 + $0xa] sm:$0x3]  ;;  %v3851_v25 = vld [vmem:[%s6909_s1 + $0x8] sm:$0x3] }
  0x22   : > { %4184 = vmatmul.mubr.msk.bf16.vlgmr.msra.gmra.mrb[0].mxu0 %vm385_vm3, %v320_v23  ;;  %v336_v38 = vsel %vm308_vm4, %v331_v32, %v335_v33  ;;  %v5210_v52 = vshrl.u32 %v5183_v44, 16  ;;  %v5213_v53 = vshll.u32 %v5202_v50, 16  ;;  %v5229_v58 = vshrl.u32 %v5202_v50, 16 }
  0x23   : > { %4258 = vmatpush3.bf16.msra.mxu0 %v5119_v20  ;;  %4187 = vmatprep.mubr.msk.bf16.mxu0 %vm4996_vm2, %v6915_v1  ;;  %v344_v45 = vsel %vm308_vm4, %v339_v42, %v343_v43  ;;  %v347_v48 = vor.u32 %v5191_v46, %v343_v43  ;;  %v351_v49 = vrot.slane %v5194_v47, 1  ;;  %v5232_v59 = vshll.u32 %v5221_v56, 16 }
  0x24   : > { %4226 = vmatmul.mubr.msk.bf16.gmra.mrb[4].mxu1 %vm385_vm3, %v5104_v11  ;;  %4333 = vmatprep.subr.bf16.mxu0 %v6915_v1  ;;  %v359_v55 = vrot.slane %v5213_v53, 1  ;;  %v5248_v0 = vshrl.u32 %v5221_v56, 16  ;;  %v5251_v2 = vshll.u32 %v5240_v62, 16  ;;  %v5263_v10 = vcombine.low %v5254_v3, %v5254_v3 }
  0x25   : > { %4229 = vmatprep.mubr.msk.bf16.mxu1 %vm4996_vm2, %v6915_v1  ;;  %v352_v51 = vsel %vm308_vm4, %v347_v48, %v351_v49  ;;  %v355_v54 = vor.u32 %v5210_v52, %v351_v49  ;;  %v367_v61 = vrot.slane %v5232_v59, 1  ;;  %v5271_v13 = vshrl.u32 %v5240_v62, 16 }
  0x26   : > { %v363_v60 = vor.u32 %v5229_v58, %v359_v55  ;;  %v375_v8 = vrot.slane %v5251_v2, 1  ;;  %v381_v14 = vshll.u32 %v5263_v10, 16  ;;  %v667_v18 = vrot.slane %v5115_v16, 1 }
  0x27   : > { %v360_v57 = vsel %vm308_vm4, %v355_v54, %v359_v55  ;;  %v371_v4 = vor.u32 %v5248_v0, %v367_v61  ;;  %v5291_v24 = vand.u32 %v3861_v19, %v5067_v5  ;;  %v671_v32 = vrot.slane %v5153_v34, 1 }
  0x28   : > { %v368_v63 = vsel %vm308_vm4, %v363_v60, %v367_v61  ;;  %v379_v15 = vor.u32 %v5271_v13, %v375_v8  ;;  %v383_v17 = vrot.slane %v381_v14, 1  ;;  %v668_v23 = vsel %vm663_vm5, %v665_v30, %v667_v18  ;;  %v5364_v60 = vld [vmem:[%s5097_s8 + $0x50] sm:$0xf] }
  0x29   : > { %v376_v12 = vsel %vm308_vm4, %v371_v4, %v375_v8  ;;  %v5306_v30 = vand.u32 %v3851_v25, %v5067_v5  ;;  %v675_v42 = vrot.slane %v5202_v50, 1  ;;  %v679_v49 = vrot.slane %v5240_v62, 1 }
  0x2a   : > { %4188 = vmatmul.mubr.msk.bf16.gmra.mrb[4].mxu0 %vm385_vm3, %v328_v28  ;;  %v384_v21 = vsel %vm308_vm4, %v379_v15, %v383_v17  ;;  %v669_v28 = vrot.slane %v5132_v26, 1  ;;  %v681_v8 = vrot.slane %v5263_v10, 1  ;;  %v1187_v14 = vrot.slane %v5115_v16, 2  ;;  %v3883_v15 = vld [vmem:[%s6909_s1 + $0xe] sm:$0x3] }
  0x2b   : > { %4191 = vmatprep.mubr.msk.bf16.mxu0 %vm4996_vm2, %v6915_v1  ;;  %v985_v10 = vrot.slane %v5123_v22, 2  ;;  %v1191_v37 = vrot.slane %v5153_v34, 2 }
  0x2c   : > { %4230 = vmatmul.mubr.msk.bf16.gmra.mrb[8].mxu1 %vm385_vm3, %v5115_v16  ;;  %v670_v31 = vsel %vm663_vm5, %v667_v18, %v669_v28  ;;  %v672_v33 = vsel %vm663_vm5, %v669_v28, %v671_v32  ;;  %v682_v17 = vsel %vm663_vm5, %v679_v49, %v681_v8  ;;  %v984_v18 = vrot.slane %v5140_v27, 1  ;;  %v3873_v16 = vld [vmem:[%s6909_s1 + $0xc] sm:$0x3] }
  0x2d   : > { %4233 = vmatprep.mubr.msk.bf16.mxu1 %vm4996_vm2, %v6915_v1  ;;  %v5415_v28 = vand.u32 %v3873_v16, %v5067_v5  ;;  %v1001_v8 = vrot.slane %v5213_v53, 2  ;;  %v1008_v16 = vrot.slane %v5271_v13, 1 }
  0x32   : > { %4192 = vmatmul.mubr.msk.bf16.gmra.mrb[8].mxu0 %vm385_vm3, %v336_v38 }
  0x33   : > { %4195 = vmatprep.mubr.msk.bf16.mxu0 %vm4996_vm2, %v6915_v1 }
  0x34   : > { %4234 = vmatmul.mubr.msk.bf16.gmra.mrb[12].mxu1 %vm385_vm3, %v5132_v26 }
  0x35   : > { %4237 = vmatprep.mubr.msk.bf16.mxu1 %vm4996_vm2, %v6915_v1 }
  0x3a   : > { %4196 = vmatmul.mubr.msk.bf16.gmra.mrb[12].mxu0 %vm385_vm3, %v344_v45  ;;  %v677_v45 = vrot.slane %v5221_v56, 1 }
  0x3b   : > { %4199 = vmatprep.mubr.msk.bf16.mxu0 %vm4996_vm2, %v6915_v1 }
  0x3c   : > { %4238 = vmatmul.mubr.msk.bf16.gmra.mrb[16].mxu1 %vm385_vm3, %v5153_v34  ;;  %v678_v48 = vsel %vm663_vm5, %v675_v42, %v677_v45  ;;  %v680_v55 = vsel %vm663_vm5, %v677_v45, %v679_v49  ;;  %v1193_v45 = vrot.slane %v5183_v44, 2 }
  0x3d   : > { %4241 = vmatprep.mubr.msk.bf16.mxu1 %vm4996_vm2, %v6915_v1 }
  0x42   : > { %4200 = vmatmul.mubr.msk.bf16.gmra.mrb[16].mxu0 %vm385_vm3, %v352_v51  ;;  %v268_v51 = vld [vmem:[%s5097_s8 + $0x4c] sm:$0xf] }
  0x43   : > { %4203 = vmatprep.mubr.msk.bf16.mxu0 %vm4996_vm2, %v6915_v1  ;;  %v5353_v54 = vcombine.low %v5254_v3, %v268_v51  ;;  %v997_v51 = vrot.slane %v5194_v47, 2 }
  0x44   : > { %4242 = vmatmul.mubr.msk.bf16.gmra.mrb[20].mxu1 %vm385_vm3, %v5183_v44 }
  0x45   : > { %4245 = vmatprep.mubr.msk.bf16.mxu1 %vm4996_vm2, %v6915_v1 }
  0x4a   : > { %4204 = vmatmul.mubr.msk.bf16.gmra.mrb[20].mxu0 %vm385_vm3, %v360_v57  ;;  %v842_v57 = vrot.slane %v5353_v54, 1 }
  0x4b   : > { %4207 = vmatprep.mubr.msk.bf16.mxu0 %vm4996_vm2, %v6915_v1 }
  0x4c   : > { %4246 = vmatmul.mubr.msk.bf16.gmra.mrb[24].mxu1 %vm385_vm3, %v5202_v50  ;;  %v843_v61 = vsel %vm663_vm5, %v679_v49, %v842_v57  ;;  %v996_v49 = vrot.slane %v5210_v52, 1 }
  0x4d   : > { %4249 = vmatprep.mubr.msk.bf16.mxu1 %vm4996_vm2, %v6915_v1 }
  0x52   : > { %4208 = vmatmul.mubr.msk.bf16.gmra.mrb[24].mxu0 %vm385_vm3, %v368_v63  ;;  %v5369_v63 = vcombine.low %v5364_v60, %v5364_v60 }
  0x53   : > { %4211 = vmatprep.mubr.msk.bf16.mxu0 %vm4996_vm2, %v6915_v1 }
  0x54   : > { %4250 = vmatmul.mubr.msk.bf16.gmra.mrb[28].mxu1 %vm385_vm3, %v5221_v56  ;;  %v844_v3 = vrot.slane %v5369_v63, 1 }
  0x55   : > { %4253 = vmatprep.mubr.msk.bf16.mxu1 %vm4996_vm2, %v6915_v1 }
  0x56   : > { %v845_v4 = vsel %vm663_vm5, %v842_v57, %v844_v3  ;;  %v998_v57 = vor.u32 %v997_v51, %v996_v49  ;;  %v1203_v49 = vrot.slane %v5369_v63, 2 }
  0x5a   : > { %4212 = vmatmul.mubr.msk.bf16.gmra.mrb[28].mxu0 %vm385_vm3, %v376_v12  ;;  %v1186_v12 = vrot.slane %v5104_v11, 2  ;;  %v986_v11 = vor.u32 %v985_v10, %v984_v18  ;;  %v1005_v18 = vrot.slane %v5232_v59, 2 }
  0x5b   : > { %4215 = vmatprep.mubr.msk.bf16.mxu0 %vm4996_vm2, %v6915_v1 }
  0x5c   : > { %4254 = vmatmul.mubr.msk.bf16.gmra.mrb[32].mxu1 %vm385_vm3, %v5240_v62  ;;  %v1188_v19 = vsel %vm1185_vm6, %v1186_v12, %v1187_v14  ;;  %v987_v25 = vsel %vm980_vm7, %v983_v41, %v986_v11 }
  0x5d   : > { %4297 = vmatprep.mubr.msk.bf16.mxu1 %vm4996_vm2, %v6915_v1 }
  0x62   : > { %4216 = vmatmul.mubr.msk.bf16.gmra.mrb[32].mxu0 %vm385_vm3, %v384_v21  ;;  %v5396_v21 = vand.u32 %v3883_v15, %v5067_v5 }
  0x63   : > { %4259 = vmatprep.mubr.msk.bf16.mxu0 %vm4996_vm2, %v6915_v1 }
  0x64   : > { %4298 = vmatmul.mubr.msk.bf16.vlgmr.msra.gmra.mrb[36].mxu1 %vm385_vm3, %v668_v23  ;;  %6944 = vst [vmem:[#allocation2_spill] sm:$0xff] %v5396_v21 }
  0x65   : > { %4372 = vmatpush3.bf16.msra.mxu1 %v5291_v24  ;;  %4301 = vmatprep.mubr.msk.bf16.mxu1 %vm4996_vm2, %v6915_v1 }
  0x66   : > { %4447 = vmatprep.subr.bf16.mxu1 %v6915_v1 }
  0x6a   : > { %4260 = vmatmul.mubr.msk.bf16.vlgmr.msra.gmra.mrb[36].mxu0 %vm385_vm3, %v5158_v35  ;;  %v673_v35 = vrot.slane %v5183_v44, 1 }
  0x6b   : > { %4334 = vmatpush3.bf16.msra.mxu0 %v5306_v30  ;;  %4263 = vmatprep.mubr.msk.bf16.mxu0 %vm4996_vm2, %v6915_v1 }
  0x6c   : > { %4302 = vmatmul.mubr.msk.bf16.gmra.mrb[40].mxu1 %vm385_vm3, %v670_v31  ;;  %4409 = vmatprep.subr.bf16.mxu0 %v6915_v1  ;;  %v674_v38 = vsel %vm663_vm5, %v671_v32, %v673_v35  ;;  %v676_v43 = vsel %vm663_vm5, %v673_v35, %v675_v42  ;;  %v989_v32 = vrot.slane %v5144_v29, 2  ;;  %v992_v35 = vrot.slane %v5191_v46, 1 }
  0x6d   : > { %4305 = vmatprep.mubr.msk.bf16.mxu1 %vm4996_vm2, %v6915_v1 }
  0x72   : > { %4264 = vmatmul.mubr.msk.bf16.gmra.mrb[40].mxu0 %vm385_vm3, %v668_v23  ;;  %v1189_v23 = vrot.slane %v5132_v26, 2 }
  0x73   : > { %4267 = vmatprep.mubr.msk.bf16.mxu0 %vm4996_vm2, %v6915_v1 }
  0x74   : > { %4306 = vmatmul.mubr.msk.bf16.gmra.mrb[44].mxu1 %vm385_vm3, %v672_v33  ;;  %v5436_v42 = vsel %vm1185_vm6, %v1189_v23, %v1191_v37 }
  0x75   : > { %4309 = vmatprep.mubr.msk.bf16.mxu1 %vm4996_vm2, %v6915_v1 }
  0x7a   : > { %4268 = vmatmul.mubr.msk.bf16.gmra.mrb[44].mxu0 %vm385_vm3, %v670_v31  ;;  %v988_v31 = vrot.slane %v5170_v39, 1 }
  0x7b   : > { %4271 = vmatprep.mubr.msk.bf16.mxu0 %vm4996_vm2, %v6915_v1 }
  0x7c   : > { %4310 = vmatmul.mubr.msk.bf16.gmra.mrb[48].mxu1 %vm385_vm3, %v674_v38  ;;  %v990_v36 = vor.u32 %v989_v32, %v988_v31  ;;  %v1013_v32 = vshrl.u32 %v5353_v54, 16 }
  0x7d   : > { %4313 = vmatprep.mubr.msk.bf16.mxu1 %vm4996_vm2, %v6915_v1 }
  0x7e   : > { %v991_v41 = vsel %vm980_vm7, %v986_v11, %v990_v36 }
  0x82   : > { %4272 = vmatmul.mubr.msk.bf16.gmra.mrb[48].mxu0 %vm385_vm3, %v672_v33  ;;  %v5420_v33 = vsel %vm1185_vm6, %v1187_v14, %v1189_v23  ;;  %v1009_v23 = vrot.slane %v5251_v2, 2 }
  0x83   : > { %4275 = vmatprep.mubr.msk.bf16.mxu0 %vm4996_vm2, %v6915_v1 }
  0x84   : > { %4314 = vmatmul.mubr.msk.bf16.gmra.mrb[52].mxu1 %vm385_vm3, %v676_v43  ;;  %v1010_v31 = vor.u32 %v1009_v23, %v1008_v16  ;;  %v3893_v16 = vld [vmem:[%s6909_s1 + $0x10] sm:$0x3] }
  0x85   : > { %4317 = vmatprep.mubr.msk.bf16.mxu1 %vm4996_vm2, %v6915_v1 }
  0x8a   : > { %4276 = vmatmul.mubr.msk.bf16.gmra.mrb[52].mxu0 %vm385_vm3, %v674_v38  ;;  %v993_v38 = vrot.slane %v5173_v40, 2 }
  0x8b   : > { %4279 = vmatprep.mubr.msk.bf16.mxu0 %vm4996_vm2, %v6915_v1 }
  0x8c   : > { %4318 = vmatmul.mubr.msk.bf16.gmra.mrb[56].mxu1 %vm385_vm3, %v678_v48 }
  0x8d   : > { %4321 = vmatprep.mubr.msk.bf16.mxu1 %vm4996_vm2, %v6915_v1 }
  0x92   : > { %4280 = vmatmul.mubr.msk.bf16.gmra.mrb[56].mxu0 %vm385_vm3, %v676_v43  ;;  %v994_v43 = vor.u32 %v993_v38, %v992_v35 }
  0x93   : > { %4283 = vmatprep.mubr.msk.bf16.mxu0 %vm4996_vm2, %v6915_v1 }
  0x94   : > { %4322 = vmatmul.mubr.msk.bf16.gmra.mrb[60].mxu1 %vm385_vm3, %v680_v55  ;;  %v999_v3 = vsel %vm980_vm7, %v994_v43, %v998_v57 }
  0x95   : > { %4325 = vmatprep.mubr.msk.bf16.mxu1 %vm4996_vm2, %v6915_v1 }
  0x9a   : > { %4284 = vmatmul.mubr.msk.bf16.gmra.mrb[60].mxu0 %vm385_vm3, %v678_v48  ;;  %v995_v48 = vsel %vm980_vm7, %v990_v36, %v994_v43  ;;  %v1016_v36 = vshll.u32 %v5353_v54, 16 }
  0x9b   : > { %4287 = vmatprep.mubr.msk.bf16.mxu0 %vm4996_vm2, %v6915_v1 }
  0x9c   : > { %4326 = vmatmul.mubr.msk.bf16.gmra.mrb[64].mxu1 %vm385_vm3, %v843_v61  ;;  %v1195_v61 = vrot.slane %v5202_v50, 2  ;;  %v1197_v50 = vrot.slane %v5221_v56, 2  ;;  %v1199_v56 = vrot.slane %v5240_v62, 2  ;;  %v5504_v62 = vrot.slane %v5353_v54, 2 }
  0x9d   : > { %4329 = vmatprep.mubr.msk.bf16.mxu1 %vm4996_vm2, %v6915_v1  ;;  %v1018_v35 = vrot.slane %v1016_v36, 2 }
  0x9e   : > { %v5464_v12 = vsel %vm1185_vm6, %v1193_v45, %v1195_v61  ;;  %v5478_v10 = vsel %vm1185_vm6, %v1195_v61, %v1197_v50  ;;  %v5513_v38 = vsel %vm1185_vm6, %v1199_v56, %v5504_v62 }
  0xa2   : > { %4288 = vmatmul.mubr.msk.bf16.gmra.mrb[64].mxu0 %vm385_vm3, %v680_v55  ;;  %v5450_v55 = vsel %vm1185_vm6, %v1191_v37, %v1193_v45  ;;  %v1022_v45 = vshrl.u32 %v5369_v63, 16 }
  0xa3   : > { %4291 = vmatprep.mubr.msk.bf16.mxu0 %vm4996_vm2, %v6915_v1 }
  0xa4   : > { %4330 = vmatmul.mubr.msk.bf16.gmra.mrb[68].mxu1 %vm385_vm3, %v845_v4  ;;  %v1000_v4 = vrot.slane %v5229_v58, 1 }
  0xa5   : > { %4373 = vmatprep.mubr.msk.bf16.mxu1 %vm4996_vm2, %v6915_v1 }
  0xa6   : > { %v1002_v14 = vor.u32 %v1001_v8, %v1000_v4  ;;  %v1503_v4 = vrot.slane %v5140_v27, 2  ;;  %v1504_v8 = vrot.slane %v5123_v22, 3 }
  0xa8   : > { %v1003_v15 = vsel %vm980_vm7, %v998_v57, %v1002_v14  ;;  %v1024_v57 = vrot.slane %v1022_v45, 1 }
  0xaa   : > { %4292 = vmatmul.mubr.msk.bf16.gmra.mrb[68].mxu0 %vm385_vm3, %v682_v17  ;;  %v1004_v17 = vrot.slane %v5248_v0, 1 }
  0xab   : > { %4335 = vmatprep.mubr.msk.bf16.mxu0 %vm4996_vm2, %v6915_v1 }
  0xac   : > { %4374 = vmatmul.mubr.msk.bf16.vlgmr.msra.gmra.mrb[72].mxu1 %vm385_vm3, %v1188_v19  ;;  %v1006_v19 = vor.u32 %v1005_v18, %v1004_v17 }
  0xad   : > { %4448 = vmatpush3.bf16.msra.mxu1 %v5396_v21  ;;  %4377 = vmatprep.mubr.msk.bf16.mxu1 %vm4996_vm2, %v6915_v1 }
  0xae   : > { %4523 = vmatprep.subr.bf16.mxu1 %v6915_v1  ;;  %v1007_v11 = vsel %vm980_vm7, %v1002_v14, %v1006_v19  ;;  %v1011_v37 = vsel %vm980_vm7, %v1006_v19, %v1010_v31  ;;  %v1506_v14 = vrot.slane %v5170_v39, 2 }
  0xb2   : > { %4336 = vmatmul.mubr.msk.bf16.vlgmr.msra.gmra.mrb[72].mxu0 %vm385_vm3, %v987_v25  ;;  %v5492_v25 = vsel %vm1185_vm6, %v1197_v50, %v1199_v56  ;;  %v1507_v50 = vrot.slane %v5144_v29, 3  ;;  %v1510_v56 = vrot.slane %v5191_v46, 2 }
  0xb3   : > { %4410 = vmatpush3.bf16.msra.mxu0 %v5415_v28  ;;  %4339 = vmatprep.mubr.msk.bf16.mxu0 %vm4996_vm2, %v6915_v1 }
  0xb4   : > { %4378 = vmatmul.mubr.msk.bf16.gmra.mrb[76].mxu1 %vm385_vm3, %v5420_v33  ;;  %4485 = vmatprep.subr.bf16.mxu0 %v6915_v1  ;;  %v1508_v17 = vor.u32 %v1507_v50, %v1506_v14 }
  0xb5   : > { %4381 = vmatprep.mubr.msk.bf16.mxu1 %vm4996_vm2, %v6915_v1 }
  0xba   : > { %4340 = vmatmul.mubr.msk.bf16.gmra.mrb[76].mxu0 %vm385_vm3, %v991_v41  ;;  %v1015_v41 = vrot.slane %v1013_v32, 1 }
  0xbb   : > { %4343 = vmatprep.mubr.msk.bf16.mxu0 %vm4996_vm2, %v6915_v1 }
  0xbc   : > { %4382 = vmatmul.mubr.msk.bf16.gmra.mrb[80].mxu1 %vm385_vm3, %v5436_v42  ;;  %v1019_v43 = vor.u32 %v1018_v35, %v1015_v41  ;;  %v5556_v41 = vand.u32 %v3893_v16, %v5067_v5 }
  0xbd   : > { %4385 = vmatprep.mubr.msk.bf16.mxu1 %vm4996_vm2, %v6915_v1 }
  0xbe   : > { %v1020_v51 = vsel %vm980_vm7, %v1010_v31, %v1019_v43  ;;  %6945 = vst [vmem:[#allocation3_spill] sm:$0xff] %v5556_v41 }
  0xc2   : > { %4344 = vmatmul.mubr.msk.bf16.gmra.mrb[80].mxu0 %vm385_vm3, %v995_v48  ;;  %v1025_v48 = vshll.u32 %v5369_v63, 16 }
  0xc3   : > { %4347 = vmatprep.mubr.msk.bf16.mxu0 %vm4996_vm2, %v6915_v1 }
  0xc4   : > { %4386 = vmatmul.mubr.msk.bf16.gmra.mrb[84].mxu1 %vm385_vm3, %v5450_v55  ;;  %v1027_v61 = vrot.slane %v1025_v48, 2 }
  0xc5   : > { %4389 = vmatprep.mubr.msk.bf16.mxu1 %vm4996_vm2, %v6915_v1 }
  0xc6   : > { %v1028_v63 = vor.u32 %v1027_v61, %v1024_v57  ;;  %v1515_v57 = vrot.slane %v5194_v47, 3 }
  0xc8   : > { %v1029_v22 = vsel %vm980_vm7, %v1019_v43, %v1028_v63 }
  0xca   : > { %4348 = vmatmul.mubr.msk.bf16.gmra.mrb[84].mxu0 %vm385_vm3, %v999_v3  ;;  %v1204_v3 = vsel %vm1185_vm6, %v5504_v62, %v1203_v49 }
  0xcb   : > { %4351 = vmatprep.mubr.msk.bf16.mxu0 %vm4996_vm2, %v6915_v1 }
  0xcc   : > { %4390 = vmatmul.mubr.msk.bf16.gmra.mrb[88].mxu1 %vm385_vm3, %v5464_v12 }
  0xcd   : > { %4393 = vmatprep.mubr.msk.bf16.mxu1 %vm4996_vm2, %v6915_v1 }
  0xd2   : > { %4352 = vmatmul.mubr.msk.bf16.gmra.mrb[88].mxu0 %vm385_vm3, %v1003_v15  ;;  %v1505_v15 = vor.u32 %v1504_v8, %v1503_v4 }
  0xd3   : > { %4355 = vmatprep.mubr.msk.bf16.mxu0 %vm4996_vm2, %v6915_v1 }
  0xd4   : > { %4394 = vmatmul.mubr.msk.bf16.gmra.mrb[92].mxu1 %vm385_vm3, %v5478_v10  ;;  %v1509_v19 = vsel %vm1502_vm8, %v1505_v15, %v1508_v17 }
  0xd5   : > { %4397 = vmatprep.mubr.msk.bf16.mxu1 %vm4996_vm2, %v6915_v1 }
  0xda   : > { %4356 = vmatmul.mubr.msk.bf16.gmra.mrb[92].mxu0 %vm385_vm3, %v1007_v11  ;;  %v1511_v11 = vrot.slane %v5173_v40, 3 }
  0xdb   : > { %4359 = vmatprep.mubr.msk.bf16.mxu0 %vm4996_vm2, %v6915_v1 }
  0xdc   : > { %4398 = vmatmul.mubr.msk.bf16.gmra.mrb[96].mxu1 %vm385_vm3, %v5492_v25  ;;  %v1512_v46 = vor.u32 %v1511_v11, %v1510_v56 }
  0xdd   : > { %4401 = vmatprep.mubr.msk.bf16.mxu1 %vm4996_vm2, %v6915_v1 }
  0xe2   : > { %4360 = vmatmul.mubr.msk.bf16.gmra.mrb[96].mxu0 %vm385_vm3, %v1011_v37 }
  0xe3   : > { %4363 = vmatprep.mubr.msk.bf16.mxu0 %vm4996_vm2, %v6915_v1 }
  0xe4   : > { %4402 = vmatmul.mubr.msk.bf16.gmra.mrb[100].mxu1 %vm385_vm3, %v5513_v38 }
  0xe5   : > { %4405 = vmatprep.mubr.msk.bf16.mxu1 %vm4996_vm2, %v6915_v1 }
  0xea   : > { %4364 = vmatmul.mubr.msk.bf16.gmra.mrb[100].mxu0 %vm385_vm3, %v1020_v51  ;;  %v1514_v51 = vrot.slane %v5210_v52, 2 }
  0xeb   : > { %4367 = vmatprep.mubr.msk.bf16.mxu0 %vm4996_vm2, %v6915_v1 }
  0xec   : > { %4406 = vmatmul.mubr.msk.bf16.gmra.mrb[104].mxu1 %vm385_vm3, %v1204_v3  ;;  %v1516_v52 = vor.u32 %v1515_v57, %v1514_v51 }
  0xed   : > { %4449 = vmatprep.mubr.msk.bf16.mxu1 %vm4996_vm2, %v6915_v1 }
  0xee   : > { %v580_v27 = vpop.f32.mrb[0].mxu1  ;;  %v1517_v15 = vsel %vm1502_vm8, %v1512_v46, %v1516_v52 }
  0xef   : > { %v4223_v39 = vpop.f32.mrb[1].mxu1 }
  0xf0   : > { %v583_v18 = vpop.f32.mrb[2].mxu1 }
  0xf1   : > { %v4224_v29 = vpop.f32.mrb[3].mxu1 }
  0xf2   : > { %4368 = vmatmul.mubr.msk.bf16.gmra.mrb[104].mxu0 %vm385_vm3, %v1029_v22 }
  0xf3   : > { %4411 = vmatprep.mubr.msk.bf16.mxu0 %vm4996_vm2, %v6915_v1 }
  0xf4   : > { %4450 = vmatmul.mubr.msk.bf16.vlgmr.msra.gmra.mrb[108].mxu1 %vm385_vm3, %v1509_v19 }
  0xf5   : > { %v454_v23 = vpop.f32.mrb[0].mxu0  ;;  %4524 = vmatpush3.bf16.msra.mxu1 %v5074_v6  ;;  %4453 = vmatprep.mubr.msk.bf16.mxu1 %vm4996_vm2, %v6915_v1  ;;  %v1513_v6 = vsel %vm1502_vm8, %v1508_v17, %v1512_v46  ;;  %v1518_v17 = vrot.slane %v5229_v58, 2  ;;  %v1522_v46 = vrot.slane %v5248_v0, 2 }
  0xf6   : > { %v5552_v31 = vadd.f32 %v580_v27, %v454_v23  ;;  %v4185_v40 = vpop.f32.mrb[1].mxu0  ;;  %4599 = vmatprep.subr.bf16.mxu1 %v6915_v1  ;;  %v1519_v27 = vrot.slane %v5213_v53, 3 }
  0xf7   : > { %v457_v37 = vpop.f32.mrb[2].mxu0  ;;  %v588_v35 = vpop.f32.mrb[4].mxu1  ;;  %v1523_v40 = vrot.slane %v5232_v59, 3 }
  0xf8   : > { %v5558_v43 = vadd.f32 %v583_v18, %v457_v37  ;;  %v4186_v45 = vpop.f32.mrb[3].mxu0  ;;  %v4227_v48 = vpop.f32.mrb[5].mxu1  ;;  %v1520_v18 = vor.u32 %v1519_v27, %v1518_v17  ;;  %v231_v27 = vld [vmem:[%s6911_s3] sm:$0xff] }
  0xf9   : > { %v591_v49 = vpop.f32.mrb[6].mxu1  ;;  %v1524_v45 = vor.u32 %v1523_v40, %v1522_v46 }
  0xfa   : > { %4412 = vmatmul.mubr.msk.bf16.vlgmr.msra.gmra.mrb[108].mxu0 %vm385_vm3, %v5420_v33  ;;  %v4228_v61 = vpop.f32.mrb[7].mxu1  ;;  %v1521_v23 = vsel %vm1502_vm8, %v1516_v52, %v1520_v18  ;;  %v1527_v52 = vrot.slane %v5251_v2, 3 }
  0xfb   : > { %4486 = vmatpush3.bf16.msra.mxu0 %v5556_v41  ;;  %4415 = vmatprep.mubr.msk.bf16.mxu0 %vm4996_vm2, %v6915_v1  ;;  %v1525_v61 = vsel %vm1502_vm8, %v1520_v18, %v1524_v45 }
  0xfc   : > { %4454 = vmatmul.mubr.msk.bf16.gmra.mrb[112].mxu1 %vm385_vm3, %v1513_v6  ;;  %4561 = vmatprep.subr.bf16.mxu0 %v6915_v1 }
  0xfd   : > { %v462_v5 = vpop.f32.mrb[4].mxu0  ;;  %4457 = vmatprep.mubr.msk.bf16.mxu1 %vm4996_vm2, %v6915_v1 }
  0xfe   : > { %v5572_v3 = vadd.f32 %v588_v35, %v462_v5  ;;  %v4189_v47 = vpop.f32.mrb[5].mxu0  ;;  %v1526_v5 = vrot.slane %v5271_v13, 2 }
  0xff   : > { %v465_v4 = vpop.f32.mrb[6].mxu0  ;;  %v596_v33 = vpop.f32.mrb[8].mxu1 }
 0x100   : > { %v5574_v8 = vadd.f32 %v591_v49, %v465_v4  ;;  %v4190_v14 = vpop.f32.mrb[7].mxu0  ;;  %v4231_v50 = vpop.f32.mrb[9].mxu1 }
 0x101   : > { %v599_v63 = vpop.f32.mrb[10].mxu1  ;;  %v270_v14 = vld [vmem:[%s5097_s8 + $0x54] sm:$0xf] }
 0x102   : > { %4416 = vmatmul.mubr.msk.bf16.gmra.mrb[112].mxu0 %vm385_vm3, %v5436_v42  ;;  %v4232_v22 = vpop.f32.mrb[11].mxu1 }
 0x103   : > { %4419 = vmatprep.mubr.msk.bf16.mxu0 %vm4996_vm2, %v6915_v1  ;;  %v5623_v22 = vcombine.low %v5364_v60, %v270_v14 }
 0x104   : > { %4458 = vmatmul.mubr.msk.bf16.gmra.mrb[116].mxu1 %vm385_vm3, %v1517_v15 }
 0x105   : > { %v470_v39 = vpop.f32.mrb[8].mxu0  ;;  %4461 = vmatprep.mubr.msk.bf16.mxu1 %vm4996_vm2, %v6915_v1 }
 0x106   : > { %v5586_v29 = vadd.f32 %v596_v33, %v470_v39  ;;  %v4193_v19 = vpop.f32.mrb[9].mxu0  ;;  %v1528_v33 = vor.u32 %v1527_v52, %v1526_v5 }
 0x107   : > { %v473_v58 = vpop.f32.mrb[10].mxu0  ;;  %v604_v56 = vpop.f32.mrb[12].mxu1  ;;  %v1530_v19 = vrot.slane %v1013_v32, 2 }
 0x108   : > { %v5588_v53 = vadd.f32 %v599_v63, %v473_v58  ;;  %v4194_v11 = vpop.f32.mrb[11].mxu0  ;;  %v4235_v42 = vpop.f32.mrb[13].mxu1  ;;  %v1529_v18 = vsel %vm1502_vm8, %v1524_v45, %v1528_v33  ;;  %v1531_v58 = vrot.slane %v1016_v36, 3  ;;  %v1535_v36 = vshrl.u32 %v5623_v22, 16 }
 0x109   : > { %v607_v16 = vpop.f32.mrb[14].mxu1  ;;  %v1538_v42 = vshll.u32 %v5623_v22, 16 }
 0x10a   : > { %4420 = vmatmul.mubr.msk.bf16.gmra.mrb[116].mxu0 %vm385_vm3, %v5450_v55  ;;  %v4236_v37 = vpop.f32.mrb[15].mxu1  ;;  %v1532_v32 = vor.u32 %v1531_v58, %v1530_v19  ;;  %v5671_v58 = vld [vmem:[%s5097_s8 + $0x48] sm:$0xff]  }
 0x10b   : > { %4423 = vmatprep.mubr.msk.bf16.mxu0 %vm4996_vm2, %v6915_v1 }
 0x10c   : > { %4462 = vmatmul.mubr.msk.bf16.gmra.mrb[120].mxu1 %vm385_vm3, %v1521_v23 }
 0x10d   : > { %v478_v35 = vpop.f32.mrb[12].mxu0  ;;  %4465 = vmatprep.mubr.msk.bf16.mxu1 %vm4996_vm2, %v6915_v1 }
 0x10e   : > { %v5600_v48 = vadd.f32 %v604_v56, %v478_v35  ;;  %v4197_v49 = vpop.f32.mrb[13].mxu0  ;;  %v4997_v56 = vmov 0  }
 0x10f   : > { %v481_v0 = vpop.f32.mrb[14].mxu0  ;;  %v612_v59 = vpop.f32.mrb[16].mxu1  ;;  %4911 = vset.pattern.permute.xlu0 %v4997_v56  ;;  %4912 = vset.pattern.permute.xlu1 %v4997_v56  ;;  %v233_v49 = vld [vmem:[%s6911_s3 + $0x10] sm:$0xff] }
 0x110   : > { %v5602_v6 = vadd.f32 %v607_v16, %v481_v0  ;;  %v4198_v55 = vpop.f32.mrb[15].mxu0  ;;  %v4239_v51 = vpop.f32.mrb[17].mxu1  ;;  %1925 = vperm.xlu0 %4911, %v231_v27   ;;  %1935 = vperm.xlu1 %4912, %v233_v49  }
 0x111   : > { %v615_v57 = vpop.f32.mrb[18].mxu1  ;;  %v1537_v55 = vrot.slane %v1535_v36, 2  ;;  %v1540_v51 = vrot.slane %v1538_v42, 3  ;;  %v5685_v42 = vld [vmem:[%s5097_s8 + $0x50] sm:$0xff]  }
 0x112   : > { %4424 = vmatmul.mubr.msk.bf16.gmra.mrb[120].mxu0 %vm385_vm3, %v5464_v12  ;;  %v4240_v47 = vpop.f32.mrb[19].mxu1 }
 0x113   : > { %4427 = vmatprep.mubr.msk.bf16.mxu0 %vm4996_vm2, %v6915_v1  ;;  %v1541_v52 = vor.u32 %v1540_v51, %v1537_v55 }
 0x114   : > { %4466 = vmatmul.mubr.msk.bf16.gmra.mrb[124].mxu1 %vm385_vm3, %v1525_v61 }
 0x115   : > { %v486_v4 = vpop.f32.mrb[16].mxu0  ;;  %4469 = vmatprep.mubr.msk.bf16.mxu1 %vm4996_vm2, %v6915_v1 }
 0x116   : > { %v5615_v50 = vadd.f32 %v612_v59, %v486_v4  ;;  %v4201_v13 = vpop.f32.mrb[17].mxu0  ;;  %v1533_v59 = vsel %vm1502_vm8, %v1528_v33, %v1532_v32 }
 0x117   : > { %v489_v63 = vpop.f32.mrb[18].mxu0  ;;  %v620_v2 = vpop.f32.mrb[20].mxu1 }
 0x118   : > { %v5617_v15 = vadd.f32 %v615_v57, %v489_v63  ;;  %v4202_v12 = vpop.f32.mrb[19].mxu0  ;;  %v4243_v17 = vpop.f32.mrb[21].mxu1  ;;  %v5651_v57 = vld [vmem:[%s5097_s8 + $0x58] ss:$0 sps:$4 sm:$0x77]  }
 0x119   : > { %v623_v39 = vpop.f32.mrb[22].mxu1  ;;  %v1544_v47 = vshrl.u32 %v5651_v57, 16  ;;  %v1547_v4 = vshll.u32 %v5651_v57, 16 }
 0x11a   : > { %4428 = vmatmul.mubr.msk.bf16.gmra.mrb[124].mxu0 %vm385_vm3, %v5478_v10  ;;  %v4244_v11 = vpop.f32.mrb[23].mxu1  ;;  %v232_v10 = vld [vmem:[%s6911_s3 + $0x8] sm:$0xff] }
 0x11b   : > { %4431 = vmatprep.mubr.msk.bf16.mxu0 %vm4996_vm2, %v6915_v1  ;;  %1930 = vperm.xlu0 %4911, %v232_v10   ;;  %v1549_v19 = vrot.slane %v1547_v4, 3  ;;  %v235_v11 = vld [vmem:[%s6911_s3 + $0x20] sm:$0xff]  ;;  %v236_v10 = vld [vmem:[%s6911_s3 + $0x28] sm:$0xff] }
 0x11c   : > { %4470 = vmatmul.mubr.msk.bf16.gmra.mrb[128].mxu1 %vm385_vm3, %v1529_v18  ;;  %v1546_v18 = vrot.slane %v1544_v47, 2  ;;  %v6913_v47 = vshll.u32 %v5685_v42, 16 }
 0x11d   : > { %v494_v60 = vpop.f32.mrb[20].mxu0  ;;  %4473 = vmatprep.mubr.msk.bf16.mxu1 %vm4996_vm2, %v6915_v1 }
 0x11e   : > { %v5642_v16 = vadd.f32 %v620_v2, %v494_v60  ;;  %v4205_v23 = vpop.f32.mrb[21].mxu0  ;;  %v1364_v60 = vrot.slane %v5623_v22, 2  ;;  %v1550_v36 = vor.u32 %v1549_v19, %v1546_v18 }
 0x11f   : > { %v497_v46 = vpop.f32.mrb[22].mxu0  ;;  %v628_v40 = vpop.f32.mrb[24].mxu1  ;;  %1945 = vperm.xlu0 %4911, %v235_v11  }
 0x120   : > { %v5644_v37 = vadd.f32 %v623_v39, %v497_v46  ;;  %v4206_v35 = vpop.f32.mrb[23].mxu0  ;;  %v4247_v45 = vpop.f32.mrb[25].mxu1  ;;  %v1542_v39 = vsel %vm1502_vm8, %v1532_v32, %v1541_v52  ;;  %v1551_v51 = vsel %vm1502_vm8, %v1541_v52, %v1550_v36 }
 0x121   : > { %v631_v0 = vpop.f32.mrb[26].mxu1  ;;  %v1365_v35 = vsel %vm1185_vm6, %v5504_v62, %v1364_v60  ;;  %v237_v62 = vld [vmem:[%s6911_s3 + $0x30] sm:$0xff] }
 0x122   : > { %4432 = vmatmul.mubr.msk.bf16.gmra.mrb[128].mxu0 %vm385_vm3, %v5492_v25  ;;  %v4248_v61 = vpop.f32.mrb[27].mxu1  ;;  %v234_v25 = vld [vmem:[%s6911_s3 + $0x18] sm:$0xff] }
 0x123   : > { %4435 = vmatprep.mubr.msk.bf16.mxu0 %vm4996_vm2, %v6915_v1  ;;  %1940 = vperm.xlu1 %4912, %v234_v25   ;;  %v2112_v61 = vshrl.u32 %v5671_v58, 16  ;;  %v1366_v25 = vrot.slane %v5651_v57, 2 }
 0x124   : > { %4474 = vmatmul.mubr.msk.bf16.gmra.mrb[132].mxu1 %vm385_vm3, %v1533_v59  ;;  %1955 = vperm.xlu0 %4911, %v237_v62  }
 0x125   : > { %v502_v5 = vpop.f32.mrb[24].mxu0  ;;  %4477 = vmatprep.mubr.msk.bf16.mxu1 %vm4996_vm2, %v6915_v1  ;;  %v1367_v18 = vsel %vm1185_vm6, %v1364_v60, %v1366_v25  ;;  %v239_v60 = vld [vmem:[%s6911_s3 + $0x40] sm:$0xff] }
 0x126   : > { %v5665_v33 = vadd.f32 %v628_v40, %v502_v5  ;;  %v4209_v14 = vpop.f32.mrb[25].mxu0 }
 0x127   : > { %v505_v13 = vpop.f32.mrb[26].mxu0  ;;  %v636_v63 = vpop.f32.mrb[28].mxu1  ;;  %1950 = vperm.xlu1 %4912, %v236_v10   ;;  %v6914_v10 = vshrl.u32 %v5685_v42, 16 }
 0x128   : > { %v5667_v2 = vadd.f32 %v631_v0, %v505_v13  ;;  %v4210_v12 = vpop.f32.mrb[27].mxu0  ;;  %v4251_v17 = vpop.f32.mrb[29].mxu1  ;;  %v2121_v13 = vrot.slane %v6913_v47, 1  ;;  %1965 = vperm.xlu0 %4911, %v239_v60   ;;  %v5779_v60 = vld [vmem:[%s5097_s8 + $0x68] sm:$0xff]  }
 0x129   : > { %v639_v27 = vpop.f32.mrb[30].mxu1  ;;  %v238_v12 = vld [vmem:[%s6911_s3 + $0x38] sm:$0xff] }
 0x12a   : > { %4436 = vmatmul.mubr.msk.bf16.gmra.mrb[132].mxu0 %vm385_vm3, %v5513_v38  ;;  %v4252_v56 = vpop.f32.mrb[31].mxu1  ;;  %v2114_v38 = vshll.u32 %v5671_v58, 16 }
 0x12b   : > { %4439 = vmatprep.mubr.msk.bf16.mxu0 %vm4996_vm2, %v6915_v1  ;;  %1960 = vperm.xlu1 %4912, %v238_v12  }
 0x12c   : > { %4478 = vmatmul.mubr.msk.bf16.gmra.mrb[136].mxu1 %vm385_vm3, %v1542_v39  ;;  %v2116_v5 = vrot.slane %v2114_v38, 1 }
 0x12d   : > { %v510_v32 = vpop.f32.mrb[28].mxu0  ;;  %4481 = vmatprep.mubr.msk.bf16.mxu1 %vm4996_vm2, %v6915_v1 }
 0x12e   : > { %v5691_v23 = vadd.f32 %v636_v63, %v510_v32  ;;  %v4213_v46 = vpop.f32.mrb[29].mxu0  ;;  %v2117_v14 = vor.u32 %v2116_v5, %v2112_v61  ;;  %v5713_v63 = vld [vmem:[%s5097_s8 + $0x58] sm:$0xff]   ;;  %v5744_v61 = vld [vmem:[%s5097_s8 + $0x60] sm:$0xff]  }
 0x12f   : > { %v513_v40 = vpop.f32.mrb[30].mxu0  ;;  %v644_v45 = vpop.f32.mrb[32].mxu1  ;;  %v5726_v46 = vshll.u32 %v5713_v63, 16 }
 0x130   : > { %v5695_v49 = vadd.f32 %v639_v27, %v513_v40  ;;  %v4214_v0 = vpop.f32.mrb[31].mxu0  ;;  %v4255_v59 = vpop.f32.mrb[33].mxu1  ;;  %v2122_v38 = vsel %vm308_vm4, %v2117_v14, %v2121_v13 }
 0x131   : > { %v647_v55 = vpop.f32.mrb[34].mxu1  ;;  %v1709_v0 = vrot.slane %v5132_v26, 3  ;;  %v240_v26 = vld [vmem:[%s6911_s3 + $0x48] sm:$0xff] }
 0x132   : > { %4440 = vmatmul.mubr.msk.bf16.gmra.mrb[136].mxu0 %vm385_vm3, %v1365_v35  ;;  %v4256_v4 = vpop.f32.mrb[35].mxu1  ;;  %v4941_v35 = vld [vmem:[%s5097_s8 + $0x10] sm:$0xff]   ;;  %1970 = vperm.xlu1 %4912, %v240_v26  }
 0x133   : > { %4443 = vmatprep.mubr.msk.bf16.mxu0 %vm4996_vm2, %v6915_v1 }
 0x134   : > { %4482 = vmatmul.mubr.msk.bf16.gmra.mrb[140].mxu1 %vm385_vm3, %v1551_v51  ;;  %v2129_v51 = vrot.slane %v5726_v46, 1 }
 0x135   : > { %v518_v52 = vpop.f32.mrb[32].mxu0  ;;  %4525 = vmatprep.mubr.msk.bf16.mxu1 %vm4996_vm2, %v6915_v1 }
 0x136   : > { %v4217_v17 = vpop.f32.mrb[33].mxu0  ;;  %v5718_v27 = vadd.f32 %v644_v45, %v518_v52  ;;  %v1708_v45 = vrot.slane %v4941_v35, 3 }
 0x137   : > { %v521_v39 = vpop.f32.mrb[34].mxu0  ;;  %v889_v19 = vpop.f32.mrb[36].mxu1 }
 0x138   : > { %v4218_v56 = vpop.f32.mrb[35].mxu0  ;;  %v4299_v11 = vpop.f32.mrb[37].mxu1  ;;  %v5721_v32 = vadd.f32 %v647_v55, %v521_v39  ;;  %v2125_v55 = vor.u32 %v6914_v10, %v2121_v13  ;;  %v1710_v62 = vsel %vm1707_vm9, %v1708_v45, %v1709_v0 }
 0x139   : > { %v892_v36 = vpop.f32.mrb[38].mxu1 }
 0x13a   : > { %4444 = vmatmul.mubr.msk.bf16.gmra.mrb[140].mxu0 %vm385_vm3, %v1367_v18  ;;  %v4300_v40 = vpop.f32.mrb[39].mxu1  ;;  %v2130_v39 = vsel %vm308_vm4, %v2125_v55, %v2129_v51  ;;  %v5760_v18 = vshll.u32 %v5744_v61, 16 }
 0x13b   : > { %4487 = vmatprep.mubr.msk.bf16.mxu0 %vm4996_vm2, %v6915_v1 }
 0x13c   : > { %4526 = vmatmul.mubr.msk.bf16.vlgmr.msra.gmra.mrb[144].mxu1 %vm385_vm3, %v2122_v38  ;;  %v2137_v40 = vrot.slane %v5760_v18, 1 }
 0x13d   : > { %v747_v59 = vpop.f32.mrb[36].mxu0  ;;  %4600 = vmatpush3.bf16.msra.mxu1 %v5119_v20  ;;  %4529 = vmatprep.mubr.msk.bf16.mxu1 %vm4996_vm2, %v6915_v1 }
 0x13e   : > { %v818_v5 = vadd.f32 %v747_v59, %v5552_v31  ;;  %v4261_v4 = vpop.f32.mrb[37].mxu0  ;;  %4675 = vmatprep.subr.bf16.mxu1 %v6915_v1  ;;  %v5757_v31 = vshrl.u32 %v5713_v63, 16 }
 0x13f   : > { %v750_v20 = vpop.f32.mrb[38].mxu0  ;;  %v897_v25 = vpop.f32.mrb[40].mxu1 }
 0x140   : > { %v819_v52 = vadd.f32 %v750_v20, %v5558_v43  ;;  %v4262_v14 = vpop.f32.mrb[39].mxu0  ;;  %v4303_v13 = vpop.f32.mrb[41].mxu1  ;;  %v5753_v12 = vadd.f32 %v889_v19, %v818_v5  ;;  %v241_v43 = vld [vmem:[%s6911_s3 + $0x50] sm:$0xff]  ;;  %v1711_v19 = vrot.slane %v5153_v34, 3 }
 0x141   : > { %v900_v17 = vpop.f32.mrb[42].mxu1  ;;  %1975 = vperm.xlu0 %4911, %v241_v43   ;;  %v244_v43 = vld [vmem:[%s6911_s3 + $0x68] sm:$0xff] }
 0x142   : > { %4488 = vmatmul.mubr.msk.bf16.vlgmr.msra.gmra.mrb[144].mxu0 %vm385_vm3, %v1710_v62  ;;  %v4304_v56 = vpop.f32.mrb[43].mxu1  ;;  %v5763_v11 = vadd.f32 %v892_v36, %v819_v52  ;;  %v2133_v36 = vor.u32 %v5757_v31, %v2129_v51  ;;  %v1712_v59 = vsel %vm1707_vm9, %v1709_v0, %v1711_v19  ;;  %v5791_v52 = vshrl.u32 %v5744_v61, 16 }
 0x143   : > { %4562 = vmatpush3.bf16.msra.mxu0 %v5077_v7  ;;  %4491 = vmatprep.mubr.msk.bf16.mxu0 %vm4996_vm2, %v6915_v1  ;;  %v242_v7 = vld [vmem:[%s6911_s3 + $0x58] sm:$0xff]  ;;  %v5811_v56 = vld [vmem:[%s5097_s8 + $0x70] sm:$0xff]  }
 0x144   : > { %4530 = vmatmul.mubr.msk.bf16.gmra.mrb[148].mxu1 %vm385_vm3, %v2130_v39  ;;  %4637 = vmatprep.subr.bf16.mxu0 %v6915_v1  ;;  %v2138_v62 = vsel %vm308_vm4, %v2133_v36, %v2137_v40  ;;  %v2141_v39 = vor.u32 %v5791_v52, %v2137_v40 }
 0x145   : > { %v755_v38 = vpop.f32.mrb[40].mxu0  ;;  %4533 = vmatprep.mubr.msk.bf16.mxu1 %vm4996_vm2, %v6915_v1  ;;  %1980 = vperm.xlu1 %4912, %v242_v7  }
 0x146   : > { %v820_v34 = vadd.f32 %v755_v38, %v5572_v3  ;;  %v4265_v35 = vpop.f32.mrb[41].mxu0  ;;  %v5794_v3 = vshll.u32 %v5779_v60, 16 }
 0x147   : > { %v758_v45 = vpop.f32.mrb[42].mxu0  ;;  %v905_v55 = vpop.f32.mrb[44].mxu1 }
 0x148   : > { %v821_v26 = vadd.f32 %v758_v45, %v5574_v8  ;;  %v4266_v51 = vpop.f32.mrb[43].mxu0  ;;  %v4307_v5 = vpop.f32.mrb[45].mxu1  ;;  %v5787_v4 = vadd.f32 %v897_v25, %v820_v34  ;;  %v243_v8 = vld [vmem:[%s6911_s3 + $0x60] sm:$0xff]  ;;  %v1713_v25 = vrot.slane %v5183_v44, 3 }
 0x149   : > { %v908_v20 = vpop.f32.mrb[46].mxu1  ;;  %1985 = vperm.xlu0 %4911, %v243_v8   ;;  %1990 = vperm.xlu1 %4912, %v244_v43   ;;  %v5823_v5 = vshrl.u32 %v5779_v60, 16  ;;  %v246_v43 = vld [vmem:[%s6911_s3 + $0x78] sm:$0xff] }
 0x14a   : > { %4492 = vmatmul.mubr.msk.bf16.gmra.mrb[148].mxu0 %vm385_vm3, %v1712_v59  ;;  %v4308_v0 = vpop.f32.mrb[47].mxu1  ;;  %v5797_v14 = vadd.f32 %v900_v17, %v821_v26  ;;  %v2145_v17 = vrot.slane %v5794_v3, 1  ;;  %v1714_v7 = vsel %vm1707_vm9, %v1711_v19, %v1713_v25 }
 0x14b   : > { %4495 = vmatprep.mubr.msk.bf16.mxu0 %vm4996_vm2, %v6915_v1  ;;  %v245_v0 = vld [vmem:[%s6911_s3 + $0x70] sm:$0xff] }
 0x14c   : > { %4534 = vmatmul.mubr.msk.bf16.gmra.mrb[152].mxu1 %vm385_vm3, %v2138_v62  ;;  %v2146_v51 = vsel %vm308_vm4, %v2141_v39, %v2145_v17  ;;  %v5843_v39 = vld [vmem:[%s5097_s8 + $0x78] sm:$0xff]  }
 0x14d   : > { %v763_v13 = vpop.f32.mrb[44].mxu0  ;;  %4537 = vmatprep.mubr.msk.bf16.mxu1 %vm4996_vm2, %v6915_v1  ;;  %1995 = vperm.xlu0 %4911, %v245_v0   ;;  %v5855_v0 = vshrl.u32 %v5811_v56, 16 }
 0x14e   : > { %v822_v38 = vadd.f32 %v763_v13, %v5586_v29  ;;  %v4269_v44 = vpop.f32.mrb[45].mxu0  ;;  %v5826_v29 = vshll.u32 %v5811_v56, 16  ;;  %v2149_v13 = vor.u32 %v5823_v5, %v2145_v17  ;;  %2000 = vperm.xlu1 %4912, %v246_v43  }
 0x14f   : > { %v766_v36 = vpop.f32.mrb[46].mxu0  ;;  %v913_v34 = vpop.f32.mrb[48].mxu1 }
 0x150   : > { %v823_v35 = vadd.f32 %v766_v36, %v5588_v53  ;;  %v4270_v40 = vpop.f32.mrb[47].mxu0  ;;  %v4311_v45 = vpop.f32.mrb[49].mxu1  ;;  %v5819_v59 = vadd.f32 %v905_v55, %v822_v38  ;;  %v4942_v53 = vld [vmem:[%s5097_s8 + $0x30] sm:$0xff]  }
 0x151   : > { %v916_v26 = vpop.f32.mrb[50].mxu1  ;;  %v1715_v55 = vrot.slane %v4942_v53, 3 }
 0x152   : > { %4496 = vmatmul.mubr.msk.bf16.gmra.mrb[152].mxu0 %vm385_vm3, %v1714_v7  ;;  %v4312_v19 = vpop.f32.mrb[51].mxu1  ;;  %v5829_v62 = vadd.f32 %v908_v20, %v823_v35  ;;  %v2153_v20 = vrot.slane %v5826_v29, 1 }
 0x153   : > { %4499 = vmatprep.mubr.msk.bf16.mxu0 %vm4996_vm2, %v6915_v1  ;;  %v1716_v7 = vsel %vm1707_vm9, %v1713_v25, %v1715_v55 }
 0x154   : > { %4538 = vmatmul.mubr.msk.bf16.gmra.mrb[156].mxu1 %vm385_vm3, %v2146_v51  ;;  %v2154_v53 = vsel %vm308_vm4, %v2149_v13, %v2153_v20 }
 0x155   : > { %v771_v8 = vpop.f32.mrb[48].mxu0  ;;  %4541 = vmatprep.mubr.msk.bf16.mxu1 %vm4996_vm2, %v6915_v1 }
 0x156   : > { %v824_v38 = vadd.f32 %v771_v8, %v5600_v48  ;;  %v4273_v44 = vpop.f32.mrb[49].mxu0  ;;  %v5858_v48 = vshll.u32 %v5843_v39, 16 }
 0x157   : > { %v774_v36 = vpop.f32.mrb[50].mxu0  ;;  %v921_v35 = vpop.f32.mrb[52].mxu1  ;;  %v5875_v44 = vld [vmem:[%s5097_s8 + $0x80] sm:$0xff]  }
 0x158   : > { %v825_v40 = vadd.f32 %v774_v36, %v5602_v6  ;;  %v4274_v17 = vpop.f32.mrb[51].mxu0  ;;  %v4315_v45 = vpop.f32.mrb[53].mxu1  ;;  %v5851_v51 = vadd.f32 %v913_v34, %v824_v38  ;;  %6946 = vst [vmem:[#allocation4_spill] sm:$0xff] %v5858_v48  ;;  %v247_v6 = vld [vmem:[%s6911_s3 + $0x80] sm:$0xff]  ;;  %v4943_v34 = vld [vmem:[%s5097_s8 + $0x38] sm:$0xff]   ;;  %v2157_v38 = vor.u32 %v5855_v0, %v2153_v20  ;;  %v248_v36 = vld [vmem:[%s6911_s3 + $0x88] sm:$0xff] }
 0x159   : > { %v924_v19 = vpop.f32.mrb[54].mxu1  ;;  %v1717_v13 = vrot.slane %v4943_v34, 3  ;;  %2005 = vperm.xlu0 %4911, %v247_v6   ;;  %2010 = vperm.xlu1 %4912, %v248_v36  }
 0x15a   : > { %4500 = vmatmul.mubr.msk.bf16.gmra.mrb[156].mxu0 %vm385_vm3, %v1716_v7  ;;  %v4316_v25 = vpop.f32.mrb[55].mxu1  ;;  %v5861_v8 = vadd.f32 %v916_v26, %v825_v40  ;;  %v2161_v26 = vrot.slane %v5858_v48, 1 }
 0x15b   : > { %4503 = vmatprep.mubr.msk.bf16.mxu0 %vm4996_vm2, %v6915_v1  ;;  %v1718_v45 = vsel %vm1707_vm9, %v1715_v55, %v1717_v13 }
 0x15c   : > { %4542 = vmatmul.mubr.msk.bf16.gmra.mrb[160].mxu1 %vm385_vm3, %v2154_v53  ;;  %v2162_v10 = vsel %vm308_vm4, %v2157_v38, %v2161_v26 }
 0x15d   : > { %v779_v43 = vpop.f32.mrb[52].mxu0  ;;  %4545 = vmatprep.mubr.msk.bf16.mxu1 %vm4996_vm2, %v6915_v1  ;;  %v5887_v1 = vshrl.u32 %v5843_v39, 16 }
 0x15e   : > { %v826_v7 = vadd.f32 %v779_v43, %v5615_v50  ;;  %v4277_v40 = vpop.f32.mrb[53].mxu0  ;;  %v5890_v50 = vshll.u32 %v5875_v44, 16 }
 0x15f   : > { %v782_v17 = vpop.f32.mrb[54].mxu0  ;;  %v929_v53 = vpop.f32.mrb[56].mxu1  ;;  %6947 = vst [vmem:[#allocation5_spill] sm:$0xff] %v5887_v1  ;;  %v2165_v38 = vor.u32 %v5887_v1, %v2161_v26 }
 0x160   : > { %v827_v25 = vadd.f32 %v782_v17, %v5617_v15  ;;  %v4278_v20 = vpop.f32.mrb[55].mxu0  ;;  %v4319_v6 = vpop.f32.mrb[57].mxu1  ;;  %v5883_v34 = vadd.f32 %v921_v35, %v826_v7  ;;  %6948 = vst [vmem:[#allocation6_spill] sm:$0xff] %v5890_v50  ;;  %v6949_v15 = vmov 0.0   ;;  %v4944_v35 = vld [vmem:[%s5097_s8 + $0x40] sm:$0xff]   ;;  %v2169_v40 = vrot.slane %v5890_v50, 1 }
 0x161   : > { %v932_v47 = vpop.f32.mrb[58].mxu1  ;;  %v1719_v36 = vrot.slane %v4944_v35, 3  ;;  %v5904_v17 = vld [vmem:[%s5097_s8 + $0x88] sm:$0xff]   ;;  %v5913_v50 = vshrl.u32 %v5875_v44, 16 }
 0x162   : > { %4504 = vmatmul.mubr.msk.bf16.gmra.mrb[160].mxu0 %vm385_vm3, %v1718_v45  ;;  %v4320_v55 = vpop.f32.mrb[59].mxu1  ;;  %v5893_v43 = vadd.f32 %v924_v19, %v827_v25  ;;  %v2170_v26 = vsel %vm308_vm4, %v2165_v38, %v2169_v40  ;;  %v5916_v48 = vshll.u32 %v5904_v17, 16 }
 0x163   : > { %4507 = vmatprep.mubr.msk.bf16.mxu0 %vm4996_vm2, %v6949_v15  ;;  %v1720_v20 = vsel %vm1707_vm9, %v1717_v13, %v1719_v36  ;;  %6950 = vst [vmem:[#allocation7_spill] sm:$0xff] %v5913_v50  ;;  %v5920_v13 = vld [vmem:[%s5097_s8 + $0x90] sm:$0xf]  ;;  %v2173_v38 = vor.u32 %v5913_v50, %v2169_v40  ;;  %v5943_v50 = vshrl.u32 %v5904_v17, 16 }
 0x164   : > { %4546 = vmatmul.mubr.msk.bf16.gmra.mrb[164].mxu1 %vm385_vm3, %v2162_v10  ;;  %6951 = vst [vmem:[#allocation8_spill] sm:$0xff] %v5916_v48 }
 0x165   : > { %v787_v7 = vpop.f32.mrb[56].mxu0  ;;  %4549 = vmatprep.mubr.msk.bf16.mxu1 %vm4996_vm2, %v6949_v15  ;;  %6952 = vst [vmem:[#allocation9_spill] sm:$0xff] %v5943_v50 }
 0x166   : > { %v828_v19 = vadd.f32 %v787_v7, %v5642_v16  ;;  %v4281_v45 = vpop.f32.mrb[57].mxu0 }
 0x167   : > { %v790_v25 = vpop.f32.mrb[58].mxu0  ;;  %v937_v6 = vpop.f32.mrb[60].mxu1  ;;  %v5934_v45 = vcombine.low %v5920_v13, %v5920_v13 }
 0x168   : > { %v829_v10 = vadd.f32 %v790_v25, %v5644_v37  ;;  %v4282_v55 = vpop.f32.mrb[59].mxu0  ;;  %v4323_v35 = vpop.f32.mrb[61].mxu1  ;;  %v5909_v21 = vadd.f32 %v929_v53, %v828_v19  ;;  %v1721_v37 = vrot.slane %v5353_v54, 3  ;;  %v2177_v19 = vrot.slane %v5916_v48, 1 }
 0x169   : > { %v940_v41 = vpop.f32.mrb[62].mxu1  ;;  %v2183_v1 = vshll.u32 %v5934_v45, 16 }
 0x16a   : > { %4508 = vmatmul.mubr.msk.bf16.gmra.mrb[164].mxu0 %vm385_vm3, %v1720_v20  ;;  %v4324_v16 = vpop.f32.mrb[63].mxu1  ;;  %v5922_v7 = vadd.f32 %v932_v47, %v829_v10  ;;  %v1722_v54 = vsel %vm1707_vm9, %v1719_v36, %v1721_v37  ;;  %v2178_v48 = vsel %vm308_vm4, %v2173_v38, %v2177_v19 }
 0x16b   : > { %4511 = vmatprep.mubr.msk.bf16.mxu0 %vm4996_vm2, %v6949_v15  ;;  %v2185_v38 = vrot.slane %v2183_v1, 1 }
 0x16c   : > { %4550 = vmatmul.mubr.msk.bf16.gmra.mrb[168].mxu1 %vm385_vm3, %v2170_v26 }
 0x16d   : > { %v795_v53 = vpop.f32.mrb[60].mxu0  ;;  %4553 = vmatprep.mubr.msk.bf16.mxu1 %vm4996_vm2, %v6949_v15 }
 0x16e   : > { %v830_v47 = vadd.f32 %v795_v53, %v5665_v33  ;;  %v4285_v25 = vpop.f32.mrb[61].mxu0 }
 0x16f   : > { %v798_v20 = vpop.f32.mrb[62].mxu0  ;;  %v945_v10 = vpop.f32.mrb[64].mxu1 }
 0x170   : > { %v831_v55 = vadd.f32 %v798_v20, %v5667_v2  ;;  %v4286_v35 = vpop.f32.mrb[63].mxu0  ;;  %v4327_v26 = vpop.f32.mrb[65].mxu1  ;;  %v5939_v16 = vadd.f32 %v937_v6, %v830_v47  ;;  %v1723_v2 = vrot.slane %v5623_v22, 3  ;;  %v2181_v6 = vor.u32 %v5943_v50, %v2177_v19 }
 0x171   : > { %v948_v40 = vpop.f32.mrb[66].mxu1 }
 0x172   : > { %4512 = vmatmul.mubr.msk.bf16.gmra.mrb[168].mxu0 %vm385_vm3, %v1722_v54  ;;  %v4328_v33 = vpop.f32.mrb[67].mxu1  ;;  %v5947_v53 = vadd.f32 %v940_v41, %v831_v55  ;;  %v1724_v41 = vsel %vm1707_vm9, %v1721_v37, %v1723_v2  ;;  %v2452_v37 = vrot.slane %v5671_v58, 1 }
 0x173   : > { %4515 = vmatprep.mubr.msk.bf16.mxu0 %vm4996_vm2, %v6949_v15  ;;  %v2186_v33 = vsel %vm308_vm4, %v2181_v6, %v2185_v38  ;;  %v2074_v38 = vld [vmem:[%s5097_s8 + $0x94] sm:$0xf] }
 0x174   : > { %4554 = vmatmul.mubr.msk.bf16.gmra.mrb[172].mxu1 %vm385_vm3, %v2178_v48 }
 0x175   : > { %v803_v36 = vpop.f32.mrb[64].mxu0  ;;  %4557 = vmatprep.mubr.msk.bf16.mxu1 %vm4996_vm2, %v6949_v15 }
 0x176   : > { %v832_v47 = vadd.f32 %v803_v36, %v5691_v23  ;;  %v4289_v25 = vpop.f32.mrb[65].mxu0  ;;  %v1725_v23 = vrot.slane %v5651_v57, 3 }
 0x177   : > { %v806_v20 = vpop.f32.mrb[66].mxu0  ;;  %v953_v54 = vpop.f32.mrb[68].mxu1 }
 0x178   : > { %v833_v55 = vadd.f32 %v806_v20, %v5695_v49  ;;  %v4290_v35 = vpop.f32.mrb[67].mxu0  ;;  %v4331_v22 = vpop.f32.mrb[69].mxu1  ;;  %v5959_v26 = vadd.f32 %v945_v10, %v832_v47  ;;  %v2453_v10 = vrot.slane %v5685_v42, 1  ;;  %v1726_v47 = vsel %vm1707_vm9, %v1723_v2, %v1725_v23 }
 0x179   : > { %v956_v48 = vpop.f32.mrb[70].mxu1  ;;  %v2455_v2 = vrot.slane %v5713_v63, 1 }
 0x17a   : > { %4516 = vmatmul.mubr.msk.bf16.gmra.mrb[172].mxu0 %vm385_vm3, %v1724_v41  ;;  %v4332_v1 = vpop.f32.mrb[71].mxu1  ;;  %v5963_v19 = vadd.f32 %v948_v40, %v833_v55  ;;  %v2454_v22 = vsel %vm663_vm5, %v2452_v37, %v2453_v10 }
 0x17b   : > { %4519 = vmatprep.mubr.msk.bf16.mxu0 %vm4996_vm2, %v6949_v15 }
 0x17c   : > { %4558 = vmatmul.mubr.msk.bf16.gmra.mrb[176].mxu1 %vm385_vm3, %v2186_v33  ;;  %v5981_v33 = vcombine.low %v5920_v13, %v2074_v38 }
 0x17d   : > { %v811_v49 = vpop.f32.mrb[68].mxu0  ;;  %4601 = vmatprep.mubr.msk.bf16.mxu1 %vm4996_vm2, %v6949_v15 }
 0x17e   : > { %v834_v36 = vadd.f32 %v811_v49, %v5718_v27  ;;  %v4293_v6 = vpop.f32.mrb[69].mxu0  ;;  %v2793_v37 = vshll.u32 %v5981_v33, 16 }
 0x17f   : > { %v814_v40 = vpop.f32.mrb[70].mxu0  ;;  %v1269_v25 = vpop.f32.mrb[72].mxu1 }
 0x180   : > { %v835_v57 = vadd.f32 %v814_v40, %v5721_v32  ;;  %v4294_v20 = vpop.f32.mrb[71].mxu0  ;;  %v4375_v41 = vpop.f32.mrb[73].mxu1  ;;  %v5977_v55 = vadd.f32 %v953_v54, %v834_v36 }
 0x181   : > { %v1272_v35 = vpop.f32.mrb[74].mxu1 }
 0x182   : > { %4520 = vmatmul.mubr.msk.bf16.gmra.mrb[176].mxu0 %vm385_vm3, %v1726_v47  ;;  %v4376_v27 = vpop.f32.mrb[75].mxu1  ;;  %v5984_v1 = vadd.f32 %v956_v48, %v835_v57  ;;  %v2790_v48 = vshrl.u32 %v5981_v33, 16  ;;  %v3291_v57 = vrot.slane %v2793_v37, 3 }
 0x183   : > { %4563 = vmatprep.mubr.msk.bf16.mxu0 %vm4996_vm2, %v6949_v15 }
 0x184   : > { %4602 = vmatmul.mubr.msk.bf16.vlgmr.msra.gmra.mrb[180].mxu1 %vm385_vm3, %v2454_v22  ;;  %v3290_v38 = vrot.slane %v2790_v48, 2 }
 0x185   : > { %v1094_v32 = vpop.f32.mrb[72].mxu0  ;;  %4676 = vmatpush3.bf16.msra.mxu1 %v5306_v30  ;;  %4605 = vmatprep.mubr.msk.bf16.mxu1 %vm4996_vm2, %v6949_v15 }
 0x186   : > { %v1165_v13 = vadd.f32 %v1094_v32, %v5753_v12  ;;  %v4337_v54 = vpop.f32.mrb[73].mxu0  ;;  %4751 = vmatprep.subr.bf16.mxu1 %v6949_v15  ;;  %v6003_v12 = vsel %vm663_vm5, %v2453_v10, %v2455_v2 }
 0x187   : > { %v1097_v23 = vpop.f32.mrb[74].mxu0  ;;  %v1277_v49 = vpop.f32.mrb[76].mxu1 }
 0x188   : > { %v1166_v36 = vadd.f32 %v1097_v23, %v5763_v11  ;;  %v4338_v6 = vpop.f32.mrb[75].mxu0  ;;  %v4379_v30 = vpop.f32.mrb[77].mxu1  ;;  %v5998_v40 = vadd.f32 %v1269_v25, %v1165_v13  ;;  %v6014_v11 = vor.u32 %v3291_v57, %v3290_v38 }
 0x189   : > { %v1280_v47 = vpop.f32.mrb[78].mxu1 }
 0x18a   : > { %4564 = vmatmul.mubr.msk.bf16.vlgmr.msra.gmra.mrb[180].mxu0 %vm385_vm3, %v5671_v58  ;;  %v4380_v20 = vpop.f32.mrb[79].mxu1  ;;  %v6009_v41 = vadd.f32 %v1272_v35, %v1166_v36  ;;  %6953 = vst [vmem:[#allocation10_spill] sm:$0xff] %v6014_v11  ;;  %v2457_v58 = vrot.slane %v5744_v61, 1 }
 0x18b   : > { %4638 = vmatpush3.bf16.msra.mxu0 %v5100_v9  ;;  %4567 = vmatprep.mubr.msk.bf16.mxu0 %vm4996_vm2, %v6949_v15 }
 0x18c   : > { %4606 = vmatmul.mubr.msk.bf16.gmra.mrb[184].mxu1 %vm385_vm3, %v6003_v12  ;;  %4713 = vmatprep.subr.bf16.mxu0 %v6949_v15  ;;  %v6027_v36 = vsel %vm663_vm5, %v2455_v2, %v2457_v58 }
 0x18d   : > { %v1102_v10 = vpop.f32.mrb[76].mxu0  ;;  %4609 = vmatprep.mubr.msk.bf16.mxu1 %vm4996_vm2, %v6949_v15 }
 0x18e   : > { %v1167_v25 = vadd.f32 %v1102_v10, %v5787_v4  ;;  %v4341_v35 = vpop.f32.mrb[77].mxu0 }
 0x18f   : > { %v1105_v9 = vpop.f32.mrb[78].mxu0  ;;  %v1285_v22 = vpop.f32.mrb[80].mxu1 }
 0x190   : > { %v1168_v27 = vadd.f32 %v1105_v9, %v5797_v14  ;;  %v4342_v32 = vpop.f32.mrb[79].mxu0  ;;  %v4383_v13 = vpop.f32.mrb[81].mxu1  ;;  %v6024_v54 = vadd.f32 %v1277_v49, %v1167_v25  ;;  %v2459_v14 = vrot.slane %v5779_v60, 1 }
 0x191   : > { %v1288_v23 = vpop.f32.mrb[82].mxu1 }
 0x192   : > { %4568 = vmatmul.mubr.msk.bf16.gmra.mrb[184].mxu0 %vm385_vm3, %v5685_v42  ;;  %v4384_v6 = vpop.f32.mrb[83].mxu1  ;;  %v6031_v30 = vadd.f32 %v1280_v47, %v1168_v27  ;;  %v6045_v9 = vsel %vm663_vm5, %v2457_v58, %v2459_v14 }
 0x193   : > { %4571 = vmatprep.mubr.msk.bf16.mxu0 %vm4996_vm2, %v6949_v15 }
 0x194   : > { %4610 = vmatmul.mubr.msk.bf16.gmra.mrb[188].mxu1 %vm385_vm3, %v6027_v36 }
 0x195   : > { %v1110_v4 = vpop.f32.mrb[80].mxu0  ;;  %4613 = vmatprep.mubr.msk.bf16.mxu1 %vm4996_vm2, %v6949_v15 }
 0x196   : > { %v1169_v2 = vadd.f32 %v1110_v4, %v5819_v59  ;;  %v4345_v49 = vpop.f32.mrb[81].mxu0 }
 0x197   : > { %v1113_v38 = vpop.f32.mrb[82].mxu0  ;;  %v1293_v57 = vpop.f32.mrb[84].mxu1 }
 0x198   : > { %v1170_v47 = vadd.f32 %v1113_v38, %v5829_v62  ;;  %v4346_v20 = vpop.f32.mrb[83].mxu0  ;;  %v4387_v10 = vpop.f32.mrb[85].mxu1  ;;  %v6042_v25 = vadd.f32 %v1285_v22, %v1169_v2  ;;  %v2461_v62 = vrot.slane %v5811_v56, 1 }
 0x199   : > { %v1296_v35 = vpop.f32.mrb[86].mxu1 }
 0x19a   : > { %4572 = vmatmul.mubr.msk.bf16.gmra.mrb[188].mxu0 %vm385_vm3, %v5713_v63  ;;  %v4388_v27 = vpop.f32.mrb[87].mxu1  ;;  %v6049_v32 = vadd.f32 %v1288_v23, %v1170_v47  ;;  %v6063_v38 = vsel %vm663_vm5, %v2459_v14, %v2461_v62 }
 0x19b   : > { %4575 = vmatprep.mubr.msk.bf16.mxu0 %vm4996_vm2, %v6949_v15 }
 0x19c   : > { %4614 = vmatmul.mubr.msk.bf16.gmra.mrb[192].mxu1 %vm385_vm3, %v6045_v9 }
 0x19d   : > { %v1118_v59 = vpop.f32.mrb[84].mxu0  ;;  %4617 = vmatprep.mubr.msk.bf16.mxu1 %vm4996_vm2, %v6949_v15 }
 0x19e   : > { %v1171_v58 = vadd.f32 %v1118_v59, %v5851_v51  ;;  %v4349_v22 = vpop.f32.mrb[85].mxu0 }
 0x19f   : > { %v1121_v13 = vpop.f32.mrb[86].mxu0  ;;  %v1301_v63 = vpop.f32.mrb[88].mxu1 }
 0x1a0   : > { %v1172_v23 = vadd.f32 %v1121_v13, %v5861_v8  ;;  %v4350_v6 = vpop.f32.mrb[87].mxu0  ;;  %v4391_v4 = vpop.f32.mrb[89].mxu1  ;;  %v6060_v2 = vadd.f32 %v1293_v57, %v1171_v58  ;;  %v2463_v8 = vrot.slane %v5843_v39, 1 }
 0x1a1   : > { %v1304_v49 = vpop.f32.mrb[90].mxu1 }
 0x1a2   : > { %4576 = vmatmul.mubr.msk.bf16.gmra.mrb[192].mxu0 %vm385_vm3, %v5744_v61  ;;  %v4392_v47 = vpop.f32.mrb[91].mxu1  ;;  %v6067_v20 = vadd.f32 %v1296_v35, %v1172_v23  ;;  %v6081_v13 = vsel %vm663_vm5, %v2461_v62, %v2463_v8 }
 0x1a3   : > { %4579 = vmatprep.mubr.msk.bf16.mxu0 %vm4996_vm2, %v6949_v15 }
 0x1a4   : > { %4618 = vmatmul.mubr.msk.bf16.gmra.mrb[196].mxu1 %vm385_vm3, %v6063_v38 }
 0x1a5   : > { %v1126_v51 = vpop.f32.mrb[88].mxu0  ;;  %4621 = vmatprep.mubr.msk.bf16.mxu1 %vm4996_vm2, %v6949_v15 }
 0x1a6   : > { %v1173_v14 = vadd.f32 %v1126_v51, %v5883_v34  ;;  %v4353_v57 = vpop.f32.mrb[89].mxu0 }
 0x1a7   : > { %v1129_v10 = vpop.f32.mrb[90].mxu0  ;;  %v1309_v61 = vpop.f32.mrb[92].mxu1 }
 0x1a8   : > { %v1174_v35 = vadd.f32 %v1129_v10, %v5893_v43  ;;  %v4354_v27 = vpop.f32.mrb[91].mxu0  ;;  %v4395_v59 = vpop.f32.mrb[93].mxu1  ;;  %v6078_v58 = vadd.f32 %v1301_v63, %v1173_v14  ;;  %v2465_v43 = vrot.slane %v5875_v44, 1 }
 0x1a9   : > { %v1312_v22 = vpop.f32.mrb[94].mxu1 }
 0x1aa   : > { %4580 = vmatmul.mubr.msk.bf16.gmra.mrb[196].mxu0 %vm385_vm3, %v5779_v60  ;;  %v4396_v23 = vpop.f32.mrb[95].mxu1  ;;  %v6085_v6 = vadd.f32 %v1304_v49, %v1174_v35  ;;  %v6099_v10 = vsel %vm663_vm5, %v2463_v8, %v2465_v43 }
 0x1ab   : > { %4583 = vmatprep.mubr.msk.bf16.mxu0 %vm4996_vm2, %v6949_v15 }
 0x1ac   : > { %4622 = vmatmul.mubr.msk.bf16.gmra.mrb[200].mxu1 %vm385_vm3, %v6081_v13 }
 0x1ad   : > { %v1134_v34 = vpop.f32.mrb[92].mxu0  ;;  %4625 = vmatprep.mubr.msk.bf16.mxu1 %vm4996_vm2, %v6949_v15 }
 0x1ae   : > { %v1175_v62 = vadd.f32 %v1134_v34, %v5909_v21  ;;  %v4357_v63 = vpop.f32.mrb[93].mxu0 }
 0x1af   : > { %v1137_v4 = vpop.f32.mrb[94].mxu0  ;;  %v1317_v60 = vpop.f32.mrb[96].mxu1 }
 0x1b0   : > { %v1176_v49 = vadd.f32 %v1137_v4, %v5922_v7  ;;  %v4358_v47 = vpop.f32.mrb[95].mxu0  ;;  %v4399_v51 = vpop.f32.mrb[97].mxu1  ;;  %v6096_v14 = vadd.f32 %v1309_v61, %v1175_v62  ;;  %v6112_v7 = vrot.slane %v5904_v17, 1 }
 0x1b1   : > { %v1320_v57 = vpop.f32.mrb[98].mxu1 }
 0x1b2   : > { %4584 = vmatmul.mubr.msk.bf16.gmra.mrb[200].mxu0 %vm385_vm3, %v5811_v56  ;;  %v4400_v35 = vpop.f32.mrb[99].mxu1  ;;  %v6103_v27 = vadd.f32 %v1312_v22, %v1176_v49  ;;  %v6120_v4 = vsel %vm663_vm5, %v2465_v43, %v6112_v7 }
 0x1b3   : > { %4587 = vmatprep.mubr.msk.bf16.mxu0 %vm4996_vm2, %v6949_v15 }
 0x1b4   : > { %4626 = vmatmul.mubr.msk.bf16.gmra.mrb[204].mxu1 %vm385_vm3, %v6099_v10 }
 0x1b5   : > { %v1142_v21 = vpop.f32.mrb[96].mxu0  ;;  %4629 = vmatprep.mubr.msk.bf16.mxu1 %vm4996_vm2, %v6949_v15 }
 0x1b6   : > { %v1177_v8 = vadd.f32 %v1142_v21, %v5939_v16  ;;  %v4361_v61 = vpop.f32.mrb[97].mxu0 }
 0x1b7   : > { %v1145_v56 = vpop.f32.mrb[98].mxu0  ;;  %v1325_v59 = vpop.f32.mrb[100].mxu1 }
 0x1b8   : > { %v1178_v22 = vadd.f32 %v1145_v56, %v5947_v53  ;;  %v4362_v23 = vpop.f32.mrb[99].mxu0  ;;  %v4403_v34 = vpop.f32.mrb[101].mxu1  ;;  %v6116_v62 = vadd.f32 %v1317_v60, %v1177_v8  ;;  %v2469_v53 = vrot.slane %v5934_v45, 1  ;;  %v6955_v45 = vshll.u32 %v5685_v42, 16 }
 0x1b9   : > { %v1328_v63 = vpop.f32.mrb[102].mxu1 }
 0x1ba   : > { %4588 = vmatmul.mubr.msk.bf16.gmra.mrb[204].mxu0 %vm385_vm3, %v5843_v39  ;;  %v4404_v49 = vpop.f32.mrb[103].mxu1  ;;  %v6124_v47 = vadd.f32 %v1320_v57, %v1178_v22  ;;  %v6954_v57 = vshrl.u32 %v5685_v42, 16  ;;  %v2470_v23 = vsel %vm663_vm5, %v6112_v7, %v2469_v53  ;;  %v2759_v34 = vrot.slane %v6955_v45, 2 }
 0x1bb   : > { %4591 = vmatprep.mubr.msk.bf16.mxu0 %vm4996_vm2, %v6949_v15  ;;  %v2762_v49 = vrot.slane %v5726_v46, 2  ;;  %v2765_v45 = vrot.slane %v5791_v52, 1 }
 0x1bc   : > { %4630 = vmatmul.mubr.msk.bf16.gmra.mrb[208].mxu1 %vm385_vm3, %v6120_v4  ;;  %v2758_v35 = vrot.slane %v6954_v57, 1 }
 0x1bd   : > { %v1150_v16 = vpop.f32.mrb[100].mxu0  ;;  %4633 = vmatprep.mubr.msk.bf16.mxu1 %vm4996_vm2, %v6949_v15 }
 0x1be   : > { %v1179_v43 = vadd.f32 %v1150_v16, %v5959_v26  ;;  %v4365_v60 = vpop.f32.mrb[101].mxu0  ;;  %v2761_v26 = vrot.slane %v5757_v31, 1  ;;  %v2760_v42 = vor.u32 %v2759_v34, %v2758_v35 }
 0x1bf   : > { %v1153_v51 = vpop.f32.mrb[102].mxu0  ;;  %v1333_v39 = vpop.f32.mrb[104].mxu1 }
 0x1c0   : > { %v1180_v21 = vadd.f32 %v1153_v51, %v5963_v19  ;;  %v4366_v8 = vpop.f32.mrb[103].mxu0  ;;  %v4407_v61 = vpop.f32.mrb[105].mxu1  ;;  %v6137_v56 = vadd.f32 %v1325_v59, %v1179_v43  ;;  %v2763_v53 = vor.u32 %v2762_v49, %v2761_v26 }
 0x1c1   : > { %v1336_v22 = vpop.f32.mrb[106].mxu1 }
 0x1c2   : > { %4592 = vmatmul.mubr.msk.bf16.gmra.mrb[208].mxu0 %vm385_vm3, %v5875_v44  ;;  %v4408_v16 = vpop.f32.mrb[107].mxu1  ;;  %v6147_v19 = vadd.f32 %v1328_v63, %v1180_v21 }
 0x1c3   : > { %4595 = vmatprep.mubr.msk.bf16.mxu0 %vm4996_vm2, %v6949_v15  ;;  %v2766_v16 = vrot.slane %v5760_v18, 2 }
 0x1c4   : > { %4634 = vmatmul.mubr.msk.bf16.gmra.mrb[212].mxu1 %vm385_vm3, %v2470_v23  ;;  %v2764_v23 = vsel %vm980_vm7, %v2760_v42, %v2763_v53 }
 0x1c5   : > { %v1158_v59 = vpop.f32.mrb[104].mxu0  ;;  %4677 = vmatprep.mubr.msk.bf16.mxu1 %vm4996_vm2, %v6949_v15 }
 0x1c6   : > { %v1181_v43 = vadd.f32 %v1158_v59, %v5977_v55  ;;  %v4369_v60 = vpop.f32.mrb[105].mxu0 }
 0x1c7   : > { %v1161_v51 = vpop.f32.mrb[106].mxu0  ;;  %v1616_v57 = vpop.f32.mrb[108].mxu1 }
 0x1c8   : > { %v1182_v44 = vadd.f32 %v1161_v51, %v5984_v1  ;;  %v4370_v63 = vpop.f32.mrb[107].mxu0  ;;  %v4451_v21 = vpop.f32.mrb[109].mxu1  ;;  %v6156_v8 = vadd.f32 %v1333_v39, %v1181_v43  ;;  %v2767_v39 = vor.u32 %v2766_v16, %v2765_v45  ;;  %v2769_v51 = vrot.slane %v5823_v5, 1 }
 0x1c9   : > { %v1619_v61 = vpop.f32.mrb[110].mxu1 }
 0x1ca   : > { %4596 = vmatmul.mubr.msk.bf16.gmra.mrb[212].mxu0 %vm385_vm3, %v5904_v17  ;;  %v4452_v55 = vpop.f32.mrb[111].mxu1  ;;  %v6163_v35 = vadd.f32 %v1336_v22, %v1182_v44  ;;  %v2770_v44 = vrot.slane %v5794_v3, 2 }
 0x1cb   : > { %4639 = vmatprep.mubr.msk.bf16.mxu0 %vm4996_vm2, %v6949_v15 }
 0x1cc   : > { %4678 = vmatmul.mubr.msk.bf16.vlgmr.msra.gmra.mrb[216].mxu1 %vm385_vm3, %v2764_v23 }
 0x1cd   : > { %v1411_v1 = vpop.f32.mrb[108].mxu0  ;;  %4752 = vmatpush3.bf16.msra.mxu1 %v5415_v28  ;;  %4681 = vmatprep.mubr.msk.bf16.mxu1 %vm4996_vm2, %v6949_v15  ;;  %v2768_v28 = vsel %vm980_vm7, %v2763_v53, %v2767_v39  ;;  %v2771_v53 = vor.u32 %v2770_v44, %v2769_v51 }
 0x1ce   : > { %v1482_v34 = vadd.f32 %v1411_v1, %v5998_v40  ;;  %v4413_v26 = vpop.f32.mrb[109].mxu0  ;;  %4827 = vmatprep.subr.bf16.mxu1 %v6949_v15 }
 0x1cf   : > { %v1414_v17 = vpop.f32.mrb[110].mxu0  ;;  %v1624_v22 = vpop.f32.mrb[112].mxu1  ;;  %v2772_v1 = vsel %vm980_vm7, %v2767_v39, %v2771_v53  ;;  %v2774_v26 = vrot.slane %v5826_v29, 2 }
 0x1d0   : > { %v1483_v49 = vadd.f32 %v1414_v17, %v6009_v41  ;;  %v4414_v59 = vpop.f32.mrb[111].mxu0  ;;  %v4455_v42 = vpop.f32.mrb[113].mxu1  ;;  %v6174_v43 = vadd.f32 %v1616_v57, %v1482_v34  ;;  %v2773_v34 = vrot.slane %v5855_v0, 1 }
 0x1d1   : > { %v1627_v60 = vpop.f32.mrb[114].mxu1 }
 0x1d2   : > { %4640 = vmatmul.mubr.msk.bf16.vlgmr.msra.gmra.mrb[216].mxu0 %vm385_vm3, %v6003_v12  ;;  %v4456_v40 = vpop.f32.mrb[115].mxu1  ;;  %v6181_v63 = vadd.f32 %v1619_v61, %v1483_v49  ;;  %v2775_v39 = vor.u32 %v2774_v26, %v2773_v34 }
 0x1d3   : > { %4714 = vmatpush3.bf16.msra.mxu0 %v5291_v24  ;;  %4643 = vmatprep.mubr.msk.bf16.mxu0 %vm4996_vm2, %v6949_v15 }
 0x1d4   : > { %4682 = vmatmul.mubr.msk.bf16.gmra.mrb[220].mxu1 %vm385_vm3, %v2768_v28  ;;  %4789 = vmatprep.subr.bf16.mxu0 %v6949_v15  ;;  %v2776_v40 = vsel %vm980_vm7, %v2771_v53, %v2775_v39 }
 0x1d5   : > { %v1419_v41 = vpop.f32.mrb[112].mxu0  ;;  %4685 = vmatprep.mubr.msk.bf16.mxu1 %vm4996_vm2, %v6949_v15 }
 0x1d6   : > { %v1484_v57 = vadd.f32 %v1419_v41, %v6024_v54  ;;  %v4417_v12 = vpop.f32.mrb[113].mxu0  ;;  %v6956_v41 = vld [vmem:[#allocation5_spill] sm:$0xff] }
 0x1d7   : > { %v1422_v21 = vpop.f32.mrb[114].mxu0  ;;  %v1632_v61 = vpop.f32.mrb[116].mxu1  ;;  %v6957_v12 = vld [vmem:[#allocation4_spill] sm:$0xff] }
 0x1d8   : > { %v1485_v23 = vadd.f32 %v1422_v21, %v6031_v30  ;;  %v4418_v24 = vpop.f32.mrb[115].mxu0  ;;  %v4459_v45 = vpop.f32.mrb[117].mxu1  ;;  %v6192_v16 = vadd.f32 %v1624_v22, %v1484_v57  ;;  %v2777_v57 = vrot.slane %v6956_v41, 1  ;;  %v2778_v21 = vrot.slane %v6957_v12, 2 }
 0x1d9   : > { %v1635_v55 = vpop.f32.mrb[118].mxu1 }
 0x1da   : > { %4644 = vmatmul.mubr.msk.bf16.gmra.mrb[220].mxu0 %vm385_vm3, %v6027_v36  ;;  %v4460_v54 = vpop.f32.mrb[119].mxu1  ;;  %v6199_v17 = vadd.f32 %v1627_v60, %v1485_v23  ;;  %v2779_v53 = vor.u32 %v2778_v21, %v2777_v57 }
 0x1db   : > { %4647 = vmatprep.mubr.msk.bf16.mxu0 %vm4996_vm2, %v6949_v15 }
 0x1dc   : > { %4686 = vmatmul.mubr.msk.bf16.gmra.mrb[224].mxu1 %vm385_vm3, %v2772_v1 }
 0x1dd   : > { %v1427_v30 = vpop.f32.mrb[116].mxu0  ;;  %4689 = vmatprep.mubr.msk.bf16.mxu1 %vm4996_vm2, %v6949_v15 }
 0x1de   : > { %v1486_v22 = vadd.f32 %v1427_v30, %v6042_v25  ;;  %v4421_v49 = vpop.f32.mrb[117].mxu0  ;;  %v2780_v30 = vsel %vm980_vm7, %v2775_v39, %v2779_v53 }
 0x1df   : > { %v1430_v59 = vpop.f32.mrb[118].mxu0  ;;  %v1640_v42 = vpop.f32.mrb[120].mxu1 }
 0x1e0   : > { %v1487_v36 = vadd.f32 %v1430_v59, %v6049_v32  ;;  %v4422_v28 = vpop.f32.mrb[119].mxu0  ;;  %v4463_v60 = vpop.f32.mrb[121].mxu1  ;;  %v6208_v51 = vadd.f32 %v1632_v61, %v1486_v22  ;;  %v6958_v22 = vld [vmem:[#allocation7_spill] sm:$0xff]  ;;  %v6959_v59 = vld [vmem:[#allocation6_spill] sm:$0xff] }
 0x1e1   : > { %v1643_v44 = vpop.f32.mrb[122].mxu1  ;;  %v2781_v49 = vrot.slane %v6958_v22, 1 }
 0x1e2   : > { %4648 = vmatmul.mubr.msk.bf16.gmra.mrb[224].mxu0 %vm385_vm3, %v6045_v9  ;;  %v4464_v25 = vpop.f32.mrb[123].mxu1  ;;  %v6215_v23 = vadd.f32 %v1635_v55, %v1487_v36  ;;  %v2782_v36 = vrot.slane %v6959_v59, 2 }
 0x1e3   : > { %4651 = vmatprep.mubr.msk.bf16.mxu0 %vm4996_vm2, %v6949_v15 }
 0x1e4   : > { %4690 = vmatmul.mubr.msk.bf16.gmra.mrb[228].mxu1 %vm385_vm3, %v2776_v40  ;;  %v2783_v39 = vor.u32 %v2782_v36, %v2781_v49 }
 0x1e5   : > { %v1435_v32 = vpop.f32.mrb[120].mxu0  ;;  %4693 = vmatprep.mubr.msk.bf16.mxu1 %vm4996_vm2, %v6949_v15 }
 0x1e6   : > { %v1488_v61 = vadd.f32 %v1435_v32, %v6060_v2  ;;  %v4425_v24 = vpop.f32.mrb[121].mxu0 }
 0x1e7   : > { %v1438_v45 = vpop.f32.mrb[122].mxu0  ;;  %v1648_v1 = vpop.f32.mrb[124].mxu1  ;;  %v2785_v24 = vrot.slane %v5943_v50, 1 }
 0x1e8   : > { %v1489_v9 = vadd.f32 %v1438_v45, %v6067_v20  ;;  %v4426_v34 = vpop.f32.mrb[123].mxu0  ;;  %v4467_v55 = vpop.f32.mrb[125].mxu1  ;;  %v6224_v26 = vadd.f32 %v1640_v42, %v1488_v61  ;;  %v2784_v61 = vsel %vm980_vm7, %v2779_v53, %v2783_v39  ;;  %v6960_v45 = vld [vmem:[#allocation8_spill] sm:$0xff] }
 0x1e9   : > { %v1651_v54 = vpop.f32.mrb[126].mxu1 }
 0x1ea   : > { %4652 = vmatmul.mubr.msk.bf16.gmra.mrb[228].mxu0 %vm385_vm3, %v6063_v38  ;;  %v4468_v2 = vpop.f32.mrb[127].mxu1  ;;  %v6231_v28 = vadd.f32 %v1643_v44, %v1489_v9  ;;  %v2786_v9 = vrot.slane %v6960_v45, 2 }
 0x1eb   : > { %4655 = vmatprep.mubr.msk.bf16.mxu0 %vm4996_vm2, %v6949_v15 }
 0x1ec   : > { %4694 = vmatmul.mubr.msk.bf16.gmra.mrb[232].mxu1 %vm385_vm3, %v2780_v30  ;;  %v2787_v53 = vor.u32 %v2786_v9, %v2785_v24  ;;  %v6256_v30 = vld [vmem:[%s5097_s8 + $0x98] sm:$0xf] }
 0x1ed   : > { %v1443_v20 = vpop.f32.mrb[124].mxu0  ;;  %4697 = vmatprep.mubr.msk.bf16.mxu1 %vm4996_vm2, %v6949_v15 }
 0x1ee   : > { %v1490_v42 = vadd.f32 %v1443_v20, %v6078_v58  ;;  %v4429_v60 = vpop.f32.mrb[125].mxu0 }
 0x1ef   : > { %v1446_v40 = vpop.f32.mrb[126].mxu0  ;;  %v1656_v57 = vpop.f32.mrb[128].mxu1  ;;  %v2788_v60 = vsel %vm980_vm7, %v2783_v39, %v2787_v53 }
 0x1f0   : > { %v1491_v38 = vadd.f32 %v1446_v40, %v6085_v6  ;;  %v4430_v21 = vpop.f32.mrb[127].mxu0  ;;  %v4471_v44 = vpop.f32.mrb[129].mxu1  ;;  %v6240_v25 = vadd.f32 %v1648_v1, %v1490_v42  ;;  %v2792_v40 = vrot.slane %v2790_v48, 1 }
 0x1f1   : > { %v1659_v32 = vpop.f32.mrb[130].mxu1 }
 0x1f2   : > { %4656 = vmatmul.mubr.msk.bf16.gmra.mrb[232].mxu0 %vm385_vm3, %v6081_v13  ;;  %v4472_v58 = vpop.f32.mrb[131].mxu1  ;;  %v6247_v34 = vadd.f32 %v1651_v54, %v1491_v38  ;;  %v6268_v38 = vcombine.low %v6256_v30, %v6256_v30 }
 0x1f3   : > { %4659 = vmatprep.mubr.msk.bf16.mxu0 %vm4996_vm2, %v6949_v15 }
 0x1f4   : > { %4698 = vmatmul.mubr.msk.bf16.gmra.mrb[236].mxu1 %vm385_vm3, %v2784_v61 }
 0x1f5   : > { %v1451_v6 = vpop.f32.mrb[128].mxu0  ;;  %4701 = vmatprep.mubr.msk.bf16.mxu1 %vm4996_vm2, %v6949_v15 }
 0x1f6   : > { %v1492_v1 = vadd.f32 %v1451_v6, %v6096_v14  ;;  %v4433_v55 = vpop.f32.mrb[129].mxu0  ;;  %v2795_v14 = vrot.slane %v2793_v37, 2  ;;  %v2799_v37 = vshrl.u32 %v6268_v38, 16 }
 0x1f7   : > { %v1454_v49 = vpop.f32.mrb[130].mxu0  ;;  %v1664_v13 = vpop.f32.mrb[132].mxu1 }
 0x1f8   : > { %v1493_v54 = vadd.f32 %v1454_v49, %v6103_v27  ;;  %v4434_v36 = vpop.f32.mrb[131].mxu0  ;;  %v4475_v2 = vpop.f32.mrb[133].mxu1  ;;  %v6259_v20 = vadd.f32 %v1656_v57, %v1492_v1  ;;  %v2796_v48 = vor.u32 %v2795_v14, %v2792_v40  ;;  %v2802_v57 = vshll.u32 %v6268_v38, 16 }
 0x1f9   : > { %v1667_v42 = vpop.f32.mrb[134].mxu1  ;;  %v2801_v49 = vrot.slane %v2799_v37, 1 }
 0x1fa   : > { %4660 = vmatmul.mubr.msk.bf16.gmra.mrb[236].mxu0 %vm385_vm3, %v6099_v10  ;;  %v4476_v27 = vpop.f32.mrb[135].mxu1  ;;  %v6272_v21 = vadd.f32 %v1659_v32, %v1493_v54  ;;  %v2797_v55 = vsel %vm980_vm7, %v2787_v53, %v2796_v48  ;;  %v2804_v54 = vrot.slane %v2802_v57, 2 }
 0x1fb   : > { %4663 = vmatprep.mubr.msk.bf16.mxu0 %vm4996_vm2, %v6949_v15 }
 0x1fc   : > { %4702 = vmatmul.mubr.msk.bf16.gmra.mrb[240].mxu1 %vm385_vm3, %v2788_v60  ;;  %v2805_v53 = vor.u32 %v2804_v54, %v2801_v49 }
 0x1fd   : > { %v1459_v39 = vpop.f32.mrb[132].mxu0  ;;  %4705 = vmatprep.mubr.msk.bf16.mxu1 %vm4996_vm2, %v6949_v15 }
 0x1fe   : > { %v1494_v44 = vadd.f32 %v1459_v39, %v6116_v62  ;;  %v4437_v10 = vpop.f32.mrb[133].mxu0  ;;  %v2625_v62 = vrot.slane %v5981_v33, 1 }
 0x1ff   : > { %v1462_v61 = vpop.f32.mrb[134].mxu0  ;;  %v1672_v32 = vpop.f32.mrb[136].mxu1 }
 0x200   : > { %v1495_v24 = vadd.f32 %v1462_v61, %v6124_v47  ;;  %v4438_v9 = vpop.f32.mrb[135].mxu0  ;;  %v4479_v58 = vpop.f32.mrb[137].mxu1  ;;  %v6283_v6 = vadd.f32 %v1664_v13, %v1494_v44  ;;  %v2806_v44 = vsel %vm980_vm7, %v2796_v48, %v2805_v53  ;;  %v6313_v61 = vld [vmem:[%s5097_s8 + $0x58] sm:$0xff]  }
 0x201   : > { %v1675_v1 = vpop.f32.mrb[138].mxu1  ;;  %v2958_v48 = vrot.slane %v6313_v61, 2 }
 0x202   : > { %4664 = vmatmul.mubr.msk.bf16.gmra.mrb[240].mxu0 %vm385_vm3, %v6120_v4  ;;  %v4480_v36 = vpop.f32.mrb[139].mxu1  ;;  %v6288_v2 = vadd.f32 %v1667_v42, %v1495_v24  ;;  %v2626_v4 = vsel %vm663_vm5, %v6112_v7, %v2625_v62  ;;  %v2627_v7 = vrot.slane %v6268_v38, 1 }
 0x203   : > { %4667 = vmatprep.mubr.msk.bf16.mxu0 %vm4996_vm2, %v6949_v15 }
 0x204   : > { %4706 = vmatmul.mubr.msk.bf16.gmra.mrb[244].mxu1 %vm385_vm3, %v2797_v55  ;;  %v2628_v55 = vsel %vm663_vm5, %v2625_v62, %v2627_v7  ;;  %v4947_v62 = vld [vmem:[%s5097_s8 + $0x50] sm:$0xff]  }
 0x205   : > { %v1467_v47 = vpop.f32.mrb[136].mxu0  ;;  %4709 = vmatprep.mubr.msk.bf16.mxu1 %vm4996_vm2, %v6949_v15 }
 0x206   : > { %v1496_v13 = vadd.f32 %v1467_v47, %v6137_v56  ;;  %v4441_v60 = vpop.f32.mrb[137].mxu0 }
 0x207   : > { %v1470_v40 = vpop.f32.mrb[138].mxu0  ;;  %v1680_v42 = vpop.f32.mrb[140].mxu1 }
 0x208   : > { %v1497_v14 = vadd.f32 %v1470_v40, %v6147_v19  ;;  %v4442_v27 = vpop.f32.mrb[139].mxu0  ;;  %v4483_v39 = vpop.f32.mrb[141].mxu1  ;;  %v6300_v37 = vadd.f32 %v1672_v32, %v1496_v13  ;;  %v6317_v32 = vld [vmem:[%s5097_s8 + $0x60] sm:$0xff]  }
 0x209   : > { %v1683_v57 = vpop.f32.mrb[142].mxu1  ;;  %v2960_v24 = vrot.slane %v6317_v32, 2  ;;  %v6962_v27 = vld [vmem:[#allocation3_spill] sm:$0xff] }
 0x20a   : > { %4668 = vmatmul.mubr.msk.bf16.gmra.mrb[244].mxu0 %vm385_vm3, %v2626_v4  ;;  %v4484_v56 = vpop.f32.mrb[143].mxu1  ;;  %v6304_v10 = vadd.f32 %v1675_v1, %v1497_v14  ;;  %v2957_v4 = vrot.slane %v4947_v62, 2  ;;  %v6342_v14 = vpop.permute.xlu0 %1925  ;;  %v6348_v39 = vld [vmem:[%s5097_s8 + $0x68] sm:$0xff]  }
 0x20b   : > { %4671 = vmatprep.mubr.msk.bf16.mxu0 %vm4996_vm2, %v6949_v15  ;;  %v2961_v60 = vsel %vm1185_vm6, %v2958_v48, %v2960_v24  ;;  %6961 = vst [vmem:[#allocation5_spill] sm:$0xff] %v6342_v14 }
 0x20c   : > { %4710 = vmatmul.mubr.msk.bf16.gmra.mrb[248].mxu1 %vm385_vm3, %v2806_v44 }
 0x20d   : > { %v1475_v19 = vpop.f32.mrb[140].mxu0  ;;  %4753 = vmatprep.mubr.msk.bf16.mxu1 %vm4996_vm2, %v6949_v15 }
 0x20e   : > { %v1498_v9 = vadd.f32 %v1475_v19, %v6156_v8  ;;  %v4445_v58 = vpop.f32.mrb[141].mxu0  ;;  %v2959_v19 = vsel %vm1185_vm6, %v2957_v4, %v2958_v48  ;;  %v6963_v48 = vld [vmem:[#allocation2_spill] sm:$0xff]  ;;  %v6363_v4 = vpop.permute.xlu0 %1930 }
 0x20f   : > { %v1478_v1 = vpop.f32.mrb[142].mxu0  ;;  %v6322_v49 = vpop.f32.mrb[144].mxu1  ;;  %6964 = vst [vmem:[#allocation4_spill] sm:$0xff] %v6363_v4 }
 0x210   : > { %v1499_v54 = vadd.f32 %v1478_v1, %v6163_v35  ;;  %v4446_v36 = vpop.f32.mrb[143].mxu0  ;;  %v4527_v47 = vpop.f32.mrb[145].mxu1  ;;  %v6325_v53 = vadd.f32 %v1680_v42, %v1498_v9  ;;  %v6340_v42 = vld [vmem:[%s6910_s2] ss:$0 sm:$0xff] }
 0x211   : > { %v6327_v13 = vpop.f32.mrb[146].mxu1 }
 0x212   : > { %4672 = vmatmul.mubr.msk.bf16.gmra.mrb[248].mxu0 %vm385_vm3, %v2628_v55  ;;  %v4528_v8 = vpop.f32.mrb[147].mxu1  ;;  %v6331_v40 = vadd.f32 %v1683_v57, %v1499_v54  ;;  %v2962_v57 = vrot.slane %v6348_v39, 2 }
 0x213   : > { %4715 = vmatprep.mubr.msk.bf16.mxu0 %vm4996_vm2, %v6949_v15 }
 0x214   : > { %4754 = vmatmul.mubr.msk.bf16.vlgmr.msra.gmra.mrb[252].mxu1 %vm385_vm3, %v2961_v60  ;;  %v2963_v47 = vsel %vm1185_vm6, %v2960_v24, %v2962_v57  ;;  %v6373_v24 = vld [vmem:[%s5097_s8 + $0x70] sm:$0xff]  }
 0x215   : > { %v1791_v35 = vpop.f32.mrb[144].mxu0  ;;  %4828 = vmatpush3.bf16.msra.mxu1 %v6962_v27  ;;  %4757 = vmatprep.mubr.msk.bf16.mxu1 %vm4996_vm2, %v6949_v15  ;;  %v6368_v27 = vpop.permute.xlu1 %1935 }
 0x216   : > { %v1862_v44 = vadd.f32 %v1791_v35, %v6174_v43  ;;  %v4489_v56 = vpop.f32.mrb[145].mxu0  ;;  %6965 = vst [vmem:[#allocation7_spill] sm:$0xff] %v6368_v27 }
 0x217   : > { %v1794_v7 = vpop.f32.mrb[146].mxu0  ;;  %v6353_v9 = vpop.f32.mrb[148].mxu1 }
 0x218   : > { %v1887_v58 = vadd.f32 %v6340_v42, %v1862_v44  ;;  %v1863_v1 = vadd.f32 %v1794_v7, %v6181_v63  ;;  %v4490_v55 = vpop.f32.mrb[147].mxu0  ;;  %v4531_v54 = vpop.f32.mrb[149].mxu1  ;;  %v2964_v44 = vrot.slane %v6373_v24, 2 }
 0x219   : > { %v6357_v36 = vpop.f32.mrb[150].mxu1 }
 0x21a   : > { %v1905_v8 = vmax.f32 %v1887_v58, 0.0  ;;  %v1888_v43 = vadd.f32 %v6340_v42, %v1863_v1  ;;  %4716 = vmatmul.mubr.msk.bf16.vlgmr.msra.gmra.mrb[252].mxu0 %vm385_vm3, %v2959_v19  ;;  %v4532_v62 = vpop.f32.mrb[151].mxu1 }
 0x21b   : > { %4790 = vmatpush3.bf16.msra.mxu0 %v6963_v48  ;;  %4719 = vmatprep.mubr.msk.bf16.mxu0 %vm4996_vm2, %v6949_v15 }
 0x21c   : > { %v1906_v63 = vmax.f32 %v1888_v43, 0.0  ;;  %4758 = vmatmul.mubr.msk.bf16.gmra.mrb[0].mxu1 %vm385_vm3, %v2963_v47  ;;  %v2013_v56 = vmul.f32 %v6342_v14, %v1905_v8  ;;  %v2965_v8 = vsel %vm1185_vm6, %v2962_v57, %v2964_v44  ;;  %v6397_v57 = vld [vmem:[%s5097_s8 + $0x78] sm:$0xff]  }
 0x21d   : > { %v1799_v35 = vpop.f32.mrb[148].mxu0  ;;  %4761 = vmatprep.mubr.msk.bf16.mxu1 %vm4996_vm2, %v6949_v15 }
 0x21e   : > { %v2014_v7 = vmul.f32 %v6363_v4, %v1906_v63  ;;  %v1864_v19 = vadd.f32 %v1799_v35, %v6192_v16  ;;  %v4493_v58 = vpop.f32.mrb[149].mxu0  ;;  %v6388_v35 = vpop.permute.xlu1 %1940 }
 0x21f   : > { %v1802_v1 = vpop.f32.mrb[150].mxu0  ;;  %v6379_v55 = vpop.f32.mrb[152].mxu1  ;;  %6966 = vst [vmem:[#allocation6_spill] sm:$0xff] %v6388_v35 }
 0x220   : > { %v2031_v54 = vadd.f32 %v2014_v7, %v2013_v56  ;;  %v1889_v43 = vadd.f32 %v6340_v42, %v1864_v19  ;;  %v1865_v62 = vadd.f32 %v1802_v1, %v6199_v17  ;;  %v4494_v48 = vpop.f32.mrb[151].mxu0  ;;  %v4535_v11 = vpop.f32.mrb[153].mxu1  ;;  %v2966_v7 = vrot.slane %v6397_v57, 2 }
 0x221   : > { %v6383_v50 = vpop.f32.mrb[154].mxu1  ;;  %v6406_v4 = vpop.permute.xlu0 %1945 }
 0x222   : > { %v1907_v14 = vmax.f32 %v1889_v43, 0.0  ;;  %v1890_v63 = vadd.f32 %v6340_v42, %v1865_v62  ;;  %4720 = vmatmul.mubr.msk.bf16.gmra.mrb[0].mxu0 %vm385_vm3, %v2961_v60  ;;  %v4536_v16 = vpop.f32.mrb[155].mxu1  ;;  %6967 = vst [vmem:[#allocation3_spill] sm:$0xff] %v6406_v4 }
 0x223   : > { %4723 = vmatprep.mubr.msk.bf16.mxu0 %vm4996_vm2, %v6949_v15 }
 0x224   : > { %v1908_v56 = vmax.f32 %v1890_v63, 0.0  ;;  %v2015_v17 = vmul.f32 %v6368_v27, %v1907_v14  ;;  %4762 = vmatmul.mubr.msk.bf16.gmra.mrb[4].mxu1 %vm385_vm3, %v2965_v8 }
 0x225   : > { %v1807_v11 = vpop.f32.mrb[152].mxu0  ;;  %4765 = vmatprep.mubr.msk.bf16.mxu1 %vm4996_vm2, %v6949_v15 }
 0x226   : > { %v2032_v60 = vadd.f32 %v2031_v54, %v2015_v17  ;;  %v2016_v19 = vmul.f32 %v6388_v35, %v1908_v56  ;;  %v1866_v58 = vadd.f32 %v1807_v11, %v6208_v51  ;;  %v4497_v1 = vpop.f32.mrb[153].mxu0  ;;  %v2967_v54 = vsel %vm1185_vm6, %v2964_v44, %v2966_v7  ;;  %v6413_v11 = vpop.permute.xlu1 %1950  ;;  %v6422_v44 = vld [vmem:[%s5097_s8 + $0x80] sm:$0xff]  }
 0x227   : > { %v1810_v43 = vpop.f32.mrb[154].mxu0  ;;  %v6402_v62 = vpop.f32.mrb[156].mxu1  ;;  %6969 = vst [vmem:[#allocation11_spill] sm:$0xff] %v6413_v11 }
 0x228   : > { %v2033_v14 = vadd.f32 %v2032_v60, %v2016_v19  ;;  %v1891_v48 = vadd.f32 %v6340_v42, %v1866_v58  ;;  %v1867_v63 = vadd.f32 %v1810_v43, %v6215_v23  ;;  %v4498_v16 = vpop.f32.mrb[155].mxu0  ;;  %v4539_v27 = vpop.f32.mrb[157].mxu1  ;;  %v2968_v19 = vrot.slane %v6422_v44, 2 }
 0x229   : > { %v6408_v45 = vpop.f32.mrb[158].mxu1  ;;  %v6431_v35 = vpop.permute.xlu0 %1955 }
 0x22a   : > { %6968 = vst [vmem:[#allocation2_spill] sm:$0xff] %v6408_v45  ;;  %v1909_v56 = vmax.f32 %v1891_v48, 0.0  ;;  %v1892_v51 = vadd.f32 %v6340_v42, %v1867_v63  ;;  %4724 = vmatmul.mubr.msk.bf16.gmra.mrb[4].mxu0 %vm385_vm3, %v2963_v47  ;;  %v4540_v17 = vpop.f32.mrb[159].mxu1  ;;  %6970 = vst [vmem:[#allocation12_spill] sm:$0xff] %v6431_v35 }
 0x22b   : > { %4727 = vmatprep.mubr.msk.bf16.mxu0 %vm4996_vm2, %v6949_v15 }
 0x22c   : > { %v1910_v23 = vmax.f32 %v1892_v51, 0.0  ;;  %v2017_v27 = vmul.f32 %v6406_v4, %v1909_v56  ;;  %4766 = vmatmul.mubr.msk.bf16.gmra.mrb[8].mxu1 %vm385_vm3, %v2967_v54 }
 0x22d   : > { %v1815_v60 = vpop.f32.mrb[156].mxu0  ;;  %4769 = vmatprep.mubr.msk.bf16.mxu1 %vm4996_vm2, %v6949_v15 }
 0x22e   : > { %v2034_v47 = vadd.f32 %v2033_v14, %v2017_v27  ;;  %v2018_v58 = vmul.f32 %v6413_v11, %v1910_v23  ;;  %v1868_v1 = vadd.f32 %v1815_v60, %v6224_v26  ;;  %v4501_v43 = vpop.f32.mrb[157].mxu0  ;;  %v2969_v14 = vsel %vm1185_vm6, %v2966_v7, %v2968_v19  ;;  %v6438_v60 = vpop.permute.xlu1 %1960  ;;  %v6447_v7 = vld [vmem:[%s5097_s8 + $0x88] sm:$0xff]  }
 0x22f   : > { %v1818_v48 = vpop.f32.mrb[158].mxu0  ;;  %v6427_v63 = vpop.f32.mrb[160].mxu1  ;;  %6972 = vst [vmem:[#allocation14_spill] sm:$0xff] %v6438_v60 }
 0x230   : > { %v2035_v16 = vadd.f32 %v2034_v47, %v2018_v58  ;;  %v1893_v56 = vadd.f32 %v6340_v42, %v1868_v1  ;;  %v1869_v51 = vadd.f32 %v1818_v48, %v6231_v28  ;;  %v4502_v17 = vpop.f32.mrb[159].mxu0  ;;  %v4543_v4 = vpop.f32.mrb[161].mxu1  ;;  %v2970_v58 = vrot.slane %v6447_v7, 2 }
 0x231   : > { %v6433_v45 = vpop.f32.mrb[162].mxu1  ;;  %v6456_v11 = vpop.permute.xlu0 %1965 }
 0x232   : > { %6971 = vst [vmem:[#allocation13_spill] sm:$0xff] %v6433_v45  ;;  %v1911_v23 = vmax.f32 %v1893_v56, 0.0  ;;  %v1894_v26 = vadd.f32 %v6340_v42, %v1869_v51  ;;  %4728 = vmatmul.mubr.msk.bf16.gmra.mrb[8].mxu0 %vm385_vm3, %v2965_v8  ;;  %v4544_v27 = vpop.f32.mrb[163].mxu1  ;;  %6973 = vst [vmem:[#allocation15_spill] sm:$0xff] %v6456_v11 }
 0x233   : > { %4731 = vmatprep.mubr.msk.bf16.mxu0 %vm4996_vm2, %v6949_v15 }
 0x234   : > { %v1912_v28 = vmax.f32 %v1894_v26, 0.0  ;;  %v2019_v4 = vmul.f32 %v6431_v35, %v1911_v23  ;;  %4770 = vmatmul.mubr.msk.bf16.gmra.mrb[12].mxu1 %vm385_vm3, %v2969_v14 }
 0x235   : > { %v1823_v47 = vpop.f32.mrb[160].mxu0  ;;  %4773 = vmatprep.mubr.msk.bf16.mxu1 %vm4996_vm2, %v6949_v15 }
 0x236   : > { %v2036_v8 = vadd.f32 %v2035_v16, %v2019_v4  ;;  %v2020_v1 = vmul.f32 %v6438_v60, %v1912_v28  ;;  %v1870_v43 = vadd.f32 %v1823_v47, %v6240_v25  ;;  %v4505_v48 = vpop.f32.mrb[161].mxu0  ;;  %v2971_v16 = vsel %vm1185_vm6, %v2968_v19, %v2970_v58  ;;  %v6463_v47 = vpop.permute.xlu1 %1970 }
 0x237   : > { %v1826_v56 = vpop.f32.mrb[162].mxu0  ;;  %v6452_v51 = vpop.f32.mrb[164].mxu1  ;;  %6975 = vst [vmem:[#allocation17_spill] sm:$0xff] %v6463_v47  ;;  %v6472_v19 = vrot.slane %v5981_v33, 2 }
 0x238   : > { %v2037_v17 = vadd.f32 %v2036_v8, %v2020_v1  ;;  %v1895_v23 = vadd.f32 %v6340_v42, %v1870_v43  ;;  %v1871_v26 = vadd.f32 %v1826_v56, %v6247_v34  ;;  %v4506_v27 = vpop.f32.mrb[163].mxu0  ;;  %v4547_v35 = vpop.f32.mrb[165].mxu1  ;;  %v2076_v1 = vld [vmem:[%s5097_s8 + $0x9c] sm:$0xf] }
 0x239   : > { %v6458_v45 = vpop.f32.mrb[166].mxu1  ;;  %v6482_v60 = vcombine.low %v6256_v30, %v2076_v1 }
 0x23a   : > { %6974 = vst [vmem:[#allocation16_spill] sm:$0xff] %v6458_v45  ;;  %v1913_v28 = vmax.f32 %v1895_v23, 0.0  ;;  %v1896_v25 = vadd.f32 %v6340_v42, %v1871_v26  ;;  %4732 = vmatmul.mubr.msk.bf16.gmra.mrb[12].mxu0 %vm385_vm3, %v2967_v54  ;;  %v4548_v4 = vpop.f32.mrb[167].mxu1  ;;  %v6484_v45 = vpop.permute.xlu0 %1975 }
 0x23b   : > { %4735 = vmatprep.mubr.msk.bf16.mxu0 %vm4996_vm2, %v6949_v15  ;;  %6976 = vst [vmem:[#allocation18_spill] sm:$0xff] %v6484_v45 }
 0x23c   : > { %v1914_v34 = vmax.f32 %v1896_v25, 0.0  ;;  %v2021_v35 = vmul.f32 %v6456_v11, %v1913_v28  ;;  %4774 = vmatmul.mubr.msk.bf16.gmra.mrb[16].mxu1 %vm385_vm3, %v2971_v16 }
 0x23d   : > { %v1831_v8 = vpop.f32.mrb[164].mxu0  ;;  %4777 = vmatprep.mubr.msk.bf16.mxu1 %vm4996_vm2, %v6949_v15 }
 0x23e   : > { %v2038_v54 = vadd.f32 %v2037_v17, %v2021_v35  ;;  %v2022_v43 = vmul.f32 %v6463_v47, %v1914_v34  ;;  %v1872_v48 = vadd.f32 %v1831_v8, %v6259_v20  ;;  %v4509_v56 = vpop.f32.mrb[165].mxu0  ;;  %v2973_v20 = vsel %vm1185_vm6, %v2970_v58, %v6472_v19 }
 0x23f   : > { %v1834_v23 = vpop.f32.mrb[166].mxu0  ;;  %v6477_v26 = vpop.f32.mrb[168].mxu1  ;;  %v3130_v58 = vrot.slane %v6482_v60, 2 }
 0x240   : > { %v2039_v27 = vadd.f32 %v2038_v54, %v2022_v43  ;;  %v1897_v28 = vadd.f32 %v6340_v42, %v1872_v48  ;;  %v1873_v25 = vadd.f32 %v1834_v23, %v6272_v21  ;;  %v4510_v4 = vpop.f32.mrb[167].mxu0  ;;  %v4551_v11 = vpop.f32.mrb[169].mxu1 }
 0x241   : > { %v6486_v17 = vpop.f32.mrb[170].mxu1  ;;  %v6492_v54 = vpop.permute.xlu1 %1980 }
 0x242   : > { %v1915_v34 = vmax.f32 %v1897_v28, 0.0  ;;  %v1898_v35 = vadd.f32 %v6340_v42, %v1873_v25  ;;  %4736 = vmatmul.mubr.msk.bf16.gmra.mrb[16].mxu0 %vm385_vm3, %v2969_v14  ;;  %v4552_v8 = vpop.f32.mrb[171].mxu1  ;;  %6977 = vst [vmem:[#allocation19_spill] sm:$0xff] %v6492_v54 }
 0x243   : > { %4739 = vmatprep.mubr.msk.bf16.mxu0 %vm4996_vm2, %v6949_v15  ;;  %v6507_v8 = vpop.permute.xlu0 %1985 }
 0x244   : > { %v1916_v30 = vmax.f32 %v1898_v35, 0.0  ;;  %v2023_v21 = vmul.f32 %v6484_v45, %v1915_v34  ;;  %4778 = vmatmul.mubr.msk.bf16.gmra.mrb[20].mxu1 %vm385_vm3, %v2973_v20  ;;  %6978 = vst [vmem:[#allocation20_spill] sm:$0xff] %v6507_v8 }
 0x245   : > { %v1839_v11 = vpop.f32.mrb[168].mxu0  ;;  %4781 = vmatprep.mubr.msk.bf16.mxu1 %vm4996_vm2, %v6949_v15 }
 0x246   : > { %v2040_v1 = vadd.f32 %v2039_v27, %v2023_v21  ;;  %v2024_v14 = vmul.f32 %v6492_v54, %v1916_v30  ;;  %v1874_v43 = vadd.f32 %v1839_v11, %v6283_v6  ;;  %v4513_v48 = vpop.f32.mrb[169].mxu0  ;;  %v3131_v27 = vsel %vm1185_vm6, %v6472_v19, %v3130_v58  ;;  %v6514_v30 = vld [vmem:[%s5097_s8 + $0xa0] ss:$0 sps:$4 sm:$0x77]  }
 0x247   : > { %v1842_v56 = vpop.f32.mrb[170].mxu0  ;;  %v6503_v23 = vpop.f32.mrb[172].mxu1  ;;  %v3132_v48 = vrot.slane %v6514_v30, 2 }
 0x248   : > { %v2041_v28 = vadd.f32 %v2040_v1, %v2024_v14  ;;  %v1899_v25 = vadd.f32 %v6340_v42, %v1874_v43  ;;  %v1875_v4 = vadd.f32 %v1842_v56, %v6288_v2  ;;  %v4514_v34 = vpop.f32.mrb[171].mxu0  ;;  %v4555_v35 = vpop.f32.mrb[173].mxu1 }
 0x249   : > { %v6509_v45 = vpop.f32.mrb[174].mxu1  ;;  %v6518_v1 = vpop.permute.xlu1 %1990 }
 0x24a   : > { %v1917_v6 = vmax.f32 %v1899_v25, 0.0  ;;  %v1900_v21 = vadd.f32 %v6340_v42, %v1875_v4  ;;  %4740 = vmatmul.mubr.msk.bf16.gmra.mrb[20].mxu0 %vm385_vm3, %v2971_v16  ;;  %v4556_v11 = vpop.f32.mrb[175].mxu1  ;;  %v6533_v54 = vpop.permute.xlu0 %1995 }
 0x24b   : > { %4743 = vmatprep.mubr.msk.bf16.mxu0 %vm4996_vm2, %v6949_v15 }
 0x24c   : > { %v1918_v2 = vmax.f32 %v1900_v21, 0.0  ;;  %v2025_v14 = vmul.f32 %v6507_v8, %v1917_v6  ;;  %4782 = vmatmul.mubr.msk.bf16.gmra.mrb[24].mxu1 %vm385_vm3, %v3131_v27 }
 0x24d   : > { %v1847_v43 = vpop.f32.mrb[172].mxu0  ;;  %4785 = vmatprep.mubr.msk.bf16.mxu1 %vm4996_vm2, %v6949_v15 }
 0x24e   : > { %v2042_v56 = vadd.f32 %v2041_v28, %v2025_v14  ;;  %v2026_v16 = vmul.f32 %v6518_v1, %v1918_v2  ;;  %v1876_v25 = vadd.f32 %v1847_v43, %v6300_v37  ;;  %v4517_v4 = vpop.f32.mrb[173].mxu0  ;;  %v3133_v28 = vsel %vm1185_vm6, %v3130_v58, %v3132_v48  ;;  %v6540_v43 = vpop.permute.xlu1 %2000 }
 0x24f   : > { %v1850_v34 = vpop.f32.mrb[174].mxu0  ;;  %v6529_v35 = vpop.f32.mrb[176].mxu1  ;;  %v3462_v58 = vrot.slane %v6313_v61, 3  ;;  %v3264_v48 = vrot.slane %v5726_v46, 3 }
 0x250   : > { %v2043_v21 = vadd.f32 %v2042_v56, %v2026_v16  ;;  %v1901_v6 = vadd.f32 %v6340_v42, %v1876_v25  ;;  %v1877_v27 = vadd.f32 %v1850_v34, %v6304_v10  ;;  %v4518_v11 = vpop.f32.mrb[175].mxu0  ;;  %v4559_v8 = vpop.f32.mrb[177].mxu1  ;;  %v2974_v10 = vrot.slane %v6268_v38, 2 }
 0x251   : > { %v6535_v47 = vpop.f32.mrb[178].mxu1  ;;  %v3266_v11 = vrot.slane %v5791_v52, 2 }
 0x252   : > { %v1919_v2 = vmax.f32 %v1901_v6, 0.0  ;;  %v1902_v37 = vadd.f32 %v6340_v42, %v1877_v27  ;;  %4744 = vmatmul.mubr.msk.bf16.gmra.mrb[24].mxu0 %vm385_vm3, %v2973_v20  ;;  %v4560_v14 = vpop.f32.mrb[179].mxu1  ;;  %v3463_v20 = vrot.slane %v6317_v32, 3  ;;  %v3263_v6 = vrot.slane %v5757_v31, 2 }
 0x253   : > { %4747 = vmatprep.mubr.msk.bf16.mxu0 %vm4996_vm2, %v6949_v15  ;;  %v3267_v27 = vrot.slane %v5760_v18, 3  ;;  %v2975_v61 = vsel %vm1185_vm6, %v6472_v19, %v2974_v10 }
 0x254   : > { %v1920_v8 = vmax.f32 %v1902_v37, 0.0  ;;  %v2027_v56 = vmul.f32 %v6533_v54, %v1919_v2  ;;  %4786 = vmatmul.mubr.msk.bf16.gmra.mrb[28].mxu1 %vm385_vm3, %v3133_v28  ;;  %v3464_v31 = vsel %vm1707_vm9, %v3462_v58, %v3463_v20  ;;  %v3265_v19 = vor.u32 %v3264_v48, %v3263_v6 }
 0x255   : > { %v1855_v16 = vpop.f32.mrb[176].mxu0  ;;  %4829 = vmatprep.mubr.msk.bf16.mxu1 %vm4996_vm2, %v6949_v15  ;;  %v3268_v10 = vor.u32 %v3267_v27, %v3266_v11  ;;  %v3271_v27 = vrot.slane %v5794_v3, 3  ;;  %v3270_v11 = vrot.slane %v5823_v5, 2 }
 0x256   : > { %v2044_v25 = vadd.f32 %v2043_v21, %v2027_v56  ;;  %v2028_v4 = vmul.f32 %v6540_v43, %v1920_v8  ;;  %v1878_v38 = vadd.f32 %v1855_v16, %v6325_v53  ;;  %v4521_v34 = vpop.f32.mrb[177].mxu0  ;;  %v6561_v53 = vpop.permute.xlu0 %2005 }
 0x257   : > { %v1858_v28 = vpop.f32.mrb[178].mxu0  ;;  %v2532_v2 = vpop.f32.mrb[180].mxu1  ;;  %v3269_v6 = vsel %vm1502_vm8, %v3265_v19, %v3268_v10  ;;  %v3272_v3 = vor.u32 %v3271_v27, %v3270_v11  ;;  %v3278_v27 = vrot.slane %v6956_v41, 2 }
 0x258   : > { %v2045_v32 = vadd.f32 %v2044_v25, %v2028_v4  ;;  %v1903_v46 = vadd.f32 %v6340_v42, %v1878_v38  ;;  %v1879_v21 = vadd.f32 %v1858_v28, %v6331_v40  ;;  %v4522_v37 = vpop.f32.mrb[179].mxu0  ;;  %v4603_v14 = vpop.f32.mrb[181].mxu1 }
 0x259   : > { %v2535_v8 = vpop.f32.mrb[182].mxu1  ;;  %v6566_v16 = vpop.permute.xlu1 %2010  ;;  %v3273_v19 = vsel %vm1502_vm8, %v3268_v10, %v3272_v3 }
 0x25a   : > { %v1904_v18 = vadd.f32 %v6340_v42, %v1879_v21  ;;  %4748 = vmatmul.mubr.msk.bf16.gmra.mrb[28].mxu0 %vm385_vm3, %v2975_v61  ;;  %v1921_v52 = vmax.f32 %v1903_v46, 0.0  ;;  %v4604_v56 = vpop.f32.mrb[183].mxu1  ;;  %v3465_v42 = vrot.slane %v6348_v39, 3 }
 0x25b   : > { %4791 = vmatprep.mubr.msk.bf16.mxu0 %vm4996_vm2, %v6949_v15 }
 0x25c   : > { %v2029_v40 = vmul.f32 %v6561_v53, %v1921_v52  ;;  %v1922_v25 = vmax.f32 %v1904_v18, 0.0  ;;  %4830 = vmatmul.mubr.msk.bf16.vlgmr.msra.gmra.mrb[32].mxu1 %vm385_vm3, %v3464_v31  ;;  %v3275_v52 = vrot.slane %v5826_v29, 3 }
 0x25d   : > { %v2371_v4 = vpop.f32.mrb[180].mxu0  ;;  %4833 = vmatprep.mubr.msk.bf16.mxu1 %vm4996_vm2, %v6949_v15 }
 0x25e   : > { %v2046_v58 = vadd.f32 %v2045_v32, %v2029_v40  ;;  %v2030_v48 = vmul.f32 %v6566_v16, %v1922_v25  ;;  %v2372_v38 = vadd.f32 %v2371_v4, %v6322_v49  ;;  %v4565_v34 = vpop.f32.mrb[181].mxu0  ;;  %v3466_v49 = vsel %vm1707_vm9, %v3463_v20, %v3465_v42 }
 0x25f   : > { %v2374_v28 = vpop.f32.mrb[182].mxu0  ;;  %v2540_v61 = vpop.f32.mrb[184].mxu1 }
 0x260   : > { %v6580_v46 = vadd.f32 %v2046_v58, %v2030_v48  ;;  %v2375_v21 = vadd.f32 %v2374_v28, %v6327_v13  ;;  %v4566_v37 = vpop.f32.mrb[183].mxu0  ;;  %v4607_v39 = vpop.f32.mrb[185].mxu1  ;;  %v6583_v32 = vadd.f32 %v2532_v2, %v2372_v38  ;;  %v3467_v13 = vrot.slane %v6373_v24, 3 }
 0x261   : > { %v2543_v14 = vpop.f32.mrb[186].mxu1 }
 0x262   : > { %4792 = vmatmul.mubr.msk.bf16.vlgmr.msra.gmra.mrb[32].mxu0 %vm385_vm3, %v3269_v6  ;;  %v4608_v31 = vpop.f32.mrb[187].mxu1  ;;  %v6587_v18 = vadd.f32 %v2535_v8, %v2375_v21  ;;  %v3274_v8 = vrot.slane %v5855_v0, 2  ;;  %v3468_v24 = vsel %vm1707_vm9, %v3465_v42, %v3467_v13  ;;  %v3279_v6 = vrot.slane %v6957_v12, 3 }
 0x263   : > { %4795 = vmatprep.mubr.msk.bf16.mxu0 %vm4996_vm2, %v6949_v15 }
 0x264   : > { %4834 = vmatmul.mubr.msk.bf16.gmra.mrb[36].mxu1 %vm385_vm3, %v3466_v49  ;;  %v3276_v29 = vor.u32 %v3275_v52, %v3274_v8  ;;  %v3280_v12 = vor.u32 %v3279_v6, %v3278_v27 }
 0x265   : > { %v2379_v5 = vpop.f32.mrb[184].mxu0  ;;  %4837 = vmatprep.mubr.msk.bf16.mxu1 %vm4996_vm2, %v6949_v15 }
 0x266   : > { %v2380_v2 = vadd.f32 %v2379_v5, %v6353_v9  ;;  %v4569_v20 = vpop.f32.mrb[185].mxu0  ;;  %v3277_v28 = vsel %vm1502_vm8, %v3272_v3, %v3276_v29  ;;  %v3281_v52 = vsel %vm1502_vm8, %v3276_v29, %v3280_v12 }
 0x267   : > { %v2382_v56 = vpop.f32.mrb[186].mxu0  ;;  %v2548_v40 = vpop.f32.mrb[188].mxu1 }
 0x268   : > { %v2383_v25 = vadd.f32 %v2382_v56, %v6357_v36  ;;  %v4570_v4 = vpop.f32.mrb[187].mxu0  ;;  %v4611_v58 = vpop.f32.mrb[189].mxu1  ;;  %v6600_v48 = vadd.f32 %v2540_v61, %v2380_v2  ;;  %v3469_v36 = vrot.slane %v6397_v57, 3  ;;  %v3282_v2 = vrot.slane %v6958_v22, 2  ;;  %v6979_v56 = vld [vmem:[#allocation2_spill] sm:$0xff] }
 0x269   : > { %v2551_v38 = vpop.f32.mrb[190].mxu1 }
 0x26a   : > { %4796 = vmatmul.mubr.msk.bf16.gmra.mrb[36].mxu0 %vm385_vm3, %v3273_v19  ;;  %v4612_v9 = vpop.f32.mrb[191].mxu1  ;;  %v6604_v34 = vadd.f32 %v2543_v14, %v2383_v25  ;;  %v3470_v57 = vsel %vm1707_vm9, %v3467_v13, %v3469_v36  ;;  %v3283_v13 = vrot.slane %v6959_v59, 3 }
 0x26b   : > { %4799 = vmatprep.mubr.msk.bf16.mxu0 %vm4996_vm2, %v6949_v15 }
 0x26c   : > { %4838 = vmatmul.mubr.msk.bf16.gmra.mrb[40].mxu1 %vm385_vm3, %v3468_v24  ;;  %v3284_v59 = vor.u32 %v3283_v13, %v3282_v2  ;;  %v3473_v24 = vrot.slane %v6447_v7, 3 }
 0x26d   : > { %v2387_v0 = vpop.f32.mrb[188].mxu0  ;;  %4841 = vmatprep.mubr.msk.bf16.mxu1 %vm4996_vm2, %v6949_v15 }
 0x26e   : > { %v2388_v10 = vadd.f32 %v2387_v0, %v6379_v55  ;;  %v4573_v42 = vpop.f32.mrb[189].mxu0  ;;  %v6980_v0 = vld [vmem:[#allocation8_spill] sm:$0xff]  ;;  %v3285_v27 = vsel %vm1502_vm8, %v3280_v12, %v3284_v59 }
 0x26f   : > { %v2390_v11 = vpop.f32.mrb[190].mxu0  ;;  %v2556_v61 = vpop.f32.mrb[192].mxu1 }
 0x270   : > { %v2391_v21 = vadd.f32 %v2390_v11, %v6383_v50  ;;  %v4574_v37 = vpop.f32.mrb[191].mxu0  ;;  %v4615_v39 = vpop.f32.mrb[193].mxu1  ;;  %v6617_v14 = vadd.f32 %v2548_v40, %v2388_v10  ;;  %v3471_v50 = vrot.slane %v6422_v44, 3  ;;  %v6981_v10 = vld [vmem:[#allocation9_spill] sm:$0xff] }
 0x271   : > { %v2559_v49 = vpop.f32.mrb[194].mxu1  ;;  %v3286_v42 = vrot.slane %v6981_v10, 2 }
 0x272   : > { %4800 = vmatmul.mubr.msk.bf16.gmra.mrb[40].mxu0 %vm385_vm3, %v3277_v28  ;;  %v4616_v55 = vpop.f32.mrb[195].mxu1  ;;  %v6621_v31 = vadd.f32 %v2551_v38, %v2391_v21  ;;  %v3472_v44 = vsel %vm1707_vm9, %v3469_v36, %v3471_v50  ;;  %v3287_v36 = vrot.slane %v6980_v0, 3  ;;  %v6982_v28 = vld [vmem:[#allocation13_spill] sm:$0xff]  ;;  %v3474_v7 = vsel %vm1707_vm9, %v3471_v50, %v3473_v24 }
 0x273   : > { %4803 = vmatprep.mubr.msk.bf16.mxu0 %vm4996_vm2, %v6949_v15 }
 0x274   : > { %4842 = vmatmul.mubr.msk.bf16.gmra.mrb[44].mxu1 %vm385_vm3, %v3470_v57  ;;  %v3288_v55 = vor.u32 %v3287_v36, %v3286_v42 }
 0x275   : > { %v2395_v41 = vpop.f32.mrb[192].mxu0  ;;  %4845 = vmatprep.mubr.msk.bf16.mxu1 %vm4996_vm2, %v6949_v15 }
 0x276   : > { %v2396_v3 = vadd.f32 %v2395_v41, %v6402_v62  ;;  %v4577_v5 = vpop.f32.mrb[193].mxu0  ;;  %v3475_v41 = vrot.slane %v5981_v33, 3  ;;  %v3289_v13 = vsel %vm1502_vm8, %v3284_v59, %v3288_v55  ;;  %v3477_v59 = vrot.slane %v6482_v60, 3 }
 0x277   : > { %v2398_v20 = vpop.f32.mrb[194].mxu0  ;;  %v2564_v8 = vpop.f32.mrb[196].mxu1 }
 0x278   : > { %v2399_v19 = vadd.f32 %v2398_v20, %v6979_v56  ;;  %v4578_v40 = vpop.f32.mrb[195].mxu0  ;;  %v4619_v25 = vpop.f32.mrb[197].mxu1  ;;  %v6634_v4 = vadd.f32 %v2556_v61, %v2396_v3  ;;  %v6983_v20 = vld [vmem:[#allocation16_spill] sm:$0xff] }
 0x279   : > { %v2567_v58 = vpop.f32.mrb[198].mxu1  ;;  %v3476_v25 = vsel %vm1707_vm9, %v3473_v24, %v3475_v41 }
 0x27a   : > { %4804 = vmatmul.mubr.msk.bf16.gmra.mrb[44].mxu0 %vm385_vm3, %v3281_v52  ;;  %v4620_v62 = vpop.f32.mrb[199].mxu1  ;;  %v6638_v38 = vadd.f32 %v2559_v49, %v2399_v19 }
 0x27b   : > { %4807 = vmatprep.mubr.msk.bf16.mxu0 %vm4996_vm2, %v6949_v15 }
 0x27c   : > { %4846 = vmatmul.mubr.msk.bf16.gmra.mrb[48].mxu1 %vm385_vm3, %v3472_v44  ;;  %v3298_v44 = vshll.u32 %v6482_v60, 16 }
 0x27d   : > { %v2403_v22 = vpop.f32.mrb[196].mxu0  ;;  %4849 = vmatprep.mubr.msk.bf16.mxu1 %vm4996_vm2, %v6949_v15 }
 0x27e   : > { %v2404_v9 = vadd.f32 %v2403_v22, %v6427_v63  ;;  %v4581_v29 = vpop.f32.mrb[197].mxu0  ;;  %v3300_v42 = vrot.slane %v3298_v44, 3 }
 0x27f   : > { %v2406_v6 = vpop.f32.mrb[198].mxu0  ;;  %v2572_v11 = vpop.f32.mrb[200].mxu1  ;;  %v6984_v29 = vld [vmem:[#allocation10_spill] sm:$0xff] }
 0x280   : > { %v2407_v61 = vadd.f32 %v2406_v6, %v6982_v28  ;;  %v4582_v21 = vpop.f32.mrb[199].mxu0  ;;  %v4623_v37 = vpop.f32.mrb[201].mxu1  ;;  %v6651_v39 = vadd.f32 %v2564_v8, %v2404_v9  ;;  %v3293_v0 = vsel %vm1502_vm8, %v3288_v55, %v6984_v29 }
 0x281   : > { %v2575_v49 = vpop.f32.mrb[202].mxu1  ;;  %v3478_v21 = vsel %vm1707_vm9, %v3475_v41, %v3477_v59 }
 0x282   : > { %4808 = vmatmul.mubr.msk.bf16.gmra.mrb[48].mxu0 %vm385_vm3, %v3285_v27  ;;  %v4624_v63 = vpop.f32.mrb[203].mxu1  ;;  %v6655_v57 = vadd.f32 %v2567_v58, %v2407_v61 }
 0x283   : > { %4811 = vmatprep.mubr.msk.bf16.mxu0 %vm4996_vm2, %v6949_v15  ;;  %v3479_v63 = vrot.slane %v6514_v30, 3 }
 0x284   : > { %4850 = vmatmul.mubr.msk.bf16.gmra.mrb[52].mxu1 %vm385_vm3, %v3474_v7 }
 0x285   : > { %v2411_v12 = vpop.f32.mrb[200].mxu0  ;;  %4853 = vmatprep.mubr.msk.bf16.mxu1 %vm4996_vm2, %v6949_v15 }
 0x286   : > { %v2412_v3 = vadd.f32 %v2411_v12, %v6452_v51  ;;  %v4585_v50 = vpop.f32.mrb[201].mxu0  ;;  %v3295_v51 = vshrl.u32 %v6482_v60, 16 }
 0x287   : > { %v2414_v5 = vpop.f32.mrb[202].mxu0  ;;  %v2580_v2 = vpop.f32.mrb[204].mxu1 }
 0x288   : > { %v2415_v52 = vadd.f32 %v2414_v5, %v6983_v20  ;;  %v4586_v8 = vpop.f32.mrb[203].mxu0  ;;  %v4627_v56 = vpop.f32.mrb[205].mxu1  ;;  %v6666_v19 = vadd.f32 %v2572_v11, %v2412_v3  ;;  %v3297_v10 = vrot.slane %v3295_v51, 2 }
 0x289   : > { %v2583_v40 = vpop.f32.mrb[206].mxu1 }
 0x28a   : > { %4812 = vmatmul.mubr.msk.bf16.gmra.mrb[52].mxu0 %vm385_vm3, %v3289_v13  ;;  %v4628_v58 = vpop.f32.mrb[207].mxu1  ;;  %v6670_v33 = vadd.f32 %v2575_v49, %v2415_v52  ;;  %v3301_v37 = vor.u32 %v3300_v42, %v3297_v10  ;;  %v3304_v49 = vshrl.u32 %v6514_v30, 16 }
 0x28b   : > { %4815 = vmatprep.mubr.msk.bf16.mxu0 %vm4996_vm2, %v6949_v15 }
 0x28c   : > { %4854 = vmatmul.mubr.msk.bf16.gmra.mrb[56].mxu1 %vm385_vm3, %v3476_v25  ;;  %v3302_v3 = vsel %vm1502_vm8, %v6984_v29, %v3301_v37  ;;  %v3306_v5 = vrot.slane %v3304_v49, 2 }
 0x28d   : > { %v2419_v62 = vpop.f32.mrb[204].mxu0  ;;  %4857 = vmatprep.mubr.msk.bf16.mxu1 %vm4996_vm2, %v6949_v15 }
 0x28e   : > { %v2420_v22 = vadd.f32 %v2419_v62, %v6477_v26  ;;  %v4589_v24 = vpop.f32.mrb[205].mxu0 }
 0x28f   : > { %v2422_v9 = vpop.f32.mrb[206].mxu0  ;;  %v2588_v36 = vpop.f32.mrb[208].mxu1 }
 0x290   : > { %v2423_v6 = vadd.f32 %v2422_v9, %v6486_v17  ;;  %v4590_v27 = vpop.f32.mrb[207].mxu0  ;;  %v4631_v11 = vpop.f32.mrb[209].mxu1  ;;  %v6684_v28 = vadd.f32 %v2580_v2, %v2420_v22  ;;  %v3307_v17 = vshll.u32 %v6514_v30, 16 }
 0x291   : > { %v2591_v61 = vpop.f32.mrb[210].mxu1 }
 0x292   : > { %4816 = vmatmul.mubr.msk.bf16.gmra.mrb[56].mxu0 %vm385_vm3, %v3293_v0  ;;  %v4632_v60 = vpop.f32.mrb[211].mxu1  ;;  %v6688_v26 = vadd.f32 %v2583_v40, %v2423_v6  ;;  %v3309_v13 = vrot.slane %v3307_v17, 3  ;;  %v3480_v40 = vsel %vm1707_vm9, %v3477_v59, %v3479_v63 }
 0x293   : > { %4819 = vmatprep.mubr.msk.bf16.mxu0 %vm4996_vm2, %v6949_v15 }
 0x294   : > { %4858 = vmatmul.mubr.msk.bf16.gmra.mrb[60].mxu1 %vm385_vm3, %v3478_v21  ;;  %v3310_v25 = vor.u32 %v3309_v13, %v3306_v5 }
 0x295   : > { %v2427_v7 = vpop.f32.mrb[208].mxu0  ;;  %4861 = vmatprep.mubr.msk.bf16.mxu1 %vm4996_vm2, %v6949_v15 }
 0x296   : > { %v2428_v55 = vadd.f32 %v2427_v7, %v6503_v23  ;;  %v4593_v12 = vpop.f32.mrb[209].mxu0  ;;  %v3311_v62 = vsel %vm1502_vm8, %v3301_v37, %v3310_v25 }
 0x297   : > { %v2430_v41 = vpop.f32.mrb[210].mxu0  ;;  %v2596_v50 = vpop.f32.mrb[212].mxu1 }
 0x298   : > { %v2431_v2 = vadd.f32 %v2430_v41, %v6509_v45  ;;  %v4594_v20 = vpop.f32.mrb[211].mxu0  ;;  %v4635_v52 = vpop.f32.mrb[213].mxu1  ;;  %v6702_v8 = vadd.f32 %v2588_v36, %v2428_v55 }
 0x299   : > { %v2599_v56 = vpop.f32.mrb[214].mxu1 }
 0x29a   : > { %4820 = vmatmul.mubr.msk.bf16.gmra.mrb[60].mxu0 %vm385_vm3, %v3302_v3  ;;  %v4636_v23 = vpop.f32.mrb[215].mxu1  ;;  %v6706_v30 = vadd.f32 %v2591_v61, %v2431_v2 }
 0x29b   : > { %4823 = vmatprep.mubr.msk.bf16.mxu0 %vm4996_vm2, %v6949_v15 }
 0x29c   : > { %4862 = vmatmul.mubr.msk.bf16.gmra.mrb[64].mxu1 %vm385_vm3, %v3480_v40 }
 0x29d   : > { %v2435_v58 = vpop.f32.mrb[212].mxu0 }
 0x29e   : > { %v2436_v45 = vadd.f32 %v2435_v58, %v6529_v35  ;;  %v4597_v51 = vpop.f32.mrb[213].mxu0 }
 0x29f   : > { %v2438_v44 = vpop.f32.mrb[214].mxu0  ;;  %v2868_v22 = vpop.f32.mrb[216].mxu1 }
 0x2a0   : > { %v2439_v59 = vadd.f32 %v2438_v44, %v6535_v47  ;;  %v4598_v24 = vpop.f32.mrb[215].mxu0  ;;  %v4679_v9 = vpop.f32.mrb[217].mxu1  ;;  %v6714_v29 = vadd.f32 %v2596_v50, %v2436_v45 }
 0x2a1   : > { %v2871_v0 = vpop.f32.mrb[218].mxu1 }
 0x2a2   : > { %4824 = vmatmul.mubr.msk.bf16.gmra.mrb[64].mxu0 %vm385_vm3, %v3311_v62  ;;  %v4680_v15 = vpop.f32.mrb[219].mxu1  ;;  %v6717_v36 = vadd.f32 %v2599_v56, %v2439_v59 }
 0x2a5   : > { %v2669_v10 = vpop.f32.mrb[216].mxu0 }
 0x2a6   : > { %v2740_v35 = vadd.f32 %v2669_v10, %v6583_v32  ;;  %v4641_v42 = vpop.f32.mrb[217].mxu0 }
 0x2a7   : > { %v2672_v6 = vpop.f32.mrb[218].mxu0  ;;  %v2876_v27 = vpop.f32.mrb[220].mxu1 }
 0x2a8   : > { %v2741_v11 = vadd.f32 %v2672_v6, %v6587_v18  ;;  %v4642_v61 = vpop.f32.mrb[219].mxu0  ;;  %v4683_v47 = vpop.f32.mrb[221].mxu1  ;;  %v6721_v21 = vadd.f32 %v2868_v22, %v2740_v35 }
 0x2a9   : > { %v2879_v60 = vpop.f32.mrb[222].mxu1 }
 0x2aa   : > { %v4684_v37 = vpop.f32.mrb[223].mxu1  ;;  %v6723_v49 = vadd.f32 %v2871_v0, %v2741_v11 }
 0x2ad   : > { %v2677_v17 = vpop.f32.mrb[220].mxu0 }
 0x2ae   : > { %v2742_v7 = vadd.f32 %v2677_v17, %v6600_v48  ;;  %v4645_v63 = vpop.f32.mrb[221].mxu0 }
 0x2af   : > { %v2680_v55 = vpop.f32.mrb[222].mxu0  ;;  %v2884_v12 = vpop.f32.mrb[224].mxu1 }
 0x2b0   : > { %v2743_v32 = vadd.f32 %v2680_v55, %v6604_v34  ;;  %v4646_v41 = vpop.f32.mrb[223].mxu0  ;;  %v4687_v3 = vpop.f32.mrb[225].mxu1  ;;  %v6727_v50 = vadd.f32 %v2876_v27, %v2742_v7 }
 0x2b1   : > { %v2887_v18 = vpop.f32.mrb[226].mxu1 }
 0x2b2   : > { %v4688_v5 = vpop.f32.mrb[227].mxu1  ;;  %v6729_v13 = vadd.f32 %v2879_v60, %v2743_v32 }
 0x2b5   : > { %v2685_v2 = vpop.f32.mrb[224].mxu0 }
 0x2b6   : > { %v2744_v20 = vadd.f32 %v2685_v2, %v6617_v14  ;;  %v4649_v52 = vpop.f32.mrb[225].mxu0 }
 0x2b7   : > { %v2688_v56 = vpop.f32.mrb[226].mxu0  ;;  %v2892_v40 = vpop.f32.mrb[228].mxu1 }
 0x2b8   : > { %v2745_v48 = vadd.f32 %v2688_v56, %v6621_v31  ;;  %v4650_v23 = vpop.f32.mrb[227].mxu0  ;;  %v4691_v25 = vpop.f32.mrb[229].mxu1  ;;  %v6733_v58 = vadd.f32 %v2884_v12, %v2744_v20 }
 0x2b9   : > { %v2895_v34 = vpop.f32.mrb[230].mxu1 }
 0x2ba   : > { %v4692_v45 = vpop.f32.mrb[231].mxu1  ;;  %v6735_v51 = vadd.f32 %v2887_v18, %v2745_v48 }
 0x2bd   : > { %v2693_v44 = vpop.f32.mrb[228].mxu0 }
 0x2be   : > { %v2746_v62 = vadd.f32 %v2693_v44, %v6634_v4  ;;  %v4653_v22 = vpop.f32.mrb[229].mxu0 }
 0x2bf   : > { %v2696_v59 = vpop.f32.mrb[230].mxu0  ;;  %v2900_v24 = vpop.f32.mrb[232].mxu1 }
 0x2c0   : > { %v2747_v14 = vadd.f32 %v2696_v59, %v6638_v38  ;;  %v4654_v9 = vpop.f32.mrb[231].mxu0  ;;  %v4695_v0 = vpop.f32.mrb[233].mxu1  ;;  %v6739_v15 = vadd.f32 %v2892_v40, %v2746_v62 }
 0x2c1   : > { %v2903_v31 = vpop.f32.mrb[234].mxu1 }
 0x2c2   : > { %v4696_v10 = vpop.f32.mrb[235].mxu1  ;;  %v6741_v35 = vadd.f32 %v2895_v34, %v2747_v14 }
 0x2c5   : > { %v2701_v42 = vpop.f32.mrb[232].mxu0 }
 0x2c6   : > { %v2748_v6 = vadd.f32 %v2701_v42, %v6651_v39  ;;  %v4657_v27 = vpop.f32.mrb[233].mxu0 }
 0x2c7   : > { %v2704_v11 = vpop.f32.mrb[234].mxu0  ;;  %v2908_v61 = vpop.f32.mrb[236].mxu1 }
 0x2c8   : > { %v2749_v4 = vadd.f32 %v2704_v11, %v6655_v57  ;;  %v4658_v47 = vpop.f32.mrb[235].mxu0  ;;  %v4699_v60 = vpop.f32.mrb[237].mxu1  ;;  %v6745_v37 = vadd.f32 %v2900_v24, %v2748_v6 }
 0x2c9   : > { %v2911_v38 = vpop.f32.mrb[238].mxu1 }
 0x2ca   : > { %v4700_v17 = vpop.f32.mrb[239].mxu1  ;;  %v6747_v7 = vadd.f32 %v2903_v31, %v2749_v4 }
 0x2cd   : > { %v2709_v63 = vpop.f32.mrb[236].mxu0 }
 0x2ce   : > { %v2750_v55 = vadd.f32 %v2709_v63, %v6666_v19  ;;  %v4661_v12 = vpop.f32.mrb[237].mxu0 }
 0x2cf   : > { %v2712_v32 = vpop.f32.mrb[238].mxu0  ;;  %v2916_v41 = vpop.f32.mrb[240].mxu1 }
 0x2d0   : > { %v2751_v39 = vadd.f32 %v2712_v32, %v6670_v33  ;;  %v4662_v3 = vpop.f32.mrb[239].mxu0  ;;  %v4703_v18 = vpop.f32.mrb[241].mxu1  ;;  %v6751_v5 = vadd.f32 %v2908_v61, %v2750_v55 }
 0x2d1   : > { %v2919_v57 = vpop.f32.mrb[242].mxu1 }
 0x2d2   : > { %v4704_v2 = vpop.f32.mrb[243].mxu1  ;;  %v6753_v20 = vadd.f32 %v2911_v38, %v2751_v39 }
 0x2d5   : > { %v2717_v52 = vpop.f32.mrb[240].mxu0 }
 0x2d6   : > { %v2752_v56 = vadd.f32 %v2717_v52, %v6684_v28  ;;  %v4665_v40 = vpop.f32.mrb[241].mxu0 }
 0x2d7   : > { %v2720_v48 = vpop.f32.mrb[242].mxu0  ;;  %v2924_v23 = vpop.f32.mrb[244].mxu1 }
 0x2d8   : > { %v2753_v19 = vadd.f32 %v2720_v48, %v6688_v26  ;;  %v4666_v25 = vpop.f32.mrb[243].mxu0  ;;  %v4707_v34 = vpop.f32.mrb[245].mxu1  ;;  %v6757_v45 = vadd.f32 %v2916_v41, %v2752_v56 }
 0x2d9   : > { %v2927_v33 = vpop.f32.mrb[246].mxu1 }
 0x2da   : > { %v4708_v44 = vpop.f32.mrb[247].mxu1  ;;  %v6759_v62 = vadd.f32 %v2919_v57, %v2753_v19 }
 0x2dd   : > { %v2725_v22 = vpop.f32.mrb[244].mxu0 }
 0x2de   : > { %v2754_v59 = vadd.f32 %v2725_v22, %v6702_v8  ;;  %v4669_v24 = vpop.f32.mrb[245].mxu0 }
 0x2df   : > { %v2728_v14 = vpop.f32.mrb[246].mxu0  ;;  %v2932_v9 = vpop.f32.mrb[248].mxu1 }
 0x2e0   : > { %v2755_v28 = vadd.f32 %v2728_v14, %v6706_v30  ;;  %v4670_v0 = vpop.f32.mrb[247].mxu0  ;;  %v4711_v31 = vpop.f32.mrb[249].mxu1  ;;  %v6763_v10 = vadd.f32 %v2924_v23, %v2754_v59 }
 0x2e1   : > { %v2935_v26 = vpop.f32.mrb[250].mxu1 }
 0x2e2   : > { %v4712_v42 = vpop.f32.mrb[251].mxu1  ;;  %v6765_v6 = vadd.f32 %v2927_v33, %v2755_v28 }
 0x2e5   : > { %v2733_v27 = vpop.f32.mrb[248].mxu0 }
 0x2e6   : > { %v2756_v11 = vadd.f32 %v2733_v27, %v6714_v29  ;;  %v4673_v61 = vpop.f32.mrb[249].mxu0 }
 0x2e7   : > { %v2736_v4 = vpop.f32.mrb[250].mxu0  ;;  %v3174_v47 = vpop.f32.mrb[252].mxu1 }
 0x2e8   : > { %v2757_v8 = vadd.f32 %v2736_v4, %v6717_v36  ;;  %v4674_v60 = vpop.f32.mrb[251].mxu0  ;;  %v4755_v38 = vpop.f32.mrb[253].mxu1  ;;  %v6769_v17 = vadd.f32 %v2932_v9, %v2756_v11 }
 0x2e9   : > { %v3177_v30 = vpop.f32.mrb[254].mxu1 }
 0x2ea   : > { %v4756_v63 = vpop.f32.mrb[255].mxu1  ;;  %v6771_v55 = vadd.f32 %v2935_v26, %v2757_v8 }
 0x2ed   : > { %v3037_v12 = vpop.f32.mrb[252].mxu0 }
 0x2ee   : > { %v3108_v32 = vadd.f32 %v3037_v12, %v6721_v21  ;;  %v4717_v41 = vpop.f32.mrb[253].mxu0 }
 0x2ef   : > { %v3040_v39 = vpop.f32.mrb[254].mxu0  ;;  %v3182_v3 = vpop.f32.mrb[0].mxu1 }
 0x2f0   : > { %v3109_v29 = vadd.f32 %v3040_v39, %v6723_v49  ;;  %v4718_v18 = vpop.f32.mrb[255].mxu0  ;;  %v4759_v57 = vpop.f32.mrb[1].mxu1  ;;  %v6775_v2 = vadd.f32 %v3174_v47, %v3108_v32 }
 0x2f1   : > { %v3185_v36 = vpop.f32.mrb[2].mxu1 }
 0x2f2   : > { %v4760_v52 = vpop.f32.mrb[3].mxu1  ;;  %v6777_v56 = vadd.f32 %v3177_v30, %v3109_v29 }
 0x2f5   : > { %v3045_v40 = vpop.f32.mrb[0].mxu0 }
 0x2f6   : > { %v3110_v48 = vadd.f32 %v3045_v40, %v6727_v50  ;;  %v4721_v23 = vpop.f32.mrb[1].mxu0 }
 0x2f7   : > { %v3048_v19 = vpop.f32.mrb[2].mxu0  ;;  %v3190_v25 = vpop.f32.mrb[4].mxu1 }
 0x2f8   : > { %v3111_v21 = vadd.f32 %v3048_v19, %v6729_v13  ;;  %v4722_v34 = vpop.f32.mrb[3].mxu0  ;;  %v4763_v33 = vpop.f32.mrb[5].mxu1  ;;  %v6781_v44 = vadd.f32 %v3182_v3, %v3110_v48 }
 0x2f9   : > { %v3193_v49 = vpop.f32.mrb[6].mxu1 }
 0x2fa   : > { %v4764_v22 = vpop.f32.mrb[7].mxu1  ;;  %v6783_v59 = vadd.f32 %v3185_v36, %v3111_v21 }
 0x2fd   : > { %v3053_v24 = vpop.f32.mrb[4].mxu0 }
 0x2fe   : > { %v3112_v14 = vadd.f32 %v3053_v24, %v6733_v58  ;;  %v4725_v9 = vpop.f32.mrb[5].mxu0 }
 0x2ff   : > { %v3056_v28 = vpop.f32.mrb[6].mxu0  ;;  %v3198_v0 = vpop.f32.mrb[8].mxu1 }
 0x300   : > { %v3113_v50 = vadd.f32 %v3056_v28, %v6735_v51  ;;  %v4726_v31 = vpop.f32.mrb[7].mxu0  ;;  %v4767_v26 = vpop.f32.mrb[9].mxu1  ;;  %v6787_v42 = vadd.f32 %v3190_v25, %v3112_v14 }
 0x301   : > { %v3201_v13 = vpop.f32.mrb[10].mxu1 }
 0x302   : > { %v4768_v27 = vpop.f32.mrb[11].mxu1  ;;  %v6789_v11 = vadd.f32 %v3193_v49, %v3113_v50 }
 0x305   : > { %v3061_v61 = vpop.f32.mrb[8].mxu0 }
 0x306   : > { %v3114_v4 = vadd.f32 %v3061_v61, %v6739_v15  ;;  %v4729_v47 = vpop.f32.mrb[9].mxu0 }
 0x307   : > { %v3064_v8 = vpop.f32.mrb[10].mxu0  ;;  %v3206_v60 = vpop.f32.mrb[12].mxu1 }
 0x308   : > { %v3115_v58 = vadd.f32 %v3064_v8, %v6741_v35  ;;  %v4730_v38 = vpop.f32.mrb[11].mxu0  ;;  %v4771_v30 = vpop.f32.mrb[13].mxu1  ;;  %v6793_v63 = vadd.f32 %v3198_v0, %v3114_v4 }
 0x309   : > { %v3209_v51 = vpop.f32.mrb[14].mxu1 }
 0x30a   : > { %v4772_v12 = vpop.f32.mrb[15].mxu1  ;;  %v6795_v32 = vadd.f32 %v3201_v13, %v3115_v58 }
 0x30d   : > { %v3069_v41 = vpop.f32.mrb[12].mxu0 }
 0x30e   : > { %v3116_v39 = vadd.f32 %v3069_v41, %v6745_v37  ;;  %v4733_v3 = vpop.f32.mrb[13].mxu0 }
 0x30f   : > { %v3072_v29 = vpop.f32.mrb[14].mxu0  ;;  %v3214_v18 = vpop.f32.mrb[16].mxu1 }
 0x310   : > { %v3117_v15 = vadd.f32 %v3072_v29, %v6747_v7  ;;  %v4734_v57 = vpop.f32.mrb[15].mxu0  ;;  %v4775_v36 = vpop.f32.mrb[17].mxu1  ;;  %v6799_v52 = vadd.f32 %v3206_v60, %v3116_v39 }
 0x311   : > { %v3217_v35 = vpop.f32.mrb[18].mxu1 }
 0x312   : > { %v4776_v40 = vpop.f32.mrb[19].mxu1  ;;  %v6801_v48 = vadd.f32 %v3209_v51, %v3117_v15 }
 0x315   : > { %v3077_v23 = vpop.f32.mrb[16].mxu0 }
 0x316   : > { %v3118_v19 = vadd.f32 %v3077_v23, %v6751_v5  ;;  %v4737_v25 = vpop.f32.mrb[17].mxu0 }
 0x317   : > { %v3080_v21 = vpop.f32.mrb[18].mxu0  ;;  %v3222_v34 = vpop.f32.mrb[20].mxu1 }
 0x318   : > { %v3119_v37 = vadd.f32 %v3080_v21, %v6753_v20  ;;  %v4738_v33 = vpop.f32.mrb[19].mxu0  ;;  %v4779_v49 = vpop.f32.mrb[21].mxu1  ;;  %v6805_v22 = vadd.f32 %v3214_v18, %v3118_v19 }
 0x319   : > { %v3225_v7 = vpop.f32.mrb[22].mxu1 }
 0x31a   : > { %v4780_v24 = vpop.f32.mrb[23].mxu1  ;;  %v6807_v14 = vadd.f32 %v3217_v35, %v3119_v37 }
 0x31d   : > { %v3085_v9 = vpop.f32.mrb[20].mxu0 }
 0x31e   : > { %v3120_v28 = vadd.f32 %v3085_v9, %v6757_v45  ;;  %v4741_v0 = vpop.f32.mrb[21].mxu0  ;;  %v6832_v9 = vld [vmem:[%s6910_s2] ss:$0 sm:$0xff] }
 0x31f   : > { %v3088_v50 = vpop.f32.mrb[22].mxu0  ;;  %v3230_v31 = vpop.f32.mrb[24].mxu1 }
 0x320   : > { %v3121_v5 = vadd.f32 %v3088_v50, %v6759_v62  ;;  %v4742_v26 = vpop.f32.mrb[23].mxu0  ;;  %v4783_v13 = vpop.f32.mrb[25].mxu1  ;;  %v6811_v27 = vadd.f32 %v3222_v34, %v3120_v28 }
 0x321   : > { %v3233_v20 = vpop.f32.mrb[26].mxu1 }
 0x322   : > { %v4784_v61 = vpop.f32.mrb[27].mxu1  ;;  %v6813_v4 = vadd.f32 %v3225_v7, %v3121_v5 }
 0x325   : > { %v3093_v47 = vpop.f32.mrb[24].mxu0 }
 0x326   : > { %v3122_v8 = vadd.f32 %v3093_v47, %v6763_v10  ;;  %v4745_v60 = vpop.f32.mrb[25].mxu0  ;;  %v6985_v47 = vld [vmem:[#allocation5_spill] sm:$0xff] }
 0x327   : > { %v3096_v58 = vpop.f32.mrb[26].mxu0  ;;  %v3238_v38 = vpop.f32.mrb[28].mxu1  ;;  %v6986_v60 = vld [vmem:[#allocation4_spill] sm:$0xff] }
 0x328   : > { %v3123_v45 = vadd.f32 %v3096_v58, %v6765_v6  ;;  %v4746_v30 = vpop.f32.mrb[27].mxu0  ;;  %v4787_v51 = vpop.f32.mrb[29].mxu1  ;;  %v6817_v12 = vadd.f32 %v3230_v31, %v3122_v8 }
 0x329   : > { %v3241_v62 = vpop.f32.mrb[30].mxu1 }
 0x32a   : > { %v4788_v41 = vpop.f32.mrb[31].mxu1  ;;  %v6819_v39 = vadd.f32 %v3233_v20, %v3123_v45 }
 0x32d   : > { %v3101_v3 = vpop.f32.mrb[28].mxu0 }
 0x32e   : > { %v3124_v29 = vadd.f32 %v3101_v3, %v6769_v17  ;;  %v4749_v18 = vpop.f32.mrb[29].mxu0 }
 0x32f   : > { %v3104_v15 = vpop.f32.mrb[30].mxu0  ;;  %v3542_v57 = vpop.f32.mrb[32].mxu1 }
 0x330   : > { %v3125_v10 = vadd.f32 %v3104_v15, %v6771_v55  ;;  %v4750_v36 = vpop.f32.mrb[31].mxu0  ;;  %v4831_v35 = vpop.f32.mrb[33].mxu1  ;;  %v6823_v40 = vadd.f32 %v3238_v38, %v3124_v29 }
 0x331   : > { %v3545_v6 = vpop.f32.mrb[34].mxu1 }
 0x332   : > { %v4832_v23 = vpop.f32.mrb[35].mxu1  ;;  %v6825_v19 = vadd.f32 %v3241_v62, %v3125_v10  ;;  %v6987_v10 = vld [vmem:[#allocation7_spill] sm:$0xff] }
 0x335   : > { %v3373_v25 = vpop.f32.mrb[32].mxu0 }
 0x336   : > { %v3444_v21 = vadd.f32 %v3373_v25, %v6775_v2  ;;  %v4793_v34 = vpop.f32.mrb[33].mxu0 }
 0x337   : > { %v3376_v37 = vpop.f32.mrb[34].mxu0  ;;  %v3550_v33 = vpop.f32.mrb[36].mxu1  ;;  %v6988_v34 = vld [vmem:[#allocation6_spill] sm:$0xff] }
 0x338   : > { %v3613_v17 = vadd.f32 %v3542_v57, %v3444_v21  ;;  %v3445_v49 = vadd.f32 %v3376_v37, %v6777_v56  ;;  %v4794_v7 = vpop.f32.mrb[35].mxu0  ;;  %v4835_v24 = vpop.f32.mrb[37].mxu1 }
 0x339   : > { %v3553_v55 = vpop.f32.mrb[38].mxu1 }
 0x33a   : > { %v3631_v28 = vadd.f32 %v6832_v9, %v3613_v17  ;;  %v3614_v0 = vadd.f32 %v3545_v6, %v3445_v49  ;;  %v4836_v50 = vpop.f32.mrb[39].mxu1 }
 0x33c   : > { %v3649_v31 = vmax.f32 %v3631_v28, 0.0  ;;  %v3632_v2 = vadd.f32 %v6832_v9, %v3614_v0 }
 0x33d   : > { %v3381_v5 = vpop.f32.mrb[36].mxu0 }
 0x33e   : > { %v3650_v26 = vmax.f32 %v3632_v2, 0.0  ;;  %v3446_v13 = vadd.f32 %v3381_v5, %v6781_v44  ;;  %v4797_v56 = vpop.f32.mrb[37].mxu0  ;;  %v3667_v8 = vmul.f32 %v3649_v31, %v6985_v47  ;;  %v6989_v5 = vld [vmem:[#allocation3_spill] sm:$0xff] }
 0x33f   : > { %v3384_v20 = vpop.f32.mrb[38].mxu0  ;;  %v3558_v61 = vpop.f32.mrb[40].mxu1 }
 0x340   : > { %v3668_v58 = vmul.f32 %v3650_v26, %v6986_v60  ;;  %v3615_v38 = vadd.f32 %v3550_v33, %v3446_v13  ;;  %v3447_v45 = vadd.f32 %v3384_v20, %v6783_v59  ;;  %v4798_v30 = vpop.f32.mrb[39].mxu0  ;;  %v4839_v51 = vpop.f32.mrb[41].mxu1 }
 0x341   : > { %v3561_v62 = vpop.f32.mrb[42].mxu1 }
 0x342   : > { %v3685_v41 = vadd.f32 %v3668_v58, %v3667_v8  ;;  %v3633_v3 = vadd.f32 %v6832_v9, %v3615_v38  ;;  %v3616_v29 = vadd.f32 %v3553_v55, %v3447_v45  ;;  %v4840_v18 = vpop.f32.mrb[43].mxu1  ;;  %v6990_v8 = vld [vmem:[#allocation11_spill] sm:$0xff] }
 0x344   : > { %v3651_v15 = vmax.f32 %v3633_v3, 0.0  ;;  %v3634_v44 = vadd.f32 %v6832_v9, %v3616_v29 }
 0x345   : > { %v3389_v57 = vpop.f32.mrb[40].mxu0 }
 0x346   : > { %v3669_v36 = vmul.f32 %v3651_v15, %v6987_v10  ;;  %v3652_v35 = vmax.f32 %v3634_v44, 0.0  ;;  %v3448_v6 = vadd.f32 %v3389_v57, %v6787_v42  ;;  %v4801_v23 = vpop.f32.mrb[41].mxu0  ;;  %v6991_v44 = vld [vmem:[#allocation12_spill] sm:$0xff] }
 0x347   : > { %v3392_v25 = vpop.f32.mrb[42].mxu0  ;;  %v3566_v59 = vpop.f32.mrb[44].mxu1 }
 0x348   : > { %v3686_v21 = vadd.f32 %v3685_v41, %v3669_v36  ;;  %v3670_v37 = vmul.f32 %v3652_v35, %v6988_v34  ;;  %v3617_v33 = vadd.f32 %v3558_v61, %v3448_v6  ;;  %v3449_v17 = vadd.f32 %v3392_v25, %v6789_v11  ;;  %v4802_v49 = vpop.f32.mrb[43].mxu0  ;;  %v4843_v7 = vpop.f32.mrb[45].mxu1  ;;  %v6992_v25 = vld [vmem:[#allocation14_spill] sm:$0xff] }
 0x349   : > { %v3569_v24 = vpop.f32.mrb[46].mxu1 }
 0x34a   : > { %v3687_v55 = vadd.f32 %v3686_v21, %v3670_v37  ;;  %v3635_v28 = vadd.f32 %v6832_v9, %v3617_v33  ;;  %v3618_v0 = vadd.f32 %v3561_v62, %v3449_v17  ;;  %v4844_v50 = vpop.f32.mrb[47].mxu1 }
 0x34b   : > { %v6993_v50 = vld [vmem:[#allocation15_spill] sm:$0xff] }
 0x34c   : > { %v3653_v31 = vmax.f32 %v3635_v28, 0.0  ;;  %v3636_v42 = vadd.f32 %v6832_v9, %v3618_v0 }
 0x34d   : > { %v3397_v2 = vpop.f32.mrb[44].mxu0 }
 0x34e   : > { %v3671_v26 = vmul.f32 %v3653_v31, %v6989_v5  ;;  %v3654_v13 = vmax.f32 %v3636_v42, 0.0  ;;  %v3450_v56 = vadd.f32 %v3397_v2, %v6793_v63  ;;  %v4805_v20 = vpop.f32.mrb[45].mxu0 }
 0x34f   : > { %v3400_v61 = vpop.f32.mrb[46].mxu0  ;;  %v3574_v11 = vpop.f32.mrb[48].mxu1 }
 0x350   : > { %v3688_v47 = vadd.f32 %v3687_v55, %v3671_v26  ;;  %v3672_v60 = vmul.f32 %v3654_v13, %v6990_v8  ;;  %v3619_v58 = vadd.f32 %v3566_v59, %v3450_v56  ;;  %v3451_v38 = vadd.f32 %v3400_v61, %v6795_v32  ;;  %v4806_v45 = vpop.f32.mrb[47].mxu0  ;;  %v4847_v30 = vpop.f32.mrb[49].mxu1  ;;  %v6994_v56 = vld [vmem:[#allocation17_spill] sm:$0xff] }
 0x351   : > { %v3577_v51 = vpop.f32.mrb[50].mxu1 }
 0x352   : > { %v3689_v62 = vadd.f32 %v3688_v47, %v3672_v60  ;;  %v3637_v41 = vadd.f32 %v6832_v9, %v3619_v58  ;;  %v3620_v3 = vadd.f32 %v3569_v24, %v3451_v38  ;;  %v4848_v29 = vpop.f32.mrb[51].mxu1 }
 0x354   : > { %v3655_v18 = vmax.f32 %v3637_v41, 0.0  ;;  %v3638_v63 = vadd.f32 %v6832_v9, %v3620_v3  ;;  %v6995_v41 = vld [vmem:[#allocation18_spill] sm:$0xff] }
 0x355   : > { %v3405_v15 = vpop.f32.mrb[48].mxu0 }
 0x356   : > { %v3673_v57 = vmul.f32 %v3655_v18, %v6991_v44  ;;  %v3656_v10 = vmax.f32 %v3638_v63, 0.0  ;;  %v3452_v36 = vadd.f32 %v3405_v15, %v6799_v52  ;;  %v4809_v35 = vpop.f32.mrb[49].mxu0 }
 0x357   : > { %v3408_v6 = vpop.f32.mrb[50].mxu0  ;;  %v3582_v32 = vpop.f32.mrb[52].mxu1 }
 0x358   : > { %v3690_v23 = vadd.f32 %v3689_v62, %v3673_v57  ;;  %v3674_v59 = vmul.f32 %v3656_v10, %v6992_v25  ;;  %v3621_v21 = vadd.f32 %v3574_v11, %v3452_v36  ;;  %v3453_v34 = vadd.f32 %v3408_v6, %v6801_v48  ;;  %v4810_v37 = vpop.f32.mrb[51].mxu0  ;;  %v4851_v33 = vpop.f32.mrb[53].mxu1  ;;  %v6996_v57 = vld [vmem:[#allocation19_spill] sm:$0xff] }
 0x359   : > { %v3585_v17 = vpop.f32.mrb[54].mxu1 }
 0x35a   : > { %v3691_v49 = vadd.f32 %v3690_v23, %v3674_v59  ;;  %v3639_v7 = vadd.f32 %v6832_v9, %v3621_v21  ;;  %v3622_v24 = vadd.f32 %v3577_v51, %v3453_v34  ;;  %v4852_v55 = vpop.f32.mrb[55].mxu1 }
 0x35c   : > { %v3657_v28 = vmax.f32 %v3639_v7, 0.0  ;;  %v3640_v52 = vadd.f32 %v6832_v9, %v3622_v24 }
 0x35d   : > { %v3413_v0 = vpop.f32.mrb[52].mxu0 }
 0x35e   : > { %v3675_v31 = vmul.f32 %v3657_v28, %v6993_v50  ;;  %v3658_v42 = vmax.f32 %v3640_v52, 0.0  ;;  %v3454_v2 = vadd.f32 %v3413_v0, %v6805_v22  ;;  %v4813_v5 = vpop.f32.mrb[53].mxu0 }
 0x35f   : > { %v3416_v26 = vpop.f32.mrb[54].mxu0  ;;  %v3590_v48 = vpop.f32.mrb[56].mxu1 }
 0x360   : > { %v3692_v13 = vadd.f32 %v3691_v49, %v3675_v31  ;;  %v3676_v20 = vmul.f32 %v3658_v42, %v6994_v56  ;;  %v3623_v61 = vadd.f32 %v3582_v32, %v3454_v2  ;;  %v3455_v11 = vadd.f32 %v3416_v26, %v6807_v14  ;;  %v4814_v47 = vpop.f32.mrb[55].mxu0  ;;  %v4855_v8 = vpop.f32.mrb[57].mxu1 }
 0x361   : > { %v3593_v60 = vpop.f32.mrb[58].mxu1 }
 0x362   : > { %v3693_v58 = vadd.f32 %v3692_v13, %v3676_v20  ;;  %v3641_v38 = vadd.f32 %v6832_v9, %v3623_v61  ;;  %v3624_v45 = vadd.f32 %v3585_v17, %v3455_v11  ;;  %v4856_v30 = vpop.f32.mrb[59].mxu1  ;;  %v6997_v17 = vld [vmem:[#allocation20_spill] sm:$0xff] }
 0x364   : > { %v3659_v51 = vmax.f32 %v3641_v38, 0.0  ;;  %v3642_v22 = vadd.f32 %v6832_v9, %v3624_v45 }
 0x365   : > { %v3421_v62 = vpop.f32.mrb[56].mxu0 }
 0x366   : > { %v3677_v3 = vmul.f32 %v3659_v51, %v6995_v41  ;;  %v3660_v29 = vmax.f32 %v3642_v22, 0.0  ;;  %v3456_v18 = vadd.f32 %v3421_v62, %v6811_v27  ;;  %v4817_v63 = vpop.f32.mrb[57].mxu0  ;;  %v2048_v51 = vrot.slane %v6580_v46, 4 }
 0x367   : > { %v3424_v15 = vpop.f32.mrb[58].mxu0  ;;  %v3598_v14 = vpop.f32.mrb[60].mxu1 }
 0x368   : > { %v3694_v44 = vadd.f32 %v3693_v58, %v3677_v3  ;;  %v3678_v10 = vmul.f32 %v3660_v29, %v6996_v57  ;;  %v3625_v36 = vadd.f32 %v3590_v48, %v3456_v18  ;;  %v3457_v35 = vadd.f32 %v3424_v15, %v6813_v4  ;;  %v4818_v6 = vpop.f32.mrb[59].mxu0  ;;  %v4859_v32 = vpop.f32.mrb[61].mxu1 }
 0x369   : > { %v3601_v23 = vpop.f32.mrb[62].mxu1  ;;  %v2049_v3 = vadd.f32 %v2048_v51, %v6580_v46 }
 0x36a   : > { %v3695_v25 = vadd.f32 %v3694_v44, %v3678_v10  ;;  %v3643_v59 = vadd.f32 %v6832_v9, %v3625_v36  ;;  %v3626_v21 = vadd.f32 %v3593_v60, %v3457_v35  ;;  %v4860_v34 = vpop.f32.mrb[63].mxu1 }
 0x36b   : > { %v2050_v63 = vrot.slane %v2049_v3, 2 }
 0x36c   : > { %v3661_v37 = vmax.f32 %v3643_v59, 0.0  ;;  %v3644_v27 = vadd.f32 %v6832_v9, %v3626_v21 }
 0x36d   : > { %v3429_v33 = vpop.f32.mrb[60].mxu0  ;;  %v2051_v44 = vadd.f32 %v2050_v63, %v2049_v3 }
 0x36e   : > { %v3679_v49 = vmul.f32 %v3661_v37, %v6997_v17  ;;  %v3662_v7 = vmax.f32 %v3644_v27, 0.0  ;;  %v3458_v24 = vadd.f32 %v3429_v33, %v6817_v12  ;;  %v4821_v55 = vpop.f32.mrb[61].mxu0 }
 0x36f   : > { %v3432_v28 = vpop.f32.mrb[62].mxu0  ;;  %v3606_v4 = vpop.f32.mrb[64].mxu1  ;;  %v2052_v36 = vrot.slane %v2051_v44, 1 }
 0x370   : > { %v3696_v52 = vadd.f32 %v3695_v25, %v3679_v49  ;;  %v3680_v0 = vmul.f32 %v3662_v7, %v6518_v1  ;;  %v3627_v50 = vadd.f32 %v3598_v14, %v3458_v24  ;;  %v3459_v31 = vadd.f32 %v3432_v28, %v6819_v39  ;;  %v4822_v42 = vpop.f32.mrb[63].mxu0  ;;  %v4863_v2 = vpop.f32.mrb[65].mxu1 }
 0x371   : > { %v3609_v5 = vpop.f32.mrb[66].mxu1 }
 0x372   : > { %v3697_v26 = vadd.f32 %v3696_v52, %v3680_v0  ;;  %v3645_v48 = vadd.f32 %v6832_v9, %v3627_v50  ;;  %v3628_v13 = vadd.f32 %v3601_v23, %v3459_v31  ;;  %v4864_v56 = vpop.f32.mrb[67].mxu1 }
 0x374   : > { %v3663_v20 = vmax.f32 %v3645_v48, 0.0  ;;  %v3646_v12 = vadd.f32 %v6832_v9, %v3628_v13 }
 0x375   : > { %v3437_v61 = vpop.f32.mrb[64].mxu0 }
 0x376   : > { %v3681_v11 = vmul.f32 %v3663_v20, %v6533_v54  ;;  %v3664_v47 = vmax.f32 %v3646_v12, 0.0  ;;  %v3460_v1 = vadd.f32 %v3437_v61, %v6823_v40  ;;  %v4825_v8 = vpop.f32.mrb[65].mxu0 }
 0x377   : > { %v3440_v60 = vpop.f32.mrb[66].mxu0 }
 0x378   : > { %v3698_v39 = vadd.f32 %v3697_v26, %v3681_v11  ;;  %v3682_v58 = vmul.f32 %v3664_v47, %v6540_v43  ;;  %v3629_v38 = vadd.f32 %v3606_v4, %v3460_v1  ;;  %v3461_v45 = vadd.f32 %v3440_v60, %v6825_v19  ;;  %v4826_v30 = vpop.f32.mrb[67].mxu0 }
 0x37a   : > { %v3699_v22 = vadd.f32 %v3698_v39, %v3682_v58  ;;  %v3647_v62 = vadd.f32 %v6832_v9, %v3629_v38  ;;  %v3630_v41 = vadd.f32 %v3609_v5, %v3461_v45 }
 0x37c   : > { %v3665_v54 = vmax.f32 %v3647_v62, 0.0  ;;  %v3648_v40 = vadd.f32 %v6832_v9, %v3630_v41  ;;  %v2053_v9 = vadd.f32 %v2052_v36, %v2051_v44 }
 0x37e   : > { %v3683_v29 = vmul.f32 %v3665_v54, %v6561_v53  ;;  %v3666_v43 = vmax.f32 %v3648_v40, 0.0 }
 0x380   : > { %v3700_v18 = vadd.f32 %v3699_v22, %v3683_v29  ;;  %v3684_v19 = vmul.f32 %v3666_v43, %v6566_v16 }
 0x382   : > { %v3701_v15 = vadd.f32 %v3700_v18, %v3684_v19 }
 0x384   : > { %v3702_v14 = vrot.slane %v3701_v15, 4 }
 0x386   : > { %v3703_v57 = vadd.f32 %v3702_v14, %v3701_v15 }
 0x388   : > { %v3704_v10 = vrot.slane %v3703_v57, 2 }
 0x38a   : > { %v3705_v35 = vadd.f32 %v3704_v10, %v3703_v57 }
 0x38c   : > { %v3706_v6 = vrot.slane %v3705_v35, 1 }
 0x38e   : > { %v3707_v32 = vadd.f32 %v3706_v6, %v3705_v35 }
 0x390   : > { %v3708_v53 = vadd.f32 %v3707_v32, %v2053_v9 }
 0x392   : > { %3709 = vst [vmem:[%s229_s10] sm:$0x1] %v3708_v53 }
 0x393 PF: > { %s14_s19 = sadd.s32 1, %s4992_s19   ;;  %s6998_s15 = smov %s4984_s17 }
 0x394   : > { %p11_p7 = scmp.ge.s32.totalorder %s14_s19, 6   ;;  %s6999_s16 = smov %s4988_s18 }
 0x395   : > { %s7000_s17 = smov %s7003_s20  ;;  %s7001_s18 = smov %s7007_s21 }
 0x396   :  { %13 = sbr.rel (!%p11_p7) target bundleno = 3 (0x3), region = 74 }

</bundles_post_ra>
